<compile_context>
chip_gen: v7x
topology: tpu7x:2x2x1
jax: 0.10.0
libtpu: 0.0.40
codegen_flags: <defaults>
</compile_context>

<pallas_src>
import functools
import math

import jax
import jax.numpy as jnp
from jax.experimental import pallas as pl
from jax.experimental.pallas import tpu as pltpu

_LANE = 128
_LN_EPS = 1e-5
_VMEM_LIMIT = 48 * 1024 * 1024  # fits v7x 64 MiB physical; raises v5e's 16 MiB default


# ----------------------------- Pallas kernels --------------------------------

def _layernorm(x, g, b, eps):
    mean = jnp.mean(x, axis=-1, keepdims=True)
    xc = x - mean
    var = jnp.mean(xc * xc, axis=-1, keepdims=True)
    return xc * jax.lax.rsqrt(var + eps) * g + b


def _stack_layer_kernel(*refs, n_head, causal, has_seg, ln_eps):
    """One nn.TransformerEncoderLayer (post-norm, relu) per (batch, layer) grid step.

    grid = (Bflat, L).  The carried activation lives in o_ref: the output block index
    is constant across the 'arbitrary' layer axis, so the same VMEM buffer is revisited
    for every layer and only written back to HBM once per batch element.

    refs = [x, (seg), in_w, in_b, out_w, out_b, ff1_w, ff1_b, ff2_w, ff2_b,
            ln1_g, ln1_b, ln2_g, ln2_b, o]
    """
    if has_seg:
        x_ref, seg_ref = refs[0], refs[1]
        w_refs = refs[2:-1]
    else:
        x_ref, seg_ref = refs[0], None
        w_refs = refs[1:-1]
    o_ref = refs[-1]
    (in_w_ref, in_b_ref, out_w_ref, out_b_ref,
     ff1_w_ref, ff1_b_ref, ff2_w_ref, ff2_b_ref,
     ln1_g_ref, ln1_b_ref, ln2_g_ref, ln2_b_ref) = w_refs

    l = pl.program_id(1)

    @pl.when(l == 0)
    def _():
        o_ref[...] = x_ref[...]            # seed the carried activation (bf16)

    x = o_ref[0].astype(jnp.float32)       # (S, D): layer l-1 output (or embeddings)
    if has_seg:
        # in-attention conditioning: segment embedding added before every layer
        x = x + seg_ref[0].astype(jnp.float32)

    S, D = x.shape
    H = n_head
    dh = D // H
    scale = 1.0 / math.sqrt(dh)

    # ---- fused QKV projection: single MXU pass, K=D, N=3D ----
    qkv = jnp.dot(x.astype(jnp.bfloat16), in_w_ref[0],
                  preferred_element_type=jnp.float32) + in_b_ref[0]          # (S, 3D)

    # ---- head-batched attention (no per-head Python unroll) ----
    q = jnp.swapaxes(qkv[:, 0 * D:1 * D].reshape(S, H, dh), 0, 1)            # (H,S,dh)
    k = jnp.swapaxes(qkv[:, 1 * D:2 * D].reshape(S, H, dh), 0, 1)
    v = jnp.swapaxes(qkv[:, 2 * D:3 * D].reshape(S, H, dh), 0, 1)

    s = jnp.einsum("hqd,hkd->hqk", q.astype(jnp.bfloat16), k.astype(jnp.bfloat16),
                   preferred_element_type=jnp.float32) * scale               # (H,S,S)
    if causal:
        row = jax.lax.broadcasted_iota(jnp.int32, (S, S), 0)
        col = jax.lax.broadcasted_iota(jnp.int32, (S, S), 1)
        s = s + jnp.where(col <= row, 0.0, -1e9).astype(jnp.float32)[None]

    m = jnp.max(s, axis=-1, keepdims=True)
    p = jnp.exp(s - m)
    p = p * pl.reciprocal(jnp.sum(p, axis=-1, keepdims=True), approx=True)
    ctx = jnp.einsum("hqk,hkd->hqd", p.astype(jnp.bfloat16), v.astype(jnp.bfloat16),
                     preferred_element_type=jnp.float32)                     # (H,S,dh)
    ctx = jnp.swapaxes(ctx, 0, 1).reshape(S, D)

    # ---- single output projection over the concatenated heads ----
    attn = jnp.dot(ctx.astype(jnp.bfloat16), out_w_ref[0],
                   preferred_element_type=jnp.float32) + out_b_ref[0]

    # ---- residual + LN1 ----
    h1 = _layernorm(x + attn, ln1_g_ref[0], ln1_b_ref[0], ln_eps)

    # ---- FFN ----
    ff = jnp.dot(h1.astype(jnp.bfloat16), ff1_w_ref[0],
                 preferred_element_type=jnp.float32) + ff1_b_ref[0]
    ff = jnp.maximum(ff, 0.0)
    ff = jnp.dot(ff.astype(jnp.bfloat16), ff2_w_ref[0],
                 preferred_element_type=jnp.float32) + ff2_b_ref[0]

    # ---- residual + LN2 ----
    y = _layernorm(h1 + ff, ln2_g_ref[0], ln2_b_ref[0], ln_eps)
    o_ref[0] = y.astype(o_ref.dtype)


def fused_transformer_stack(x, stk, n_head, *, causal, seg=None):
    """Run a whole L-layer transformer stack in one pallas_call.

    x:   (Bflat, S, D) bf16 activations
    stk: dict of stacked per-layer weights, each with a leading L axis
    seg: optional (Bflat, S, D) bf16 added before every layer (in-attention cond.)
    """
    Bf, S, D = x.shape
    L = stk["in_w"].shape[0]
    has_seg = seg is not None

    inputs = [x]
    in_specs = [pl.BlockSpec((1, S, D), lambda b, l: (b, 0, 0))]
    if has_seg:
        inputs.append(seg)
        in_specs.append(pl.BlockSpec((1, S, D), lambda b, l: (b, 0, 0)))

    names = ("in_w", "in_b", "out_w", "out_b", "ff1_w", "ff1_b", "ff2_w", "ff2_b",
             "ln1_g", "ln1_b", "ln2_g", "ln2_b")
    w_inputs = [stk[n] for n in names]
    for w in w_inputs:
        # layer-indexed blocks: layer l+1's weights prefetch behind layer l's compute
        in_specs.append(pl.BlockSpec((1,) + w.shape[1:], lambda b, l: (l, 0, 0)))

    return pl.pallas_call(
        functools.partial(_stack_layer_kernel, n_head=n_head, causal=causal,
                          has_seg=has_seg, ln_eps=_LN_EPS),
        out_shape=jax.ShapeDtypeStruct((Bf, S, D), jnp.bfloat16),
        grid=(Bf, L),
        in_specs=in_specs,
        out_specs=pl.BlockSpec((1, S, D), lambda b, l: (b, 0, 0)),
        compiler_params=pltpu.CompilerParams(
            dimension_semantics=("parallel", "arbitrary"),
            vmem_limit_bytes=_VMEM_LIMIT),
    )(*inputs, *w_inputs)


def _linear_kernel(x_ref, w_ref, b_ref, o_ref):
    acc = jnp.dot(x_ref[...].astype(jnp.bfloat16), w_ref[...],
                  preferred_element_type=jnp.float32) + b_ref[...]
    o_ref[...] = acc.astype(o_ref.dtype)


def _pick_tile(n, target, mult):
    """Largest tile <= target that is a multiple of `mult` and divides n (else n)."""
    if n <= target:
        return n
    t = (target // mult) * mult
    while t >= mult and n % t:
        t -= mult
    return t if t >= mult else n


def pallas_linear(x, w, b, *, out_dtype=jnp.float32):
    """y = x @ w + b, tiled over (M, N); both grid axes parallel (megacore-shardable)."""
    M, K = x.shape
    N = w.shape[1]
    tm = _pick_tile(M, 256, 8)
    tn = _pick_tile(N, 512, _LANE)
    return pl.pallas_call(
        _linear_kernel,
        out_shape=jax.ShapeDtypeStruct((M, N), out_dtype),
        grid=(M // tm, N // tn),
        in_specs=[pl.BlockSpec((tm, K), lambda i, j: (i, 0)),
                  pl.BlockSpec((K, tn), lambda i, j: (0, j)),
                  pl.BlockSpec((1, tn), lambda i, j: (0, j))],
        out_specs=pl.BlockSpec((tm, tn), lambda i, j: (i, j)),
        compiler_params=pltpu.CompilerParams(
            dimension_semantics=("parallel", "parallel"),
            vmem_limit_bytes=_VMEM_LIMIT),
    )(x, w, b)


# ----------------------------- model building blocks -------------------------

def sinusoidal_pe(max_len, d):
    pos = jnp.arange(max_len, dtype=jnp.float32)[:, None]
    div = jnp.exp(jnp.arange(0, d, 2, dtype=jnp.float32) * (-math.log(10000.0) / d))
    pe = jnp.zeros((max_len, d), jnp.float32)
    pe = pe.at[:, 0::2].set(jnp.sin(pos * div))
    pe = pe.at[:, 1::2].set(jnp.cos(pos * div))
    return pe


def _round_up(n, m):
    return ((n + m - 1) // m) * m


def _pad_cols(a, n):
    return jnp.pad(a, ((0, 0), (0, n - a.shape[1])))


# ----------------------------- parameter init --------------------------------

def _dense(key, fan_in, fan_out, bias=True):
    w = jax.random.normal(key, (fan_in, fan_out), jnp.float32) * (1.0 / math.sqrt(fan_in))
    b = jnp.zeros((fan_out,), jnp.float32) if bias else None
    return w, b


def init_layer_params(key, d_model, d_ff):
    ks = jax.random.split(key, 4)
    in_w, in_b = _dense(ks[0], d_model, 3 * d_model)
    out_w, out_b = _dense(ks[1], d_model, d_model)
    ff1_w, ff1_b = _dense(ks[2], d_model, d_ff)
    ff2_w, ff2_b = _dense(ks[3], d_ff, d_model)
    return dict(
        in_w=in_w.astype(jnp.bfloat16), in_b=in_b.reshape(1, -1),
        out_w=out_w.astype(jnp.bfloat16), out_b=out_b.reshape(1, -1),
        ff1_w=ff1_w.astype(jnp.bfloat16), ff1_b=ff1_b.reshape(1, -1),
        ff2_w=ff2_w.astype(jnp.bfloat16), ff2_b=ff2_b.reshape(1, -1),
        ln1_g=jnp.ones((1, d_model), jnp.float32), ln1_b=jnp.zeros((1, d_model), jnp.float32),
        ln2_g=jnp.ones((1, d_model), jnp.float32), ln2_b=jnp.zeros((1, d_model), jnp.float32),
    )


def _stack_layers(layers):
    """Stack per-layer weight dicts along a new leading L axis (done once at init)."""
    return {k: jnp.stack([lay[k] for lay in layers]) for k in layers[0]}


def init_params(key, cfg):
    D, dlat, dval = cfg["d_model"], cfg["d_latent"], cfg["d_val"]
    ks = jax.random.split(key, 6 + cfg["enc_layers"] + cfg["dec_layers"])
    params = {}
    params["tok_emb"] = jax.random.normal(ks[0], (cfg["num_emb"], cfg["d_emb"]), jnp.float32) * 0.02
    params["val_emb"] = jax.random.normal(ks[1], (cfg["val_cls"], dval), jnp.float32) * 0.02

    # fused mu/logvar head, padded to a lane-dense (multiple of 128) output slab
    mu_w, mu_b = _dense(ks[2], D, dlat)
    lv_w, lv_b = _dense(ks[3], D, dlat)
    head_n = _round_up(2 * dlat, _LANE)
    params["head_w"] = _pad_cols(jnp.concatenate([mu_w, lv_w], axis=1), head_n).astype(jnp.bfloat16)
    params["head_b"] = _pad_cols(jnp.concatenate([mu_b, lv_b]).reshape(1, -1), head_n)

    seg_w, _ = _dense(ks[4], dlat + dval, D, bias=False)
    params["seg_w"] = seg_w.astype(jnp.bfloat16)
    params["seg_b"] = jnp.zeros((1, D), jnp.float32)

    # output (vocab) projection padded to lane-dense width
    out_w, out_b = _dense(ks[5], D, cfg["num_emb"])
    out_n = _round_up(cfg["num_emb"], _LANE)
    params["out_w"] = _pad_cols(out_w, out_n).astype(jnp.bfloat16)
    params["out_b"] = _pad_cols(out_b.reshape(1, -1), out_n)

    params["enc"] = _stack_layers([init_layer_params(ks[6 + i], D, cfg["d_ff"])
                                   for i in range(cfg["enc_layers"])])
    params["dec"] = _stack_layers([init_layer_params(ks[6 + cfg["enc_layers"] + i], D, cfg["d_ff"])
                                   for i in range(cfg["dec_layers"])])
    params["pe"] = sinusoidal_pe(cfg["max_pos"], cfg["d_emb"])
    return params


# ----------------------------- EmotionWave.forward ---------------------------

def emotionwave_forward(params, cfg, encoder_x, decoder_x, bar_pos, valence_cls, eps):
    D, H = cfg["d_model"], cfg["n_head"]
    dlat, dval = cfg["d_latent"], cfg["d_val"]
    Se, B, NB = encoder_x.shape
    Sd, _ = decoder_x.shape
    pe = params["pe"]
    emb_scale = math.sqrt(cfg["d_emb"])

    # --- encoder: EmbeddingWithProjection + PositionalEncoding (glue), batch-first ---
    enc_emb = jnp.take(params["tok_emb"], encoder_x, axis=0) * emb_scale      # (Se,B,NB,D)
    enc_h = enc_emb.reshape(Se, B * NB, D) + pe[:Se][:, None, :]
    enc_h = jnp.transpose(enc_h, (1, 0, 2)).astype(jnp.bfloat16)              # (B*NB,Se,D)
    # TODO(synk): src_key_padding_mask path omitted (demo passes padding_mask=None);
    #             fold it into an in-kernel additive bias if needed.
    enc_h = fused_transformer_stack(enc_h, params["enc"], H, causal=False)
    h0 = enc_h[:, 0, :]                                                       # (B*NB, D)

    head = pallas_linear(h0, params["head_w"], params["head_b"])              # (B*NB, 128)
    mu = head[:, :dlat]
    logvar = head[:, dlat:2 * dlat]

    # --- reparameterise (eps ~ N(0,1) supplied deterministically) ---
    std = jnp.exp(0.5 * logvar)
    latent = eps * std + mu
    latent_r = latent.reshape(B, NB, dlat)

    # --- decoder input embedding + positional encoding, batch-first ---
    dec_emb = jnp.take(params["tok_emb"], decoder_x, axis=0) * emb_scale      # (Sd,B,D)
    dec_h = jnp.transpose(dec_emb + pe[:Sd][:, None, :], (1, 0, 2)).astype(jnp.bfloat16)

    # --- segment embeddings: per-bar scatter of the VAE latent (glue) ---
    t = jnp.arange(Sd)
    seg_idx = jnp.sum(t[None, :, None] >= bar_pos[:, None, :], axis=-1) - 1   # (B,Sd)
    valid = (seg_idx >= 0) & (seg_idx < NB)
    seg_idx = jnp.clip(seg_idx, 0, NB - 1)
    seg = latent_r[jnp.arange(B)[:, None], seg_idx]                           # (B,Sd,dlat)
    seg = jnp.where(valid[..., None], seg, 0.0)

    # --- valence embedding (d_embed == d_proj -> lookup * sqrt(d)) + concat ---
    val_emb = jnp.take(params["val_emb"], valence_cls, axis=0) * math.sqrt(dval)  # (Sd,B,dval)
    val_emb = jnp.transpose(val_emb, (1, 0, 2))                                   # (B,Sd,dval)
    seg_cat = jnp.concatenate([seg, val_emb], axis=-1)                            # (B,Sd,dlat+dval)

    seg_proj = pallas_linear(seg_cat.reshape(B * Sd, dlat + dval),
                             params["seg_w"], params["seg_b"],
                             out_dtype=jnp.bfloat16).reshape(B, Sd, D)

    # --- in-attention VAETransformerDecoder (causal self-attention) ---
    # TODO(synk): reference may use a distinct per-layer segment projection; a single
    #             shared projection added before every layer is used here.
    h = fused_transformer_stack(dec_h, params["dec"], H, causal=True, seg=seg_proj)

    logits = pallas_linear(h.reshape(B * Sd, D), params["out_w"], params["out_b"])
    logits = logits[:, :cfg["num_emb"]].reshape(B, Sd, cfg["num_emb"])
    logits = jnp.transpose(logits, (1, 0, 2))                                 # (Sd,B,num_emb)
    return mu, logvar, logits


# ----------------------------- demo ------------------------------------------

if __name__ == "__main__":
    cfg = dict(num_emb=40, d_emb=32, d_model=32, n_head=4, d_ff=64,
               d_latent=16, d_val=32, val_cls=8, enc_layers=2, dec_layers=2,
               max_pos=512)

    key = jax.random.PRNGKey(0)
    kp, kx1, kx2, kv, ke = jax.random.split(key, 5)
    params = init_params(kp, cfg)

    Se, B, NB, Sd = 8, 2, 2, 16
    encoder_x = jax.random.randint(kx1, (Se, B, NB), 0, cfg["num_emb"], dtype=jnp.int32)
    decoder_x = jax.random.randint(kx2, (Sd, B), 0, cfg["num_emb"], dtype=jnp.int32)
    bar_pos = jnp.array([[0, 8, 16], [0, 6, 16]], dtype=jnp.int32)            # (B, NB+1)
    valence_cls = jax.random.randint(kv, (Sd, B), 0, cfg["val_cls"], dtype=jnp.int32)
    eps = jax.random.normal(ke, (B * NB, cfg["d_latent"]), jnp.float32)       # randn_like(std)

    fwd = jax.jit(functools.partial(emotionwave_forward, params, cfg))
    mu, logvar, logits = fwd(encoder_x, decoder_x, bar_pos, valence_cls, eps)
    jax.block_until_ready((mu, logvar, logits))

    assert mu.shape == (B * NB, cfg["d_latent"])
    assert logvar.shape == (B * NB, cfg["d_latent"])
    assert logits.shape == (Sd, B, cfg["num_emb"])
    assert bool(jnp.all(jnp.isfinite(mu))) and bool(jnp.all(jnp.isfinite(logits)))
    print("KERNEL_OK")
</pallas_src>

<mosaic_0001>
module attributes {stable_mosaic.version = 11 : i64} {
  func.func @_stack_layer_kernel(%arg0: i32, %arg1: i32, %arg2: memref<1x8x32xbf16, #tpu.memory_space<vmem>>, %arg3: memref<1x32x96xbf16, #tpu.memory_space<vmem>>, %arg4: memref<1x1x96xf32, #tpu.memory_space<vmem>>, %arg5: memref<1x32x32xbf16, #tpu.memory_space<vmem>>, %arg6: memref<1x1x32xf32, #tpu.memory_space<vmem>>, %arg7: memref<1x32x64xbf16, #tpu.memory_space<vmem>>, %arg8: memref<1x1x64xf32, #tpu.memory_space<vmem>>, %arg9: memref<1x64x32xbf16, #tpu.memory_space<vmem>>, %arg10: memref<1x1x32xf32, #tpu.memory_space<vmem>>, %arg11: memref<1x1x32xf32, #tpu.memory_space<vmem>>, %arg12: memref<1x1x32xf32, #tpu.memory_space<vmem>>, %arg13: memref<1x1x32xf32, #tpu.memory_space<vmem>>, %arg14: memref<1x1x32xf32, #tpu.memory_space<vmem>>, %arg15: memref<1x8x32xbf16, #tpu.memory_space<vmem>>) attributes {dimension_semantics = [#tpu.dimension_semantics<parallel>, #tpu.dimension_semantics<arbitrary>], iteration_bounds = array<i64: 4, 2>, scalar_prefetch = 0 : i64, scratch_operands = 0 : i64, tpu.core_type = #tpu.core_type<tc>, window_params = [{transform_indices = @transform_0, window_bounds = array<i64: 1, 8, 32>}, {transform_indices = @transform_1, window_bounds = array<i64: 1, 32, 96>}, {transform_indices = @transform_2, window_bounds = array<i64: 1, 1, 96>}, {transform_indices = @transform_3, window_bounds = array<i64: 1, 32, 32>}, {transform_indices = @transform_4, window_bounds = array<i64: 1, 1, 32>}, {transform_indices = @transform_5, window_bounds = array<i64: 1, 32, 64>}, {transform_indices = @transform_6, window_bounds = array<i64: 1, 1, 64>}, {transform_indices = @transform_7, window_bounds = array<i64: 1, 64, 32>}, {transform_indices = @transform_8, window_bounds = array<i64: 1, 1, 32>}, {transform_indices = @transform_9, window_bounds = array<i64: 1, 1, 32>}, {transform_indices = @transform_10, window_bounds = array<i64: 1, 1, 32>}, {transform_indices = @transform_11, window_bounds = array<i64: 1, 1, 32>}, {transform_indices = @transform_12, window_bounds = array<i64: 1, 1, 32>}, {transform_indices = @transform_13, window_bounds = array<i64: 1, 8, 32>}]} {
    %c0_i32 = arith.constant 0 : i32
    %0 = arith.cmpi eq, %arg1, %c0_i32 : i32
    %1 = arith.extui %0 : i1 to i32
    %c0_i32_0 = arith.constant 0 : i32
    %2 = arith.cmpi ne, %1, %c0_i32_0 : i32
    scf.if %2 {
      %c0_61 = arith.constant 0 : index
      %c0_62 = arith.constant 0 : index
      %c0_63 = arith.constant 0 : index
      %123 = vector.load %arg2[%c0_61, %c0_62, %c0_63] : memref<1x8x32xbf16, #tpu.memory_space<vmem>>, vector<1x8x32xbf16>
      %c0_64 = arith.constant 0 : index
      %c0_65 = arith.constant 0 : index
      %c0_66 = arith.constant 0 : index
      %124 = vector.load %arg15[%c0_64, %c0_65, %c0_66] : memref<1x8x32xbf16, #tpu.memory_space<vmem>>, vector<1x8x32xbf16>
      tpu.vector_store %arg15[%c0_64, %c0_65, %c0_66], %123 {strides = array<i32>} : memref<1x8x32xbf16, #tpu.memory_space<vmem>>, vector<1x8x32xbf16>,
    } else {
    }
    %c0 = arith.constant 0 : index
    %c0_1 = arith.constant 0 : index
    %c0_2 = arith.constant 0 : index
    %3 = vector.load %arg15[%c0, %c0_1, %c0_2] : memref<1x8x32xbf16, #tpu.memory_space<vmem>>, vector<1x8x32xbf16>
    %4 = vector.shape_cast %3 : vector<1x8x32xbf16> to vector<8x32xbf16>
    %5 = arith.extf %4 : vector<8x32xbf16> to vector<8x32xf32>
    %6 = arith.truncf %5 : vector<8x32xf32> to vector<8x32xbf16>
    %c0_3 = arith.constant 0 : index
    %c0_4 = arith.constant 0 : index
    %c0_5 = arith.constant 0 : index
    %7 = vector.load %arg3[%c0_3, %c0_4, %c0_5] : memref<1x32x96xbf16, #tpu.memory_space<vmem>>, vector<1x32x96xbf16>
    %8 = vector.shape_cast %7 : vector<1x32x96xbf16> to vector<32x96xbf16>
    %cst = arith.constant dense<0.000000e+00> : vector<8x96xf32>
    %9 = tpu.matmul %6, %8, %cst {dimension_numbers = #tpu.dot_dimension_numbers<[1], [0], [0], [1], [0, 0, 1, 1], [], []>} : vector<8x32xbf16>, vector<32x96xbf16>, vector<8x96xf32> -> vector<8x96xf32>
    %c0_6 = arith.constant 0 : index
    %c0_7 = arith.constant 0 : index
    %c0_8 = arith.constant 0 : index
    %10 = vector.load %arg4[%c0_6, %c0_7, %c0_8] : memref<1x1x96xf32, #tpu.memory_space<vmem>>, vector<1x1x96xf32>
    %11 = vector.shape_cast %10 : vector<1x1x96xf32> to vector<1x96xf32>
    %12 = vector.broadcast %11 : vector<1x96xf32> to vector<8x96xf32>
    %13 = arith.addf %9, %12 : vector<8x96xf32>
    %14 = vector.extract_strided_slice %13 {offsets = [0, 0], sizes = [8, 32], strides = [1, 1]} : vector<8x96xf32> to vector<8x32xf32>
    %15 = vector.shape_cast %14 : vector<8x32xf32> to vector<8x4x8xf32>
    %16 = tpu.transpose %15, [1, 0, 2] : vector<8x4x8xf32> -> vector<4x8x8xf32>
    %17 = vector.extract_strided_slice %13 {offsets = [0, 32], sizes = [8, 32], strides = [1, 1]} : vector<8x96xf32> to vector<8x32xf32>
    %18 = vector.shape_cast %17 : vector<8x32xf32> to vector<8x4x8xf32>
    %19 = tpu.transpose %18, [1, 0, 2] : vector<8x4x8xf32> -> vector<4x8x8xf32>
    %20 = vector.extract_strided_slice %13 {offsets = [0, 64], sizes = [8, 32], strides = [1, 1]} : vector<8x96xf32> to vector<8x32xf32>
    %21 = vector.shape_cast %20 : vector<8x32xf32> to vector<8x4x8xf32>
    %22 = tpu.transpose %21, [1, 0, 2] : vector<8x4x8xf32> -> vector<4x8x8xf32>
    %23 = arith.truncf %16 : vector<4x8x8xf32> to vector<4x8x8xbf16>
    %24 = arith.truncf %19 : vector<4x8x8xf32> to vector<4x8x8xbf16>
    "tpu.trace_start"() <{level = 10 : i32, message = "hqd,hkd->hqk"}> : () -> ()
    %cst_9 = arith.constant dense<0.000000e+00> : vector<4x8x8xf32>
    %25 = tpu.matmul %23, %24, %cst_9 {dimension_numbers = #tpu.dot_dimension_numbers<[2], [2], [1], [1], [0, 0, 0, 1, 1, 1], [0], [0]>} : vector<4x8x8xbf16>, vector<4x8x8xbf16>, vector<4x8x8xf32> -> vector<4x8x8xf32>
    "tpu.trace_stop"() : () -> ()
    %cst_10 = arith.constant 0.353553385 : f32
    %26 = vector.broadcast %cst_10 : f32 to vector<4x8x8xf32>
    %27 = arith.mulf %25, %26 : vector<4x8x8xf32>
    %cst_11 = arith.constant dense<0xFF800000> : vector<4x8xf32>
    %28 = vector.multi_reduction <maximumf>, %27, %cst_11 [2] : vector<4x8x8xf32> to vector<4x8xf32>
    %29 = vector.shape_cast %28 : vector<4x8xf32> to vector<4x8x1xf32>
    %30 = vector.broadcast %29 : vector<4x8x1xf32> to vector<4x8x8xf32>
    %31 = arith.subf %27, %30 : vector<4x8x8xf32>
    %32 = math.exp %31 : vector<4x8x8xf32>
    %cst_12 = arith.constant dense<0.000000e+00> : vector<4x8xf32>
    %33 = vector.multi_reduction <add>, %32, %cst_12 [2] : vector<4x8x8xf32> to vector<4x8xf32>
    %34 = vector.shape_cast %33 : vector<4x8xf32> to vector<4x8x1xf32>
    %35 = tpu.reciprocal %34 {approx = true} : vector<4x8x1xf32> -> vector<4x8x1xf32>
    %36 = vector.broadcast %35 : vector<4x8x1xf32> to vector<4x8x8xf32>
    %37 = arith.mulf %32, %36 : vector<4x8x8xf32>
    %38 = arith.truncf %37 : vector<4x8x8xf32> to vector<4x8x8xbf16>
    %39 = arith.truncf %22 : vector<4x8x8xf32> to vector<4x8x8xbf16>
    "tpu.trace_start"() <{level = 10 : i32, message = "hqk,hkd->hqd"}> : () -> ()
    %cst_13 = arith.constant dense<0.000000e+00> : vector<4x8x8xf32>
    %40 = tpu.matmul %38, %39, %cst_13 {dimension_numbers = #tpu.dot_dimension_numbers<[2], [1], [1], [2], [0, 0, 0, 1, 1, 2], [0], [0]>} : vector<4x8x8xbf16>, vector<4x8x8xbf16>, vector<4x8x8xf32> -> vector<4x8x8xf32>
    "tpu.trace_stop"() : () -> ()
    %41 = tpu.transpose %40, [1, 0, 2] : vector<4x8x8xf32> -> vector<8x4x8xf32>
    %42 = vector.shape_cast %41 : vector<8x4x8xf32> to vector<8x32xf32>
    %43 = arith.truncf %42 : vector<8x32xf32> to vector<8x32xbf16>
    %c0_14 = arith.constant 0 : index
    %c0_15 = arith.constant 0 : index
    %c0_16 = arith.constant 0 : index
    %44 = vector.load %arg5[%c0_14, %c0_15, %c0_16] : memref<1x32x32xbf16, #tpu.memory_space<vmem>>, vector<1x32x32xbf16>
    %45 = vector.shape_cast %44 : vector<1x32x32xbf16> to vector<32x32xbf16>
    %cst_17 = arith.constant dense<0.000000e+00> : vector<8x32xf32>
    %46 = tpu.matmul %43, %45, %cst_17 {dimension_numbers = #tpu.dot_dimension_numbers<[1], [0], [0], [1], [0, 0, 1, 1], [], []>} : vector<8x32xbf16>, vector<32x32xbf16>, vector<8x32xf32> -> vector<8x32xf32>
    %c0_18 = arith.constant 0 : index
    %c0_19 = arith.constant 0 : index
    %c0_20 = arith.constant 0 : index
    %47 = vector.load %arg6[%c0_18, %c0_19, %c0_20] : memref<1x1x32xf32, #tpu.memory_space<vmem>>, vector<1x1x32xf32>
    %48 = vector.shape_cast %47 : vector<1x1x32xf32> to vector<1x32xf32>
    %49 = vector.broadcast %48 : vector<1x32xf32> to vector<8x32xf32>
    %50 = arith.addf %46, %49 : vector<8x32xf32>
    %51 = arith.addf %5, %50 : vector<8x32xf32>
    %c0_21 = arith.constant 0 : index
    %c0_22 = arith.constant 0 : index
    %c0_23 = arith.constant 0 : index
    %52 = vector.load %arg11[%c0_21, %c0_22, %c0_23] : memref<1x1x32xf32, #tpu.memory_space<vmem>>, vector<1x1x32xf32>
    %53 = vector.shape_cast %52 : vector<1x1x32xf32> to vector<1x32xf32>
    %c0_24 = arith.constant 0 : index
    %c0_25 = arith.constant 0 : index
    %c0_26 = arith.constant 0 : index
    %54 = vector.load %arg12[%c0_24, %c0_25, %c0_26] : memref<1x1x32xf32, #tpu.memory_space<vmem>>, vector<1x1x32xf32>
    %55 = vector.shape_cast %54 : vector<1x1x32xf32> to vector<1x32xf32>
    %cst_27 = arith.constant dense<0.000000e+00> : vector<8xf32>
    %56 = vector.multi_reduction <add>, %51, %cst_27 [1] : vector<8x32xf32> to vector<8xf32>
    %57 = vector.shape_cast %56 : vector<8xf32> to vector<8x1xf32>
    %cst_28 = arith.constant 3.200000e+01 : f32
    %58 = vector.broadcast %cst_28 : f32 to vector<8x1xf32>
    %59 = arith.divf %57, %58 : vector<8x1xf32>
    %60 = vector.broadcast %59 : vector<8x1xf32> to vector<8x32xf32>
    %61 = arith.subf %51, %60 : vector<8x32xf32>
    %62 = arith.mulf %61, %61 : vector<8x32xf32>
    %cst_29 = arith.constant dense<0.000000e+00> : vector<8xf32>
    %63 = vector.multi_reduction <add>, %62, %cst_29 [1] : vector<8x32xf32> to vector<8xf32>
    %64 = vector.shape_cast %63 : vector<8xf32> to vector<8x1xf32>
    %cst_30 = arith.constant 3.200000e+01 : f32
    %65 = vector.broadcast %cst_30 : f32 to vector<8x1xf32>
    %66 = arith.divf %64, %65 : vector<8x1xf32>
    %cst_31 = arith.constant 9.99999974E-6 : f32
    %67 = vector.broadcast %cst_31 : f32 to vector<8x1xf32>
    %68 = arith.addf %66, %67 : vector<8x1xf32>
    %69 = math.rsqrt %68 : vector<8x1xf32>
    %70 = vector.broadcast %69 : vector<8x1xf32> to vector<8x32xf32>
    %71 = arith.mulf %61, %70 : vector<8x32xf32>
    %72 = vector.broadcast %53 : vector<1x32xf32> to vector<8x32xf32>
    %73 = arith.mulf %71, %72 : vector<8x32xf32>
    %74 = vector.broadcast %55 : vector<1x32xf32> to vector<8x32xf32>
    %75 = arith.addf %73, %74 : vector<8x32xf32>
    %76 = arith.truncf %75 : vector<8x32xf32> to vector<8x32xbf16>
    %c0_32 = arith.constant 0 : index
    %c0_33 = arith.constant 0 : index
    %c0_34 = arith.constant 0 : index
    %77 = vector.load %arg7[%c0_32, %c0_33, %c0_34] : memref<1x32x64xbf16, #tpu.memory_space<vmem>>, vector<1x32x64xbf16>
    %78 = vector.shape_cast %77 : vector<1x32x64xbf16> to vector<32x64xbf16>
    %cst_35 = arith.constant dense<0.000000e+00> : vector<8x64xf32>
    %79 = tpu.matmul %76, %78, %cst_35 {dimension_numbers = #tpu.dot_dimension_numbers<[1], [0], [0], [1], [0, 0, 1, 1], [], []>} : vector<8x32xbf16>, vector<32x64xbf16>, vector<8x64xf32> -> vector<8x64xf32>
    %c0_36 = arith.constant 0 : index
    %c0_37 = arith.constant 0 : index
    %c0_38 = arith.constant 0 : index
    %80 = vector.load %arg8[%c0_36, %c0_37, %c0_38] : memref<1x1x64xf32, #tpu.memory_space<vmem>>, vector<1x1x64xf32>
    %81 = vector.shape_cast %80 : vector<1x1x64xf32> to vector<1x64xf32>
    %82 = vector.broadcast %81 : vector<1x64xf32> to vector<8x64xf32>
    %83 = arith.addf %79, %82 : vector<8x64xf32>
    %cst_39 = arith.constant 0.000000e+00 : f32
    %84 = vector.broadcast %cst_39 : f32 to vector<8x64xf32>
    %85 = arith.maximumf %83, %84 : vector<8x64xf32>
    %86 = arith.truncf %85 : vector<8x64xf32> to vector<8x64xbf16>
    %c0_40 = arith.constant 0 : index
    %c0_41 = arith.constant 0 : index
    %c0_42 = arith.constant 0 : index
    %87 = vector.load %arg9[%c0_40, %c0_41, %c0_42] : memref<1x64x32xbf16, #tpu.memory_space<vmem>>, vector<1x64x32xbf16>
    %88 = vector.shape_cast %87 : vector<1x64x32xbf16> to vector<64x32xbf16>
    %cst_43 = arith.constant dense<0.000000e+00> : vector<8x32xf32>
    %89 = tpu.matmul %86, %88, %cst_43 {dimension_numbers = #tpu.dot_dimension_numbers<[1], [0], [0], [1], [0, 0, 1, 1], [], []>} : vector<8x64xbf16>, vector<64x32xbf16>, vector<8x32xf32> -> vector<8x32xf32>
    %c0_44 = arith.constant 0 : index
    %c0_45 = arith.constant 0 : index
    %c0_46 = arith.constant 0 : index
    %90 = vector.load %arg10[%c0_44, %c0_45, %c0_46] : memref<1x1x32xf32, #tpu.memory_space<vmem>>, vector<1x1x32xf32>
    %91 = vector.shape_cast %90 : vector<1x1x32xf32> to vector<1x32xf32>
    %92 = vector.broadcast %91 : vector<1x32xf32> to vector<8x32xf32>
    %93 = arith.addf %89, %92 : vector<8x32xf32>
    %94 = arith.addf %75, %93 : vector<8x32xf32>
    %c0_47 = arith.constant 0 : index
    %c0_48 = arith.constant 0 : index
    %c0_49 = arith.constant 0 : index
    %95 = vector.load %arg13[%c0_47, %c0_48, %c0_49] : memref<1x1x32xf32, #tpu.memory_space<vmem>>, vector<1x1x32xf32>
    %96 = vector.shape_cast %95 : vector<1x1x32xf32> to vector<1x32xf32>
    %c0_50 = arith.constant 0 : index
    %c0_51 = arith.constant 0 : index
    %c0_52 = arith.constant 0 : index
    %97 = vector.load %arg14[%c0_50, %c0_51, %c0_52] : memref<1x1x32xf32, #tpu.memory_space<vmem>>, vector<1x1x32xf32>
    %98 = vector.shape_cast %97 : vector<1x1x32xf32> to vector<1x32xf32>
    %cst_53 = arith.constant dense<0.000000e+00> : vector<8xf32>
    %99 = vector.multi_reduction <add>, %94, %cst_53 [1] : vector<8x32xf32> to vector<8xf32>
    %100 = vector.shape_cast %99 : vector<8xf32> to vector<8x1xf32>
    %cst_54 = arith.constant 3.200000e+01 : f32
    %101 = vector.broadcast %cst_54 : f32 to vector<8x1xf32>
    %102 = arith.divf %100, %101 : vector<8x1xf32>
    %103 = vector.broadcast %102 : vector<8x1xf32> to vector<8x32xf32>
    %104 = arith.subf %94, %103 : vector<8x32xf32>
    %105 = arith.mulf %104, %104 : vector<8x32xf32>
    %cst_55 = arith.constant dense<0.000000e+00> : vector<8xf32>
    %106 = vector.multi_reduction <add>, %105, %cst_55 [1] : vector<8x32xf32> to vector<8xf32>
    %107 = vector.shape_cast %106 : vector<8xf32> to vector<8x1xf32>
    %cst_56 = arith.constant 3.200000e+01 : f32
    %108 = vector.broadcast %cst_56 : f32 to vector<8x1xf32>
    %109 = arith.divf %107, %108 : vector<8x1xf32>
    %cst_57 = arith.constant 9.99999974E-6 : f32
    %110 = vector.broadcast %cst_57 : f32 to vector<8x1xf32>
    %111 = arith.addf %109, %110 : vector<8x1xf32>
    %112 = math.rsqrt %111 : vector<8x1xf32>
    %113 = vector.broadcast %112 : vector<8x1xf32> to vector<8x32xf32>
    %114 = arith.mulf %104, %113 : vector<8x32xf32>
    %115 = vector.broadcast %96 : vector<1x32xf32> to vector<8x32xf32>
    %116 = arith.mulf %114, %115 : vector<8x32xf32>
    %117 = vector.broadcast %98 : vector<1x32xf32> to vector<8x32xf32>
    %118 = arith.addf %116, %117 : vector<8x32xf32>
    %119 = arith.truncf %118 : vector<8x32xf32> to vector<8x32xbf16>
    %c0_58 = arith.constant 0 : index
    %c0_59 = arith.constant 0 : index
    %c0_60 = arith.constant 0 : index
    %120 = vector.load %arg15[%c0_58, %c0_59, %c0_60] : memref<1x8x32xbf16, #tpu.memory_space<vmem>>, vector<1x8x32xbf16>
    %121 = vector.shape_cast %120 : vector<1x8x32xbf16> to vector<8x32xbf16>
    %122 = vector.shape_cast %119 : vector<8x32xbf16> to vector<1x8x32xbf16>
    tpu.vector_store %arg15[%c0_58, %c0_59, %c0_60], %122 {strides = array<i32>} : memref<1x8x32xbf16, #tpu.memory_space<vmem>>, vector<1x8x32xbf16>,
    return
  }
  func.func @transform_0(%arg0: i32, %arg1: i32) -> (i32, i32, i32) {
    %c0_i32 = arith.constant 0 : i32
    %c0_i32_0 = arith.constant 0 : i32
    %c0_i32_1 = arith.constant 0 : i32
    return %arg0, %c0_i32, %c0_i32_0 : i32, i32, i32
  }
  func.func @transform_1(%arg0: i32, %arg1: i32) -> (i32, i32, i32) {
    %c0_i32 = arith.constant 0 : i32
    %c0_i32_0 = arith.constant 0 : i32
    %c0_i32_1 = arith.constant 0 : i32
    return %arg1, %c0_i32, %c0_i32_0 : i32, i32, i32
  }
  func.func @transform_2(%arg0: i32, %arg1: i32) -> (i32, i32, i32) {
    %c0_i32 = arith.constant 0 : i32
    %c0_i32_0 = arith.constant 0 : i32
    %c0_i32_1 = arith.constant 0 : i32
    return %arg1, %c0_i32, %c0_i32_0 : i32, i32, i32
  }
  func.func @transform_3(%arg0: i32, %arg1: i32) -> (i32, i32, i32) {
    %c0_i32 = arith.constant 0 : i32
    %c0_i32_0 = arith.constant 0 : i32
    %c0_i32_1 = arith.constant 0 : i32
    return %arg1, %c0_i32, %c0_i32_0 : i32, i32, i32
  }
  func.func @transform_4(%arg0: i32, %arg1: i32) -> (i32, i32, i32) {
    %c0_i32 = arith.constant 0 : i32
    %c0_i32_0 = arith.constant 0 : i32
    %c0_i32_1 = arith.constant 0 : i32
    return %arg1, %c0_i32, %c0_i32_0 : i32, i32, i32
  }
  func.func @transform_5(%arg0: i32, %arg1: i32) -> (i32, i32, i32) {
    %c0_i32 = arith.constant 0 : i32
    %c0_i32_0 = arith.constant 0 : i32
    %c0_i32_1 = arith.constant 0 : i32
    return %arg1, %c0_i32, %c0_i32_0 : i32, i32, i32
  }
  func.func @transform_6(%arg0: i32, %arg1: i32) -> (i32, i32, i32) {
    %c0_i32 = arith.constant 0 : i32
    %c0_i32_0 = arith.constant 0 : i32
    %c0_i32_1 = arith.constant 0 : i32
    return %arg1, %c0_i32, %c0_i32_0 : i32, i32, i32
  }
  func.func @transform_7(%arg0: i32, %arg1: i32) -> (i32, i32, i32) {
    %c0_i32 = arith.constant 0 : i32
    %c0_i32_0 = arith.constant 0 : i32
    %c0_i32_1 = arith.constant 0 : i32
    return %arg1, %c0_i32, %c0_i32_0 : i32, i32, i32
  }
  func.func @transform_8(%arg0: i32, %arg1: i32) -> (i32, i32, i32) {
    %c0_i32 = arith.constant 0 : i32
    %c0_i32_0 = arith.constant 0 : i32
    %c0_i32_1 = arith.constant 0 : i32
    return %arg1, %c0_i32, %c0_i32_0 : i32, i32, i32
  }
  func.func @transform_9(%arg0: i32, %arg1: i32) -> (i32, i32, i32) {
    %c0_i32 = arith.constant 0 : i32
    %c0_i32_0 = arith.constant 0 : i32
    %c0_i32_1 = arith.constant 0 : i32
    return %arg1, %c0_i32, %c0_i32_0 : i32, i32, i32
  }
  func.func @transform_10(%arg0: i32, %arg1: i32) -> (i32, i32, i32) {
    %c0_i32 = arith.constant 0 : i32
    %c0_i32_0 = arith.constant 0 : i32
    %c0_i32_1 = arith.constant 0 : i32
    return %arg1, %c0_i32, %c0_i32_0 : i32, i32, i32
  }
  func.func @transform_11(%arg0: i32, %arg1: i32) -> (i32, i32, i32) {
    %c0_i32 = arith.constant 0 : i32
    %c0_i32_0 = arith.constant 0 : i32
    %c0_i32_1 = arith.constant 0 : i32
    return %arg1, %c0_i32, %c0_i32_0 : i32, i32, i32
  }
  func.func @transform_12(%arg0: i32, %arg1: i32) -> (i32, i32, i32) {
    %c0_i32 = arith.constant 0 : i32
    %c0_i32_0 = arith.constant 0 : i32
    %c0_i32_1 = arith.constant 0 : i32
    return %arg1, %c0_i32, %c0_i32_0 : i32, i32, i32
  }
  func.func @transform_13(%arg0: i32, %arg1: i32) -> (i32, i32, i32) {
    %c0_i32 = arith.constant 0 : i32
    %c0_i32_0 = arith.constant 0 : i32
    %c0_i32_1 = arith.constant 0 : i32
    return %arg0, %c0_i32, %c0_i32_0 : i32, i32, i32
  }
}

module attributes {stable_mosaic.version = 11 : i64} {
  func.func @_linear_kernel(%arg0: i32, %arg1: i32, %arg2: memref<4x32xbf16, #tpu.memory_space<vmem>>, %arg3: memref<32x128xbf16, #tpu.memory_space<vmem>>, %arg4: memref<1x128xf32, #tpu.memory_space<vmem>>, %arg5: memref<4x128xf32, #tpu.memory_space<vmem>>) attributes {dimension_semantics = [#tpu.dimension_semantics<parallel>, #tpu.dimension_semantics<parallel>], iteration_bounds = array<i64: 1, 1>, scalar_prefetch = 0 : i64, scratch_operands = 0 : i64, tpu.core_type = #tpu.core_type<tc>, window_params = [{transform_indices = @transform_0, window_bounds = array<i64: 4, 32>}, {transform_indices = @transform_1, window_bounds = array<i64: 32, 128>}, {transform_indices = @transform_2, window_bounds = array<i64: 1, 128>}, {transform_indices = @transform_3, window_bounds = array<i64: 4, 128>}]} {
    %c0 = arith.constant 0 : index
    %c0_0 = arith.constant 0 : index
    %0 = vector.load %arg2[%c0, %c0_0] : memref<4x32xbf16, #tpu.memory_space<vmem>>, vector<4x32xbf16>
    %c0_1 = arith.constant 0 : index
    %c0_2 = arith.constant 0 : index
    %1 = vector.load %arg3[%c0_1, %c0_2] : memref<32x128xbf16, #tpu.memory_space<vmem>>, vector<32x128xbf16>
    %cst = arith.constant dense<0.000000e+00> : vector<4x128xf32>
    %2 = tpu.matmul %0, %1, %cst {dimension_numbers = #tpu.dot_dimension_numbers<[1], [0], [0], [1], [0, 0, 1, 1], [], []>} : vector<4x32xbf16>, vector<32x128xbf16>, vector<4x128xf32> -> vector<4x128xf32>
    %c0_3 = arith.constant 0 : index
    %c0_4 = arith.constant 0 : index
    %3 = vector.load %arg4[%c0_3, %c0_4] : memref<1x128xf32, #tpu.memory_space<vmem>>, vector<1x128xf32>
    %4 = vector.broadcast %3 : vector<1x128xf32> to vector<4x128xf32>
    %5 = arith.addf %2, %4 : vector<4x128xf32>
    %c0_5 = arith.constant 0 : index
    %c0_6 = arith.constant 0 : index
    %6 = vector.load %arg5[%c0_5, %c0_6] : memref<4x128xf32, #tpu.memory_space<vmem>>, vector<4x128xf32>
    tpu.vector_store %arg5[%c0_5, %c0_6], %5 {strides = array<i32>} : memref<4x128xf32, #tpu.memory_space<vmem>>, vector<4x128xf32>,
    return
  }
  func.func @transform_0(%arg0: i32, %arg1: i32) -> (i32, i32) {
    %c0_i32 = arith.constant 0 : i32
    %c0_i32_0 = arith.constant 0 : i32
    return %arg0, %c0_i32 : i32, i32
  }
  func.func @transform_1(%arg0: i32, %arg1: i32) -> (i32, i32) {
    %c0_i32 = arith.constant 0 : i32
    %c0_i32_0 = arith.constant 0 : i32
    return %c0_i32, %arg1 : i32, i32
  }
  func.func @transform_2(%arg0: i32, %arg1: i32) -> (i32, i32) {
    %c0_i32 = arith.constant 0 : i32
    %c0_i32_0 = arith.constant 0 : i32
    return %c0_i32, %arg1 : i32, i32
  }
  func.func @transform_3(%arg0: i32, %arg1: i32) -> (i32, i32) {
    %c0_i32 = arith.constant 0 : i32
    return %arg0, %arg1 : i32, i32
  }
}

module attributes {stable_mosaic.version = 11 : i64} {
  func.func @_linear_kernel(%arg0: i32, %arg1: i32, %arg2: memref<32x48xf32, #tpu.memory_space<vmem>>, %arg3: memref<48x32xbf16, #tpu.memory_space<vmem>>, %arg4: memref<1x32xf32, #tpu.memory_space<vmem>>, %arg5: memref<32x32xbf16, #tpu.memory_space<vmem>>) attributes {dimension_semantics = [#tpu.dimension_semantics<parallel>, #tpu.dimension_semantics<parallel>], iteration_bounds = array<i64: 1, 1>, scalar_prefetch = 0 : i64, scratch_operands = 0 : i64, tpu.core_type = #tpu.core_type<tc>, window_params = [{transform_indices = @transform_0, window_bounds = array<i64: 32, 48>}, {transform_indices = @transform_1, window_bounds = array<i64: 48, 32>}, {transform_indices = @transform_2, window_bounds = array<i64: 1, 32>}, {transform_indices = @transform_3, window_bounds = array<i64: 32, 32>}]} {
    %c0 = arith.constant 0 : index
    %c0_0 = arith.constant 0 : index
    %0 = vector.load %arg2[%c0, %c0_0] : memref<32x48xf32, #tpu.memory_space<vmem>>, vector<32x48xf32>
    %1 = arith.truncf %0 : vector<32x48xf32> to vector<32x48xbf16>
    %c0_1 = arith.constant 0 : index
    %c0_2 = arith.constant 0 : index
    %2 = vector.load %arg3[%c0_1, %c0_2] : memref<48x32xbf16, #tpu.memory_space<vmem>>, vector<48x32xbf16>
    %cst = arith.constant dense<0.000000e+00> : vector<32x32xf32>
    %3 = tpu.matmul %1, %2, %cst {dimension_numbers = #tpu.dot_dimension_numbers<[1], [0], [0], [1], [0, 0, 1, 1], [], []>} : vector<32x48xbf16>, vector<48x32xbf16>, vector<32x32xf32> -> vector<32x32xf32>
    %c0_3 = arith.constant 0 : index
    %c0_4 = arith.constant 0 : index
    %4 = vector.load %arg4[%c0_3, %c0_4] : memref<1x32xf32, #tpu.memory_space<vmem>>, vector<1x32xf32>
    %5 = vector.broadcast %4 : vector<1x32xf32> to vector<32x32xf32>
    %6 = arith.addf %3, %5 : vector<32x32xf32>
    %7 = arith.truncf %6 : vector<32x32xf32> to vector<32x32xbf16>
    %c0_5 = arith.constant 0 : index
    %c0_6 = arith.constant 0 : index
    %8 = vector.load %arg5[%c0_5, %c0_6] : memref<32x32xbf16, #tpu.memory_space<vmem>>, vector<32x32xbf16>
    tpu.vector_store %arg5[%c0_5, %c0_6], %7 {strides = array<i32>} : memref<32x32xbf16, #tpu.memory_space<vmem>>, vector<32x32xbf16>,
    return
  }
  func.func @transform_0(%arg0: i32, %arg1: i32) -> (i32, i32) {
    %c0_i32 = arith.constant 0 : i32
    %c0_i32_0 = arith.constant 0 : i32
    return %arg0, %c0_i32 : i32, i32
  }
  func.func @transform_1(%arg0: i32, %arg1: i32) -> (i32, i32) {
    %c0_i32 = arith.constant 0 : i32
    %c0_i32_0 = arith.constant 0 : i32
    return %c0_i32, %arg1 : i32, i32
  }
  func.func @transform_2(%arg0: i32, %arg1: i32) -> (i32, i32) {
    %c0_i32 = arith.constant 0 : i32
    %c0_i32_0 = arith.constant 0 : i32
    return %c0_i32, %arg1 : i32, i32
  }
  func.func @transform_3(%arg0: i32, %arg1: i32) -> (i32, i32) {
    %c0_i32 = arith.constant 0 : i32
    return %arg0, %arg1 : i32, i32
  }
}

module attributes {stable_mosaic.version = 11 : i64} {
  func.func @_linear_kernel(%arg0: i32, %arg1: i32, %arg2: memref<32x32xbf16, #tpu.memory_space<vmem>>, %arg3: memref<32x128xbf16, #tpu.memory_space<vmem>>, %arg4: memref<1x128xf32, #tpu.memory_space<vmem>>, %arg5: memref<32x128xf32, #tpu.memory_space<vmem>>) attributes {dimension_semantics = [#tpu.dimension_semantics<parallel>, #tpu.dimension_semantics<parallel>], iteration_bounds = array<i64: 1, 1>, scalar_prefetch = 0 : i64, scratch_operands = 0 : i64, tpu.core_type = #tpu.core_type<tc>, window_params = [{transform_indices = @transform_0, window_bounds = array<i64: 32, 32>}, {transform_indices = @transform_1, window_bounds = array<i64: 32, 128>}, {transform_indices = @transform_2, window_bounds = array<i64: 1, 128>}, {transform_indices = @transform_3, window_bounds = array<i64: 32, 128>}]} {
    %c0 = arith.constant 0 : index
    %c0_0 = arith.constant 0 : index
    %0 = vector.load %arg2[%c0, %c0_0] : memref<32x32xbf16, #tpu.memory_space<vmem>>, vector<32x32xbf16>
    %c0_1 = arith.constant 0 : index
    %c0_2 = arith.constant 0 : index
    %1 = vector.load %arg3[%c0_1, %c0_2] : memref<32x128xbf16, #tpu.memory_space<vmem>>, vector<32x128xbf16>
    %cst = arith.constant dense<0.000000e+00> : vector<32x128xf32>
    %2 = tpu.matmul %0, %1, %cst {dimension_numbers = #tpu.dot_dimension_numbers<[1], [0], [0], [1], [0, 0, 1, 1], [], []>} : vector<32x32xbf16>, vector<32x128xbf16>, vector<32x128xf32> -> vector<32x128xf32>
    %c0_3 = arith.constant 0 : index
    %c0_4 = arith.constant 0 : index
    %3 = vector.load %arg4[%c0_3, %c0_4] : memref<1x128xf32, #tpu.memory_space<vmem>>, vector<1x128xf32>
    %4 = vector.broadcast %3 : vector<1x128xf32> to vector<32x128xf32>
    %5 = arith.addf %2, %4 : vector<32x128xf32>
    %c0_5 = arith.constant 0 : index
    %c0_6 = arith.constant 0 : index
    %6 = vector.load %arg5[%c0_5, %c0_6] : memref<32x128xf32, #tpu.memory_space<vmem>>, vector<32x128xf32>
    tpu.vector_store %arg5[%c0_5, %c0_6], %5 {strides = array<i32>} : memref<32x128xf32, #tpu.memory_space<vmem>>, vector<32x128xf32>,
    return
  }
  func.func @transform_0(%arg0: i32, %arg1: i32) -> (i32, i32) {
    %c0_i32 = arith.constant 0 : i32
    %c0_i32_0 = arith.constant 0 : i32
    return %arg0, %c0_i32 : i32, i32
  }
  func.func @transform_1(%arg0: i32, %arg1: i32) -> (i32, i32) {
    %c0_i32 = arith.constant 0 : i32
    %c0_i32_0 = arith.constant 0 : i32
    return %c0_i32, %arg1 : i32, i32
  }
  func.func @transform_2(%arg0: i32, %arg1: i32) -> (i32, i32) {
    %c0_i32 = arith.constant 0 : i32
    %c0_i32_0 = arith.constant 0 : i32
    return %c0_i32, %arg1 : i32, i32
  }
  func.func @transform_3(%arg0: i32, %arg1: i32) -> (i32, i32) {
    %c0_i32 = arith.constant 0 : i32
    return %arg0, %arg1 : i32, i32
  }
}

module attributes {stable_mosaic.version = 11 : i64} {
  func.func @_stack_layer_kernel(%arg0: i32, %arg1: i32, %arg2: memref<1x16x32xbf16, #tpu.memory_space<vmem>>, %arg3: memref<1x16x32xbf16, #tpu.memory_space<vmem>>, %arg4: memref<1x32x96xbf16, #tpu.memory_space<vmem>>, %arg5: memref<1x1x96xf32, #tpu.memory_space<vmem>>, %arg6: memref<1x32x32xbf16, #tpu.memory_space<vmem>>, %arg7: memref<1x1x32xf32, #tpu.memory_space<vmem>>, %arg8: memref<1x32x64xbf16, #tpu.memory_space<vmem>>, %arg9: memref<1x1x64xf32, #tpu.memory_space<vmem>>, %arg10: memref<1x64x32xbf16, #tpu.memory_space<vmem>>, %arg11: memref<1x1x32xf32, #tpu.memory_space<vmem>>, %arg12: memref<1x1x32xf32, #tpu.memory_space<vmem>>, %arg13: memref<1x1x32xf32, #tpu.memory_space<vmem>>, %arg14: memref<1x1x32xf32, #tpu.memory_space<vmem>>, %arg15: memref<1x1x32xf32, #tpu.memory_space<vmem>>, %arg16: memref<1x16x32xbf16, #tpu.memory_space<vmem>>) attributes {dimension_semantics = [#tpu.dimension_semantics<parallel>, #tpu.dimension_semantics<arbitrary>], iteration_bounds = array<i64: 2, 2>, scalar_prefetch = 0 : i64, scratch_operands = 0 : i64, tpu.core_type = #tpu.core_type<tc>, window_params = [{transform_indices = @transform_0, window_bounds = array<i64: 1, 16, 32>}, {transform_indices = @transform_1, window_bounds = array<i64: 1, 16, 32>}, {transform_indices = @transform_2, window_bounds = array<i64: 1, 32, 96>}, {transform_indices = @transform_3, window_bounds = array<i64: 1, 1, 96>}, {transform_indices = @transform_4, window_bounds = array<i64: 1, 32, 32>}, {transform_indices = @transform_5, window_bounds = array<i64: 1, 1, 32>}, {transform_indices = @transform_6, window_bounds = array<i64: 1, 32, 64>}, {transform_indices = @transform_7, window_bounds = array<i64: 1, 1, 64>}, {transform_indices = @transform_8, window_bounds = array<i64: 1, 64, 32>}, {transform_indices = @transform_9, window_bounds = array<i64: 1, 1, 32>}, {transform_indices = @transform_10, window_bounds = array<i64: 1, 1, 32>}, {transform_indices = @transform_11, window_bounds = array<i64: 1, 1, 32>}, {transform_indices = @transform_12, window_bounds = array<i64: 1, 1, 32>}, {transform_indices = @transform_13, window_bounds = array<i64: 1, 1, 32>}, {transform_indices = @transform_14, window_bounds = array<i64: 1, 16, 32>}]} {
    %c0_i32 = arith.constant 0 : i32
    %0 = arith.cmpi eq, %arg1, %c0_i32 : i32
    %1 = arith.extui %0 : i1 to i32
    %c0_i32_0 = arith.constant 0 : i32
    %2 = arith.cmpi ne, %1, %c0_i32_0 : i32
    scf.if %2 {
      %c0_66 = arith.constant 0 : index
      %c0_67 = arith.constant 0 : index
      %c0_68 = arith.constant 0 : index
      %136 = vector.load %arg2[%c0_66, %c0_67, %c0_68] : memref<1x16x32xbf16, #tpu.memory_space<vmem>>, vector<1x16x32xbf16>
      %c0_69 = arith.constant 0 : index
      %c0_70 = arith.constant 0 : index
      %c0_71 = arith.constant 0 : index
      %137 = vector.load %arg16[%c0_69, %c0_70, %c0_71] : memref<1x16x32xbf16, #tpu.memory_space<vmem>>, vector<1x16x32xbf16>
      tpu.vector_store %arg16[%c0_69, %c0_70, %c0_71], %136 {strides = array<i32>} : memref<1x16x32xbf16, #tpu.memory_space<vmem>>, vector<1x16x32xbf16>,
    } else {
    }
    %c0 = arith.constant 0 : index
    %c0_1 = arith.constant 0 : index
    %c0_2 = arith.constant 0 : index
    %3 = vector.load %arg16[%c0, %c0_1, %c0_2] : memref<1x16x32xbf16, #tpu.memory_space<vmem>>, vector<1x16x32xbf16>
    %4 = vector.shape_cast %3 : vector<1x16x32xbf16> to vector<16x32xbf16>
    %5 = arith.extf %4 : vector<16x32xbf16> to vector<16x32xf32>
    %c0_3 = arith.constant 0 : index
    %c0_4 = arith.constant 0 : index
    %c0_5 = arith.constant 0 : index
    %6 = vector.load %arg3[%c0_3, %c0_4, %c0_5] : memref<1x16x32xbf16, #tpu.memory_space<vmem>>, vector<1x16x32xbf16>
    %7 = vector.shape_cast %6 : vector<1x16x32xbf16> to vector<16x32xbf16>
    %8 = arith.extf %7 : vector<16x32xbf16> to vector<16x32xf32>
    %9 = arith.addf %5, %8 : vector<16x32xf32>
    %10 = arith.truncf %9 : vector<16x32xf32> to vector<16x32xbf16>
    %c0_6 = arith.constant 0 : index
    %c0_7 = arith.constant 0 : index
    %c0_8 = arith.constant 0 : index
    %11 = vector.load %arg4[%c0_6, %c0_7, %c0_8] : memref<1x32x96xbf16, #tpu.memory_space<vmem>>, vector<1x32x96xbf16>
    %12 = vector.shape_cast %11 : vector<1x32x96xbf16> to vector<32x96xbf16>
    %cst = arith.constant dense<0.000000e+00> : vector<16x96xf32>
    %13 = tpu.matmul %10, %12, %cst {dimension_numbers = #tpu.dot_dimension_numbers<[1], [0], [0], [1], [0, 0, 1, 1], [], []>} : vector<16x32xbf16>, vector<32x96xbf16>, vector<16x96xf32> -> vector<16x96xf32>
    %c0_9 = arith.constant 0 : index
    %c0_10 = arith.constant 0 : index
    %c0_11 = arith.constant 0 : index
    %14 = vector.load %arg5[%c0_9, %c0_10, %c0_11] : memref<1x1x96xf32, #tpu.memory_space<vmem>>, vector<1x1x96xf32>
    %15 = vector.shape_cast %14 : vector<1x1x96xf32> to vector<1x96xf32>
    %16 = vector.broadcast %15 : vector<1x96xf32> to vector<16x96xf32>
    %17 = arith.addf %13, %16 : vector<16x96xf32>
    %18 = vector.extract_strided_slice %17 {offsets = [0, 0], sizes = [16, 32], strides = [1, 1]} : vector<16x96xf32> to vector<16x32xf32>
    %19 = vector.shape_cast %18 : vector<16x32xf32> to vector<16x4x8xf32>
    %20 = tpu.transpose %19, [1, 0, 2] : vector<16x4x8xf32> -> vector<4x16x8xf32>
    %21 = vector.extract_strided_slice %17 {offsets = [0, 32], sizes = [16, 32], strides = [1, 1]} : vector<16x96xf32> to vector<16x32xf32>
    %22 = vector.shape_cast %21 : vector<16x32xf32> to vector<16x4x8xf32>
    %23 = tpu.transpose %22, [1, 0, 2] : vector<16x4x8xf32> -> vector<4x16x8xf32>
    %24 = vector.extract_strided_slice %17 {offsets = [0, 64], sizes = [16, 32], strides = [1, 1]} : vector<16x96xf32> to vector<16x32xf32>
    %25 = vector.shape_cast %24 : vector<16x32xf32> to vector<16x4x8xf32>
    %26 = tpu.transpose %25, [1, 0, 2] : vector<16x4x8xf32> -> vector<4x16x8xf32>
    %27 = arith.truncf %20 : vector<4x16x8xf32> to vector<4x16x8xbf16>
    %28 = arith.truncf %23 : vector<4x16x8xf32> to vector<4x16x8xbf16>
    "tpu.trace_start"() <{level = 10 : i32, message = "hqd,hkd->hqk"}> : () -> ()
    %cst_12 = arith.constant dense<0.000000e+00> : vector<4x16x16xf32>
    %29 = tpu.matmul %27, %28, %cst_12 {dimension_numbers = #tpu.dot_dimension_numbers<[2], [2], [1], [1], [0, 0, 0, 1, 1, 1], [0], [0]>} : vector<4x16x8xbf16>, vector<4x16x8xbf16>, vector<4x16x16xf32> -> vector<4x16x16xf32>
    "tpu.trace_stop"() : () -> ()
    %cst_13 = arith.constant 0.353553385 : f32
    %30 = vector.broadcast %cst_13 : f32 to vector<4x16x16xf32>
    %31 = arith.mulf %29, %30 : vector<4x16x16xf32>
    %32 = tpu.iota {dimensions = array<i32: 0>} : vector<16x16xi32>
    %33 = tpu.iota {dimensions = array<i32: 1>} : vector<16x16xi32>
    %34 = arith.cmpi sle, %33, %32 : vector<16x16xi32>
    %cst_14 = arith.constant 0.000000e+00 : f32
    %cst_15 = arith.constant -1.000000e+09 : f32
    %35 = vector.broadcast %cst_14 : f32 to vector<16x16xf32>
    %36 = vector.broadcast %cst_15 : f32 to vector<16x16xf32>
    %37 = arith.select %34, %35, %36 : vector<16x16xi1>, vector<16x16xf32>
    %38 = vector.shape_cast %37 : vector<16x16xf32> to vector<1x16x16xf32>
    %39 = vector.broadcast %38 : vector<1x16x16xf32> to vector<4x16x16xf32>
    %40 = arith.addf %31, %39 : vector<4x16x16xf32>
    %cst_16 = arith.constant dense<0xFF800000> : vector<4x16xf32>
    %41 = vector.multi_reduction <maximumf>, %40, %cst_16 [2] : vector<4x16x16xf32> to vector<4x16xf32>
    %42 = vector.shape_cast %41 : vector<4x16xf32> to vector<4x16x1xf32>
    %43 = vector.broadcast %42 : vector<4x16x1xf32> to vector<4x16x16xf32>
    %44 = arith.subf %40, %43 : vector<4x16x16xf32>
    %45 = math.exp %44 : vector<4x16x16xf32>
    %cst_17 = arith.constant dense<0.000000e+00> : vector<4x16xf32>
    %46 = vector.multi_reduction <add>, %45, %cst_17 [2] : vector<4x16x16xf32> to vector<4x16xf32>
    %47 = vector.shape_cast %46 : vector<4x16xf32> to vector<4x16x1xf32>
    %48 = tpu.reciprocal %47 {approx = true} : vector<4x16x1xf32> -> vector<4x16x1xf32>
    %49 = vector.broadcast %48 : vector<4x16x1xf32> to vector<4x16x16xf32>
    %50 = arith.mulf %45, %49 : vector<4x16x16xf32>
    %51 = arith.truncf %50 : vector<4x16x16xf32> to vector<4x16x16xbf16>
    %52 = arith.truncf %26 : vector<4x16x8xf32> to vector<4x16x8xbf16>
    "tpu.trace_start"() <{level = 10 : i32, message = "hqk,hkd->hqd"}> : () -> ()
    %cst_18 = arith.constant dense<0.000000e+00> : vector<4x16x8xf32>
    %53 = tpu.matmul %51, %52, %cst_18 {dimension_numbers = #tpu.dot_dimension_numbers<[2], [1], [1], [2], [0, 0, 0, 1, 1, 2], [0], [0]>} : vector<4x16x16xbf16>, vector<4x16x8xbf16>, vector<4x16x8xf32> -> vector<4x16x8xf32>
    "tpu.trace_stop"() : () -> ()
    %54 = tpu.transpose %53, [1, 0, 2] : vector<4x16x8xf32> -> vector<16x4x8xf32>
    %55 = vector.shape_cast %54 : vector<16x4x8xf32> to vector<16x32xf32>
    %56 = arith.truncf %55 : vector<16x32xf32> to vector<16x32xbf16>
    %c0_19 = arith.constant 0 : index
    %c0_20 = arith.constant 0 : index
    %c0_21 = arith.constant 0 : index
    %57 = vector.load %arg6[%c0_19, %c0_20, %c0_21] : memref<1x32x32xbf16, #tpu.memory_space<vmem>>, vector<1x32x32xbf16>
    %58 = vector.shape_cast %57 : vector<1x32x32xbf16> to vector<32x32xbf16>
    %cst_22 = arith.constant dense<0.000000e+00> : vector<16x32xf32>
    %59 = tpu.matmul %56, %58, %cst_22 {dimension_numbers = #tpu.dot_dimension_numbers<[1], [0], [0], [1], [0, 0, 1, 1], [], []>} : vector<16x32xbf16>, vector<32x32xbf16>, vector<16x32xf32> -> vector<16x32xf32>
    %c0_23 = arith.constant 0 : index
    %c0_24 = arith.constant 0 : index
    %c0_25 = arith.constant 0 : index
    %60 = vector.load %arg7[%c0_23, %c0_24, %c0_25] : memref<1x1x32xf32, #tpu.memory_space<vmem>>, vector<1x1x32xf32>
    %61 = vector.shape_cast %60 : vector<1x1x32xf32> to vector<1x32xf32>
    %62 = vector.broadcast %61 : vector<1x32xf32> to vector<16x32xf32>
    %63 = arith.addf %59, %62 : vector<16x32xf32>
    %64 = arith.addf %9, %63 : vector<16x32xf32>
    %c0_26 = arith.constant 0 : index
    %c0_27 = arith.constant 0 : index
    %c0_28 = arith.constant 0 : index
    %65 = vector.load %arg12[%c0_26, %c0_27, %c0_28] : memref<1x1x32xf32, #tpu.memory_space<vmem>>, vector<1x1x32xf32>
    %66 = vector.shape_cast %65 : vector<1x1x32xf32> to vector<1x32xf32>
    %c0_29 = arith.constant 0 : index
    %c0_30 = arith.constant 0 : index
    %c0_31 = arith.constant 0 : index
    %67 = vector.load %arg13[%c0_29, %c0_30, %c0_31] : memref<1x1x32xf32, #tpu.memory_space<vmem>>, vector<1x1x32xf32>
    %68 = vector.shape_cast %67 : vector<1x1x32xf32> to vector<1x32xf32>
    %cst_32 = arith.constant dense<0.000000e+00> : vector<16xf32>
    %69 = vector.multi_reduction <add>, %64, %cst_32 [1] : vector<16x32xf32> to vector<16xf32>
    %70 = vector.shape_cast %69 : vector<16xf32> to vector<16x1xf32>
    %cst_33 = arith.constant 3.200000e+01 : f32
    %71 = vector.broadcast %cst_33 : f32 to vector<16x1xf32>
    %72 = arith.divf %70, %71 : vector<16x1xf32>
    %73 = vector.broadcast %72 : vector<16x1xf32> to vector<16x32xf32>
    %74 = arith.subf %64, %73 : vector<16x32xf32>
    %75 = arith.mulf %74, %74 : vector<16x32xf32>
    %cst_34 = arith.constant dense<0.000000e+00> : vector<16xf32>
    %76 = vector.multi_reduction <add>, %75, %cst_34 [1] : vector<16x32xf32> to vector<16xf32>
    %77 = vector.shape_cast %76 : vector<16xf32> to vector<16x1xf32>
    %cst_35 = arith.constant 3.200000e+01 : f32
    %78 = vector.broadcast %cst_35 : f32 to vector<16x1xf32>
    %79 = arith.divf %77, %78 : vector<16x1xf32>
    %cst_36 = arith.constant 9.99999974E-6 : f32
    %80 = vector.broadcast %cst_36 : f32 to vector<16x1xf32>
    %81 = arith.addf %79, %80 : vector<16x1xf32>
    %82 = math.rsqrt %81 : vector<16x1xf32>
    %83 = vector.broadcast %82 : vector<16x1xf32> to vector<16x32xf32>
    %84 = arith.mulf %74, %83 : vector<16x32xf32>
    %85 = vector.broadcast %66 : vector<1x32xf32> to vector<16x32xf32>
    %86 = arith.mulf %84, %85 : vector<16x32xf32>
    %87 = vector.broadcast %68 : vector<1x32xf32> to vector<16x32xf32>
    %88 = arith.addf %86, %87 : vector<16x32xf32>
    %89 = arith.truncf %88 : vector<16x32xf32> to vector<16x32xbf16>
    %c0_37 = arith.constant 0 : index
    %c0_38 = arith.constant 0 : index
    %c0_39 = arith.constant 0 : index
    %90 = vector.load %arg8[%c0_37, %c0_38, %c0_39] : memref<1x32x64xbf16, #tpu.memory_space<vmem>>, vector<1x32x64xbf16>
    %91 = vector.shape_cast %90 : vector<1x32x64xbf16> to vector<32x64xbf16>
    %cst_40 = arith.constant dense<0.000000e+00> : vector<16x64xf32>
    %92 = tpu.matmul %89, %91, %cst_40 {dimension_numbers = #tpu.dot_dimension_numbers<[1], [0], [0], [1], [0, 0, 1, 1], [], []>} : vector<16x32xbf16>, vector<32x64xbf16>, vector<16x64xf32> -> vector<16x64xf32>
    %c0_41 = arith.constant 0 : index
    %c0_42 = arith.constant 0 : index
    %c0_43 = arith.constant 0 : index
    %93 = vector.load %arg9[%c0_41, %c0_42, %c0_43] : memref<1x1x64xf32, #tpu.memory_space<vmem>>, vector<1x1x64xf32>
    %94 = vector.shape_cast %93 : vector<1x1x64xf32> to vector<1x64xf32>
    %95 = vector.broadcast %94 : vector<1x64xf32> to vector<16x64xf32>
    %96 = arith.addf %92, %95 : vector<16x64xf32>
    %cst_44 = arith.constant 0.000000e+00 : f32
    %97 = vector.broadcast %cst_44 : f32 to vector<16x64xf32>
    %98 = arith.maximumf %96, %97 : vector<16x64xf32>
    %99 = arith.truncf %98 : vector<16x64xf32> to vector<16x64xbf16>
    %c0_45 = arith.constant 0 : index
    %c0_46 = arith.constant 0 : index
    %c0_47 = arith.constant 0 : index
    %100 = vector.load %arg10[%c0_45, %c0_46, %c0_47] : memref<1x64x32xbf16, #tpu.memory_space<vmem>>, vector<1x64x32xbf16>
    %101 = vector.shape_cast %100 : vector<1x64x32xbf16> to vector<64x32xbf16>
    %cst_48 = arith.constant dense<0.000000e+00> : vector<16x32xf32>
    %102 = tpu.matmul %99, %101, %cst_48 {dimension_numbers = #tpu.dot_dimension_numbers<[1], [0], [0], [1], [0, 0, 1, 1], [], []>} : vector<16x64xbf16>, vector<64x32xbf16>, vector<16x32xf32> -> vector<16x32xf32>
    %c0_49 = arith.constant 0 : index
    %c0_50 = arith.constant 0 : index
    %c0_51 = arith.constant 0 : index
    %103 = vector.load %arg11[%c0_49, %c0_50, %c0_51] : memref<1x1x32xf32, #tpu.memory_space<vmem>>, vector<1x1x32xf32>
    %104 = vector.shape_cast %103 : vector<1x1x32xf32> to vector<1x32xf32>
    %105 = vector.broadcast %104 : vector<1x32xf32> to vector<16x32xf32>
    %106 = arith.addf %102, %105 : vector<16x32xf32>
    %107 = arith.addf %88, %106 : vector<16x32xf32>
    %c0_52 = arith.constant 0 : index
    %c0_53 = arith.constant 0 : index
    %c0_54 = arith.constant 0 : index
    %108 = vector.load %arg14[%c0_52, %c0_53, %c0_54] : memref<1x1x32xf32, #tpu.memory_space<vmem>>, vector<1x1x32xf32>
    %109 = vector.shape_cast %108 : vector<1x1x32xf32> to vector<1x32xf32>
    %c0_55 = arith.constant 0 : index
    %c0_56 = arith.constant 0 : index
    %c0_57 = arith.constant 0 : index
    %110 = vector.load %arg15[%c0_55, %c0_56, %c0_57] : memref<1x1x32xf32, #tpu.memory_space<vmem>>, vector<1x1x32xf32>
    %111 = vector.shape_cast %110 : vector<1x1x32xf32> to vector<1x32xf32>
    %cst_58 = arith.constant dense<0.000000e+00> : vector<16xf32>
    %112 = vector.multi_reduction <add>, %107, %cst_58 [1] : vector<16x32xf32> to vector<16xf32>
    %113 = vector.shape_cast %112 : vector<16xf32> to vector<16x1xf32>
    %cst_59 = arith.constant 3.200000e+01 : f32
    %114 = vector.broadcast %cst_59 : f32 to vector<16x1xf32>
    %115 = arith.divf %113, %114 : vector<16x1xf32>
    %116 = vector.broadcast %115 : vector<16x1xf32> to vector<16x32xf32>
    %117 = arith.subf %107, %116 : vector<16x32xf32>
    %118 = arith.mulf %117, %117 : vector<16x32xf32>
    %cst_60 = arith.constant dense<0.000000e+00> : vector<16xf32>
    %119 = vector.multi_reduction <add>, %118, %cst_60 [1] : vector<16x32xf32> to vector<16xf32>
    %120 = vector.shape_cast %119 : vector<16xf32> to vector<16x1xf32>
    %cst_61 = arith.constant 3.200000e+01 : f32
    %121 = vector.broadcast %cst_61 : f32 to vector<16x1xf32>
    %122 = arith.divf %120, %121 : vector<16x1xf32>
    %cst_62 = arith.constant 9.99999974E-6 : f32
    %123 = vector.broadcast %cst_62 : f32 to vector<16x1xf32>
    %124 = arith.addf %122, %123 : vector<16x1xf32>
    %125 = math.rsqrt %124 : vector<16x1xf32>
    %126 = vector.broadcast %125 : vector<16x1xf32> to vector<16x32xf32>
    %127 = arith.mulf %117, %126 : vector<16x32xf32>
    %128 = vector.broadcast %109 : vector<1x32xf32> to vector<16x32xf32>
    %129 = arith.mulf %127, %128 : vector<16x32xf32>
    %130 = vector.broadcast %111 : vector<1x32xf32> to vector<16x32xf32>
    %131 = arith.addf %129, %130 : vector<16x32xf32>
    %132 = arith.truncf %131 : vector<16x32xf32> to vector<16x32xbf16>
    %c0_63 = arith.constant 0 : index
    %c0_64 = arith.constant 0 : index
    %c0_65 = arith.constant 0 : index
    %133 = vector.load %arg16[%c0_63, %c0_64, %c0_65] : memref<1x16x32xbf16, #tpu.memory_space<vmem>>, vector<1x16x32xbf16>
    %134 = vector.shape_cast %133 : vector<1x16x32xbf16> to vector<16x32xbf16>
    %135 = vector.shape_cast %132 : vector<16x32xbf16> to vector<1x16x32xbf16>
    tpu.vector_store %arg16[%c0_63, %c0_64, %c0_65], %135 {strides = array<i32>} : memref<1x16x32xbf16, #tpu.memory_space<vmem>>, vector<1x16x32xbf16>,
    return
  }
  func.func @transform_0(%arg0: i32, %arg1: i32) -> (i32, i32, i32) {
    %c0_i32 = arith.constant 0 : i32
    %c0_i32_0 = arith.constant 0 : i32
    %c0_i32_1 = arith.constant 0 : i32
    return %arg0, %c0_i32, %c0_i32_0 : i32, i32, i32
  }
  func.func @transform_1(%arg0: i32, %arg1: i32) -> (i32, i32, i32) {
    %c0_i32 = arith.constant 0 : i32
    %c0_i32_0 = arith.constant 0 : i32
    %c0_i32_1 = arith.constant 0 : i32
    return %arg0, %c0_i32, %c0_i32_0 : i32, i32, i32
  }
  func.func @transform_2(%arg0: i32, %arg1: i32) -> (i32, i32, i32) {
    %c0_i32 = arith.constant 0 : i32
    %c0_i32_0 = arith.constant 0 : i32
    %c0_i32_1 = arith.constant 0 : i32
    return %arg1, %c0_i32, %c0_i32_0 : i32, i32, i32
  }
  func.func @transform_3(%arg0: i32, %arg1: i32) -> (i32, i32, i32) {
    %c0_i32 = arith.constant 0 : i32
    %c0_i32_0 = arith.constant 0 : i32
    %c0_i32_1 = arith.constant 0 : i32
    return %arg1, %c0_i32, %c0_i32_0 : i32, i32, i32
  }
  func.func @transform_4(%arg0: i32, %arg1: i32) -> (i32, i32, i32) {
    %c0_i32 = arith.constant 0 : i32
    %c0_i32_0 = arith.constant 0 : i32
    %c0_i32_1 = arith.constant 0 : i32
    return %arg1, %c0_i32, %c0_i32_0 : i32, i32, i32
  }
  func.func @transform_5(%arg0: i32, %arg1: i32) -> (i32, i32, i32) {
    %c0_i32 = arith.constant 0 : i32
    %c0_i32_0 = arith.constant 0 : i32
    %c0_i32_1 = arith.constant 0 : i32
    return %arg1, %c0_i32, %c0_i32_0 : i32, i32, i32
  }
  func.func @transform_6(%arg0: i32, %arg1: i32) -> (i32, i32, i32) {
    %c0_i32 = arith.constant 0 : i32
    %c0_i32_0 = arith.constant 0 : i32
    %c0_i32_1 = arith.constant 0 : i32
    return %arg1, %c0_i32, %c0_i32_0 : i32, i32, i32
  }
  func.func @transform_7(%arg0: i32, %arg1: i32) -> (i32, i32, i32) {
    %c0_i32 = arith.constant 0 : i32
    %c0_i32_0 = arith.constant 0 : i32
    %c0_i32_1 = arith.constant 0 : i32
    return %arg1, %c0_i32, %c0_i32_0 : i32, i32, i32
  }
  func.func @transform_8(%arg0: i32, %arg1: i32) -> (i32, i32, i32) {
    %c0_i32 = arith.constant 0 : i32
    %c0_i32_0 = arith.constant 0 : i32
    %c0_i32_1 = arith.constant 0 : i32
    return %arg1, %c0_i32, %c0_i32_0 : i32, i32, i32
  }
  func.func @transform_9(%arg0: i32, %arg1: i32) -> (i32, i32, i32) {
    %c0_i32 = arith.constant 0 : i32
    %c0_i32_0 = arith.constant 0 : i32
    %c0_i32_1 = arith.constant 0 : i32
    return %arg1, %c0_i32, %c0_i32_0 : i32, i32, i32
  }
  func.func @transform_10(%arg0: i32, %arg1: i32) -> (i32, i32, i32) {
    %c0_i32 = arith.constant 0 : i32
    %c0_i32_0 = arith.constant 0 : i32
    %c0_i32_1 = arith.constant 0 : i32
    return %arg1, %c0_i32, %c0_i32_0 : i32, i32, i32
  }
  func.func @transform_11(%arg0: i32, %arg1: i32) -> (i32, i32, i32) {
    %c0_i32 = arith.constant 0 : i32
    %c0_i32_0 = arith.constant 0 : i32
    %c0_i32_1 = arith.constant 0 : i32
    return %arg1, %c0_i32, %c0_i32_0 : i32, i32, i32
  }
  func.func @transform_12(%arg0: i32, %arg1: i32) -> (i32, i32, i32) {
    %c0_i32 = arith.constant 0 : i32
    %c0_i32_0 = arith.constant 0 : i32
    %c0_i32_1 = arith.constant 0 : i32
    return %arg1, %c0_i32, %c0_i32_0 : i32, i32, i32
  }
  func.func @transform_13(%arg0: i32, %arg1: i32) -> (i32, i32, i32) {
    %c0_i32 = arith.constant 0 : i32
    %c0_i32_0 = arith.constant 0 : i32
    %c0_i32_1 = arith.constant 0 : i32
    return %arg1, %c0_i32, %c0_i32_0 : i32, i32, i32
  }
  func.func @transform_14(%arg0: i32, %arg1: i32) -> (i32, i32, i32) {
    %c0_i32 = arith.constant 0 : i32
    %c0_i32_0 = arith.constant 0 : i32
    %c0_i32_1 = arith.constant 0 : i32
    return %arg0, %c0_i32, %c0_i32_0 : i32, i32, i32
  }
}

</mosaic_0001>

<bundles_post_ra>
// kernel: emotionwave_forward.6
= control target key start
LH: loop header
LB: loop body
LE: loop exit
PB: predicated region body
PF: predicated region fallthrough
CT: control target
= control target key end

     0   :  { %v107_v0 = vmov 0.0   ;;  %vm108_vm0 = vmmov 0   ;;  %vm39_vm1 = vcmask 261120   ;;  %s144_s1 = inlined_call_operand.vmem [shape: bf16[32,128], index: 1, kind: input, shape index: {}]   ;;  %s145_s0 = inlined_call_operand.vmem [shape: bf16[4,32], index: 0, kind: input, shape index: {}]   ;;  %s146_s2 = inlined_call_operand.vmem [shape: f32[1,128], index: 2, kind: input, shape index: {}]   ;;  %s147_s3 = inlined_call_operand.vmem [shape: f32[4,128], index: 3, kind: output, shape index: {}]  }
   0x1   :  { %95 = vmatprep.subr.bf16.mxu0 %v107_v0  ;;  %v105_v1 = vld [vmem:[%s144_s1] sm:$0xff]   ;;  %99 = vmatprep.mubr.msk.bf16.mxu0 %vm108_vm0, %v107_v0  ;;  %v106_v2 = vld [vmem:[%s144_s1 + $0x8] sm:$0xff]  }
   0x2   :  { %96 = vmatpush3.bf16.msra.mxu0 %v105_v1  ;;  %v15_v3 = vld [vmem:[%s145_s0] sm:$0x3] }
   0x3   :  { %97 = vmatprep.subr.bf16.mxu0 %v107_v0  ;;  %v88_v4 = vld [vmem:[%s146_s2] ss:$0 sm:$0xff] }
   0x6   :  { %98 = vmatpush3.bf16.msra.mxu0 %v106_v2 }
   0x9   :  { %100 = vmatmul.mubr.msk.bf16.vlgmr.msra.gmra.mrb[0].mxu0 %vm39_vm1, %v15_v3 }
  0xdc   :  { %v77_v5 = vpop.f32.mrb[0].mxu0 }
  0xdd   :  { %v78_v6 = vadd.f32 %v88_v4, %v77_v5  ;;  %v101_v7 = vpop.f32.mrb[1].mxu0 }
  0xde   :  { %v80_v8 = vpop.f32.mrb[2].mxu0 }
  0xdf   :  { %83 = vst [vmem:[%s147_s3] sm:$0xf] %v78_v6  ;;  %v102_v9 = vpop.f32.mrb[3].mxu0 }

// kernel: emotionwave_forward.7
= control target key start
LH: loop header
LB: loop body
LE: loop exit
PB: predicated region body
PF: predicated region fallthrough
CT: control target
= control target key end

     0   :  { %vm52_vm0 = vcmask 392192   ;;  %vm124_vm1 = vcmask 257024   ;;  %s221_s1 = inlined_call_operand.vmem [shape: bf16[48,32], index: 1, kind: input, shape index: {}]   ;;  %s222_s0 = inlined_call_operand.vmem [shape: f32[32,48], index: 0, kind: input, shape index: {}]   ;;  %s223_s2 = inlined_call_operand.vmem [shape: f32[1,32], index: 2, kind: input, shape index: {}]   ;;  %s224_s3 = inlined_call_operand.vmem [shape: bf16[32,32], index: 3, kind: output, shape index: {}]  }
   0x1   :  { %v162_v0 = vld [vmem:[%s221_s1] sm:$0xff]   ;;  %v163_v1 = vld [vmem:[%s221_s1 + $0x8] sm:$0xff]   ;;  %v164_v4 = vld [vmem:[%s221_s1 + $0x10] sm:$0xff]  }
   0x2   :  { %152 = vmatprep.subr.bf16.mxu0 %v162_v0  ;;  %v15_v2 = vld [vmem:[%s222_s0] sm:$0xff]  ;;  %v16_v3 = vld [vmem:[%s222_s0 + $0x8] sm:$0xff]  ;;  %v17_v6 = vld [vmem:[%s222_s0 + $0x10] sm:$0xff] }
   0x3   :  { %153 = vmatpush3.bf16.msra.mxu0 %v162_v0  ;;  %v19_v5 = vpack.c.bf16 %v16_v3, %v15_v2  ;;  %v18_v7 = vld [vmem:[%s222_s0 + $0x18] sm:$0xff]  ;;  %v133_v9 = vld [vmem:[%s223_s2] ss:$0 sm:$0xff] }
   0x4   :  { %154 = vmatprep.subr.bf16.mxu0 %v163_v1  ;;  %v20_v8 = vpack.c.bf16 %v18_v7, %v17_v6 }
   0x5   :  { %158 = vmatprep.mubr.msk.bf16.mxu0 %vm52_vm0, %v19_v5 }
   0x7   :  { %155 = vmatpush3.bf16.msra.mxu0 %v163_v1 }
   0x8   :  { %156 = vmatprep.subr.bf16.mxu0 %v164_v4 }
   0xb   :  { %157 = vmatpush3.bf16.msra.mxu0 %v164_v4 }
   0xe   :  { %159 = vmatmul.mubr.msk.bf16.vlgmr.msra.gmra.mrb[0].mxu0 %vm52_vm0, %v20_v8 }
  0xe1   :  { %v160_v10 = vpop.f32.mrb[0].mxu0 }
  0xe2   :  { %v102_v11 = vadd.f32 %v160_v10, %v133_v9  ;;  %v93_v12 = vpop.f32.mrb[1].mxu0 }
  0xe3   :  { %v94_v13 = vadd.f32 %v133_v9, %v93_v12  ;;  %v161_v14 = vpop.f32.mrb[2].mxu0 }
  0xe4   :  { %v145_v15 = vpack.c.bf16 %v102_v11, %v102_v11  ;;  %v105_v16 = vadd.f32 %v161_v14, %v133_v9  ;;  %v96_v17 = vpop.f32.mrb[3].mxu0 }
  0xe5   :  { %v143_v18 = vpack.c.bf16 %v94_v13, %v94_v13  ;;  %v97_v19 = vadd.f32 %v133_v9, %v96_v17 }
  0xe6   :  { %127 = vst.msk [vmem:[%s224_s3 + $0x8] sm:$0xf] %vm124_vm1, %v145_v15  ;;  %v146_v20 = vpack.c.bf16 %v105_v16, %v105_v16 }
  0xe7   :  { %125 = vst.msk [vmem:[%s224_s3] sm:$0xf] %vm124_vm1, %v143_v18  ;;  %v144_v21 = vpack.c.bf16 %v97_v19, %v97_v19 }
  0xe8   :  { %128 = vst.msk [vmem:[%s224_s3 + $0xc] sm:$0xf] %vm124_vm1, %v146_v20 }
  0xe9   :  { %126 = vst.msk [vmem:[%s224_s3 + $0x4] sm:$0xf] %vm124_vm1, %v144_v21 }

// kernel: emotionwave_forward.5
= control target key start
LH: loop header
LB: loop body
LE: loop exit
PB: predicated region body
PF: predicated region fallthrough
CT: control target
= control target key end

     0   :  { %s2591_s25 = smov 0   ;;  %s2593_s26 = smov 0   ;;  %s2943_s0 = inlined_call_operand.vmem [shape: bf16[4,8,32], index: 0, kind: input, shape index: {}]   ;;  %s2944_s1 = inlined_call_operand.vmem [shape: bf16[2,32,96], index: 1, kind: input, shape index: {}]   ;;  %s2945_s2 = inlined_call_operand.vmem [shape: f32[2,1,96], index: 2, kind: input, shape index: {}]   ;;  %s2946_s3 = inlined_call_operand.vmem [shape: bf16[2,32,32], index: 3, kind: input, shape index: {}]   ;;  %s2947_s4 = inlined_call_operand.vmem [shape: f32[2,1,32], index: 4, kind: input, shape index: {}, may-alias: {4,8,10,12}]   ;;  %s2948_s5 = inlined_call_operand.vmem [shape: bf16[2,32,64], index: 5, kind: input, shape index: {}]   ;;  %s2949_s6 = inlined_call_operand.vmem [shape: f32[2,1,64], index: 6, kind: input, shape index: {}]   ;;  %s2950_s7 = inlined_call_operand.vmem [shape: bf16[2,64,32], index: 7, kind: input, shape index: {}]   ;;  %s2951_s8 = inlined_call_operand.vmem [shape: f32[2,1,32], index: 8, kind: input, shape index: {}, may-alias: {4,8,10,12}]   ;;  %s2952_s9 = inlined_call_operand.vmem [shape: f32[2,1,32], index: 9, kind: input, shape index: {}, may-alias: {9,11}]   ;;  %s2953_s10 = inlined_call_operand.vmem [shape: f32[2,1,32], index: 10, kind: input, shape index: {}, may-alias: {4,8,10,12}]   ;;  %s2954_s11 = inlined_call_operand.vmem [shape: f32[2,1,32], index: 11, kind: input, shape index: {}, may-alias: {9,11}]   ;;  %s2955_s12 = inlined_call_operand.vmem [shape: f32[2,1,32], index: 12, kind: input, shape index: {}, may-alias: {4,8,10,12}]   ;;  %s2956_s13 = inlined_call_operand.vmem [shape: bf16[4,8,32], index: 13, kind: output, shape index: {}]  }
   0x1   :  { %2962 = sst [smem:[#allocation9_spill]] %s2943_s0  ;;  %s2595_s27 = smov 0  }
   0x2   :  { %2963 = sst [smem:[#allocation10_spill]] %s2944_s1  ;;  %s2597_s28 = smov 0  }
   0x3   :  { %2964 = sst [smem:[#allocation11_spill]] %s2946_s3  ;;  %s2599_s29 = smov 0  }
   0x4   :  { %2965 = sst [smem:[#allocation12_spill]] %s2948_s5 }
   0x5   :  { %2966 = sst [smem:[#allocation13_spill]] %s2950_s7 }
   0x6   :  { %2967 = sst [smem:[#allocation14_spill]] %s2956_s13 }
   0x7 LB: > { %2968 = sst [smem:[#allocation2_spill]] %s2491_s25  ;;  %s32_s30 = sadd.s32 1, %s2499_s27  ;;  %s2507_s29 = sphi %s2599_s29, %s23_s29   ;;  %s2503_s28 = sphi %s2597_s28, %s2991_s28   ;;  %s2499_s27 = sphi %s2595_s27, %s2990_s27   ;;  %s2495_s26 = sphi %s2593_s26, %s2989_s26   ;;  %s2491_s25 = sphi %s2591_s25, %s2988_s25  }
   0x8   : > { %2969 = sst [smem:[#allocation3_spill]] %s2499_s27  ;;  %s35_s14 = sadd.s32 1, %s2503_s28 }
   0x9   : > { %2970 = sst [smem:[#allocation4_spill]] %s2503_s28  ;;  %p33_p0 = scmp.ge.s32.totalorder %s32_s30, 2 }
   0xa   : > { %2971 = sst [smem:[#allocation5_spill]] %s2507_s29  ;;  %p2217_p1 = scmp.ge.s32.totalorder %s2507_s29, 1 }
   0xb   : > { %p502_p2 = scmp.lt.s32.totalorder %s2507_s29, 9  ;;  %s2993_s30 = smov (%p33_p0, %s32_s30), 0 }
   0xc   : > { %2972 = sst [smem:[#allocation6_spill]] %s2993_s30  ;;  %s2995_s14 = smov (!%p33_p0, %s35_s14), %s2503_s28 }
   0xd   : > { %p503_p3 = pnand %p2217_p1, %p502_p2  ;;  %p37_p4 = scmp.ge.s32.totalorder %s2995_s14, 4 }
   0xf   : > { %s2997_s14 = smov (%p37_p4, %s2995_s14), 0  ;;  %506 = sbr.rel (%p503_p3) target bundleno = 2752 (0xac0), region = 72 }
  0x10   : > { %2973 = sst [smem:[#allocation7_spill]] %s2997_s14 }
  0x16   : > { %p588_p5 = scmp.lt.s32.totalorder %s2495_s26, 3  ;;  %p592_p6 = scmp.lt.s32.totalorder %s2491_s25, 1 }
  0x17   : > { %s2974_s0 = sld [smem:[#allocation9_spill]]  ;;  %s2975_s1 = sld [smem:[#allocation10_spill]] }
  0x18   : > { %s2999_s26 = smov (!%p588_p5, %s2495_s26), 3  ;;  %s2976_s3 = sld [smem:[#allocation11_spill]] }
  0x19   : > { %s2625_s15 = scalar_select %p592_p6, %s2491_s25, 1 }
  0x1a   : > { %s2218_s16 = sshll.u32 %s2999_s26, 2  ;;  %s2978_s5 = sld [smem:[#allocation12_spill]] }
  0x1b   : > { %s2269_s20 = sshll.u32 %s2625_s15, 4  ;;  %s2272_s14 = sshll.u32 %s2625_s15, 5 }
  0x1c   : > { %s2979_s7 = sld [smem:[#allocation13_spill]]  ;;  %s626_s17 = scalar_lea.vmem %s2952_s9, %s2625_s15 }
  0x1d   : > { %s591_s19 = scalar_lea.vmem %s2974_s0, %s2218_s16  ;;  %s596_s23 = scalar_lea.vmem %s2975_s1, %s2269_s20 }
  0x1e   : > { %s2641_s29 = scalar_lea.vmem %s2976_s3, %s2269_s20  ;;  %s629_s13 = scalar_lea.vmem %s2953_s10, %s2625_s15 }
  0x1f   : > { %2977 = sst [smem:[#allocation8_spill]] %s2641_s29  ;;  %s632_s1 = scalar_lea.vmem %s2954_s11, %s2625_s15 }
  0x20   : > { %s2650_s0 = scalar_lea.vmem %s2978_s5, %s2269_s20  ;;  %s635_s24 = scalar_lea.vmem %s2955_s12, %s2625_s15 }
  0x22   : > { %s2664_s29 = scalar_lea.vmem %s2979_s7, %s2272_s14  ;;  %s2980_s14 = sld [smem:[#allocation14_spill]] }
  0x23   : > { %s2981_s7 = sld [smem:[#allocation2_spill]] }
  0x28   : > { %s2685_s28 = scalar_lea.vmem %s2980_s14, %s2218_s16 }
  0x29   : > { %p2228_p7 = scmp.ne.s32.totalorder %s2981_s7, 0 }
  0x2a   : > { %v645_v0 = vld [vmem:[%s591_s19] sm:$0xf] (!%p2228_p7)  ;;  %vm646_vm0 = vcmask (!%p2228_p7), 257024  }
  0x2b   : > { %644 = sbr.rel (%p2228_p7) target bundleno = 50 (0x32), region = 76  ;;  %647 = vst.msk [vmem:[%s2685_s28] sm:$0xf] (!%p2228_p7), %vm646_vm0, %v645_v0 }
  0x32 PF: > { %v2439_v1 = vld [vmem:[%s596_s23] sm:$0xff]   ;;  %v2509_v2 = vmov 0.0   ;;  %v2440_v3 = vld [vmem:[%s596_s23 + $0x8] sm:$0xff]   ;;  %vm2510_vm1 = vmmov 0   ;;  %vm673_vm2 = vcmask 261120   ;;  %s2982_s16 = scalar_lea.vmem %s2945_s2, %s2625_s15  ;;  %s2511_s19 = smov 104   ;;  %v732_v16 = vlaneseq }
  0x33   : > { %2303 = vmatprep.subr.bf16.mxu0 %v2509_v2  ;;  %2311 = vmatprep.subr.bf16.mxu1 %v2509_v2  ;;  %v2697_v4 = vld [vmem:[%s2685_s28] sm:$0xf]  ;;  %s2512_s23 = smov 120   ;;  %s2513_s27 = smov 96   ;;  %v2515_v14 = vmov 1983009808  }
  0x34   : > { %2304 = vmatpush3.bf16.msra.mxu0 %v2439_v1  ;;  %2307 = vmatprep.mubr.msk.bf16.mxu0 %vm2510_vm1, %v2509_v2  ;;  %v2229_v5 = vld [vmem:[%s2982_s16] ss:$0 sm:$0xff]  ;;  %s2514_s25 = smov 112   ;;  %v730_v15 = vunpack.c.l.s4 %v2515_v14  ;;  %v733_v18 = vshrl.u32 %v732_v16, 7  ;;  %v2516_v19 = vmov 1934713408   ;;  %s2984_s14 = scalar_lea.vmem %s2947_s4, %s2625_s15 }
  0x35   : > { %2305 = vmatprep.subr.bf16.mxu0 %v2509_v2  ;;  %2313 = vmatprep.mubr.msk.bf16.mxu1 %vm2510_vm1, %v2509_v2  ;;  %v762_v20 = vunpack.c.l.s4 %v2516_v19  ;;  %vm1167_vm3 = vcmask 64512   ;;  %s2517_s26 = smov 64   ;;  %vm1411_vm4 = vcmask 1043456   ;;  %s2983_s20 = sld [smem:[#allocation8_spill]]  ;;  %vm1742_vm5 = vcmask 130048  }
  0x36   : > { %v731_v17 = vunpack.c.0.s8 %v730_v15  ;;  %s2518_s18 = smov 16   ;;  %s2519_s21 = smov 8   ;;  %vm1744_vm6 = vcmask 195584   ;;  %vm1952_vm7 = vcmask 523264   ;;  %vm2027_vm8 = vcmask 257024  }
  0x37   : > { %v763_v26 = vunpack.c.0.s8 %v762_v20  ;;  %s2520_s22 = smov 24  }
  0x38   : > { %2306 = vmatpush3.bf16.msra.mxu0 %v2440_v3  ;;  %v2728_v23 = vsub.s32 %v731_v17, %v733_v18 }
  0x39   : > { %2317 = vmatprep.subr.bf16.mxu0 %v2509_v2  ;;  %v2738_v33 = vsub.s32 %v763_v26, %v733_v18 }
  0x3b   : > { %2308 = vmatmul.mubr.msk.bf16.vlgmr.msra.gmra.mrb[0].mxu0 %vm673_vm2, %v2697_v4 }
  0x3c   : > { %2319 = vmatprep.mubr.msk.bf16.mxu0 %vm2510_vm1, %v2509_v2 }
 0x10e   : > { %v711_v6 = vpop.f32.mrb[0].mxu0 }
 0x10f   : > { %v2709_v7 = vadd.f32 %v2229_v5, %v711_v6  ;;  %v2309_v8 = vpop.f32.mrb[1].mxu0 }
 0x110   : > { %v714_v9 = vpop.f32.mrb[2].mxu0 }
 0x111   : > { %724 = vrot.lane.b32.xlu1 %v2709_v7, %s2511_s19  ;;  %718 = vrot.lane.b32.xlu0 %v2709_v7, %s2512_s23  ;;  %v2310_v10 = vpop.f32.mrb[3].mxu0  ;;  %s2985_s23 = scalar_lea.vmem %s2949_s6, %s2625_s15 }
 0x115   : > { %863 = vrot.lane.b32.xlu1 %v2709_v7, %s2513_s27  ;;  %721 = vrot.lane.b32.xlu0 %v2709_v7, %s2514_s25  ;;  %s2986_s25 = scalar_lea.vmem %s2951_s8, %s2625_s15 }
 0x183   : > { %v2715_v11 = vpop.permute.xlu0 %718  ;;  %v2718_v12 = vpop.permute.xlu1 %724 }
 0x184   : > { %865 = vrot.lane.b32.xlu0 %v2715_v11, %s2513_s27  ;;  %v743_v24 = vcombine.low %v2715_v11, %v2718_v12  ;;  %v744_v25 = vcombine.high %v2715_v11, %v2718_v12 }
 0x186   : > { %v751_v29 = vrot.slane %v743_v24, %v2728_v23  ;;  %v758_v30 = vrot.slane %v744_v25, %v2728_v23 }
 0x187   : > { %v2720_v13 = vpop.permute.xlu0 %721  ;;  %v864_v31 = vpop.permute.xlu1 %863 }
 0x188   : > { %869 = vrot.lane.b32.xlu0 %v2718_v12, %s2513_s27  ;;  %867 = vrot.lane.b32.xlu1 %v2720_v13, %s2513_s27  ;;  %v727_v21 = vcombine.low %v2709_v7, %v2720_v13  ;;  %v728_v22 = vcombine.high %v2709_v7, %v2720_v13 }
 0x18a   : > { %v735_v27 = vrot.slane %v727_v21, %v2728_v23  ;;  %v742_v28 = vrot.slane %v728_v22, %v2728_v23 }
 0x18c   : > { %v759_v34 = vcombine.low %v735_v27, %v751_v29  ;;  %v760_v35 = vcombine.high %v735_v27, %v751_v29  ;;  %v775_v36 = vcombine.low %v742_v28, %v758_v30  ;;  %v776_v37 = vcombine.high %v742_v28, %v758_v30 }
 0x18e   : > { %v767_v44 = vrot.slane %v759_v34, %v2738_v33  ;;  %v774_v45 = vrot.slane %v760_v35, %v2738_v33  ;;  %v783_v46 = vrot.slane %v775_v36, %v2738_v33  ;;  %v790_v47 = vrot.slane %v776_v37, %v2738_v33 }
 0x190   : > { %v795_v56 = vcombine.low %v767_v44, %v774_v45  ;;  %v2233_v57 = vcombine.high %v767_v44, %v774_v45  ;;  %v811_v58 = vcombine.low %v783_v46, %v790_v47  ;;  %v2234_v59 = vcombine.high %v783_v46, %v790_v47 }
 0x192   : > { %v802_v6 = vrot.slane %v795_v56, %v2728_v23  ;;  %v810_v8 = vrot.slane %v2233_v57, %v2728_v23  ;;  %v818_v9 = vrot.slane %v811_v58, %v2728_v23  ;;  %v826_v10 = vrot.slane %v2234_v59, %v2728_v23 }
 0x194   : > { %v827_v25 = vcombine.low %v802_v6, %v810_v8  ;;  %v843_v26 = vcombine.low %v818_v9, %v826_v10 }
 0x196   : > { %v835_v34 = vrot.slane %v827_v25, %v2738_v33  ;;  %v851_v35 = vrot.slane %v843_v26, %v2738_v33 }
 0x1f6   : > { %v866_v32 = vpop.permute.xlu0 %865 }
 0x1fa   : > { %v868_v38 = vpop.permute.xlu1 %867  ;;  %v870_v39 = vpop.permute.xlu0 %869 }
 0x1fb   : > { %v875_v40 = vcombine.low %v864_v31, %v868_v38  ;;  %v876_v41 = vcombine.high %v864_v31, %v868_v38  ;;  %v891_v42 = vcombine.low %v866_v32, %v870_v39  ;;  %v892_v43 = vcombine.high %v866_v32, %v870_v39 }
 0x1fd   : > { %v883_v48 = vrot.slane %v875_v40, %v2728_v23  ;;  %v890_v49 = vrot.slane %v876_v41, %v2728_v23  ;;  %v899_v50 = vrot.slane %v891_v42, %v2728_v23  ;;  %v906_v51 = vrot.slane %v892_v43, %v2728_v23 }
 0x1fe   : > { %v828_v40 = vcombine.high %v802_v6, %v810_v8  ;;  %v844_v41 = vcombine.high %v818_v9, %v826_v10  ;;  %v859_v42 = vcombine.low %v835_v34, %v851_v35  ;;  %v860_v43 = vcombine.high %v835_v34, %v851_v35 }
 0x1ff   : > { %v907_v52 = vcombine.low %v883_v48, %v899_v50  ;;  %v908_v53 = vcombine.high %v883_v48, %v899_v50  ;;  %v923_v54 = vcombine.low %v890_v49, %v906_v51  ;;  %v924_v55 = vcombine.high %v890_v49, %v906_v51 }
 0x200   : > { %v1159_v46 = vpack.c.bf16 %v859_v42, %v859_v42  ;;  %v1160_v47 = vpack.c.bf16 %v860_v43, %v860_v43  ;;  %v842_v48 = vrot.slane %v828_v40, %v2738_v33  ;;  %v858_v49 = vrot.slane %v844_v41, %v2738_v33 }
 0x201   : > { %v915_v60 = vrot.slane %v907_v52, %v2738_v33  ;;  %v922_v61 = vrot.slane %v908_v53, %v2738_v33  ;;  %v931_v62 = vrot.slane %v923_v54, %v2738_v33  ;;  %v938_v63 = vrot.slane %v924_v55, %v2738_v33 }
 0x202   : > { %v861_v52 = vcombine.low %v842_v48, %v858_v49  ;;  %v862_v53 = vcombine.high %v842_v48, %v858_v49 }
 0x203   : > { %v943_v0 = vcombine.low %v915_v60, %v922_v61  ;;  %v2235_v1 = vcombine.high %v915_v60, %v922_v61  ;;  %v959_v3 = vcombine.low %v931_v62, %v938_v63  ;;  %v2236_v5 = vcombine.high %v931_v62, %v938_v63 }
 0x204   : > { %v1161_v54 = vpack.c.bf16 %v861_v52, %v861_v52  ;;  %v1162_v55 = vpack.c.bf16 %v862_v53, %v862_v53 }
 0x205   : > { %v950_v14 = vrot.slane %v943_v0, %v2728_v23  ;;  %v958_v15 = vrot.slane %v2235_v1, %v2728_v23  ;;  %v966_v16 = vrot.slane %v959_v3, %v2728_v23  ;;  %v974_v17 = vrot.slane %v2236_v5, %v2728_v23 }
 0x207   : > { %v975_v18 = vcombine.low %v950_v14, %v958_v15  ;;  %v991_v19 = vcombine.low %v966_v16, %v974_v17  ;;  %v976_v20 = vcombine.high %v950_v14, %v958_v15  ;;  %v992_v21 = vcombine.high %v966_v16, %v974_v17 }
 0x209   : > { %v983_v22 = vrot.slane %v975_v18, %v2738_v33  ;;  %v999_v24 = vrot.slane %v991_v19, %v2738_v33  ;;  %v990_v29 = vrot.slane %v976_v20, %v2738_v33  ;;  %v1006_v30 = vrot.slane %v992_v21, %v2738_v33 }
 0x20b   : > { %v1007_v27 = vcombine.low %v983_v22, %v999_v24  ;;  %v1008_v28 = vcombine.high %v983_v22, %v999_v24  ;;  %v1009_v38 = vcombine.low %v990_v29, %v1006_v30  ;;  %v1010_v39 = vcombine.high %v990_v29, %v1006_v30 }
 0x20d   : > { %v1163_v31 = vpack.c.bf16 %v1007_v27, %v1007_v27  ;;  %v1164_v32 = vpack.c.bf16 %v1008_v28, %v1008_v28  ;;  %v1165_v44 = vpack.c.bf16 %v1009_v38, %v1009_v38  ;;  %v1166_v45 = vpack.c.bf16 %v1010_v39, %v1010_v39 }
 0x20f   : > { %v1172_v36 = vsel %vm1167_vm3, %v1163_v31, 0  ;;  %v1218_v37 = vsel %vm1167_vm3, %v1164_v32, 0  ;;  %v1264_v50 = vsel %vm1167_vm3, %v1165_v44, 0  ;;  %v1310_v51 = vsel %vm1167_vm3, %v1166_v45, 0 }
 0x210   : > { %2312 = vmatpush3.bf16.xpose.msra.mxu1 %v1172_v36  ;;  %2318 = vmatpush3.bf16.xpose.msra.mxu0 %v1218_v37 }
 0x211   : > { %2323 = vmatprep.subr.bf16.mxu1 %v2509_v2  ;;  %2329 = vmatprep.subr.bf16.mxu0 %v2509_v2 }
 0x217   : > { %2314 = vmatmul.mubr.msk.bf16.vlgmr.msra.gmra.mrb[0].mxu1 %vm1167_vm3, %v1159_v46  ;;  %2320 = vmatmul.mubr.msk.bf16.vlgmr.msra.gmra.mrb[4].mxu0 %vm1167_vm3, %v1160_v47 }
 0x218   : > { %2324 = vmatpush3.bf16.xpose.msra.mxu1 %v1264_v50  ;;  %2330 = vmatpush3.bf16.xpose.msra.mxu0 %v1310_v51 }
 0x219   : > { %2325 = vmatprep.mubr.msk.bf16.mxu1 %vm2510_vm1, %v2509_v2  ;;  %2331 = vmatprep.mubr.msk.bf16.mxu0 %vm2510_vm1, %v2509_v2 }
 0x21a   : > { %2335 = vmatprep.subr.bf16.mxu1 %v2509_v2  ;;  %2341 = vmatprep.subr.bf16.mxu0 %v2509_v2 }
 0x21f   : > { %2326 = vmatmul.mubr.msk.bf16.vlgmr.msra.gmra.mrb[4].mxu1 %vm1167_vm3, %v1161_v54  ;;  %2332 = vmatmul.mubr.msk.bf16.vlgmr.msra.gmra.mrb[8].mxu0 %vm1167_vm3, %v1162_v55 }
 0x220   : > { %2337 = vmatprep.mubr.msk.bf16.mxu1 %vm2510_vm1, %v2509_v2  ;;  %2343 = vmatprep.mubr.msk.bf16.mxu0 %vm2510_vm1, %v2509_v2 }
 0x2ea   : > { %v1208_v56 = vpop.f32.mrb[0].mxu1  ;;  %v1254_v57 = vpop.f32.mrb[4].mxu0 }
 0x2eb   : > { %v1352_v58 = vmul.f32 0.35355338, %v1208_v56  ;;  %v1353_v59 = vmul.f32 0.35355338, %v1254_v57  ;;  %v2315_v60 = vpop.f32.mrb[1].mxu1  ;;  %v2321_v61 = vpop.f32.mrb[5].mxu0 }
 0x2ec   : > { %v1211_v62 = vpop.f32.mrb[2].mxu1  ;;  %v1257_v63 = vpop.f32.mrb[6].mxu0 }
 0x2ed   : > { %v2316_v0 = vpop.f32.mrb[3].mxu1  ;;  %v2322_v1 = vpop.f32.mrb[7].mxu0  ;;  %v1356_v3 = vsel %vm1167_vm3, %v1352_v58, -inf  ;;  %v1359_v5 = vsel %vm1167_vm3, %v1353_v59, -inf }
 0x2ee   : > { %1357 = vmax.xlane.f32.xlu1 %v1356_v3  ;;  %1360 = vmax.xlane.f32.xlu0 %v1359_v5 }
 0x2f2   : > { %v1300_v6 = vpop.f32.mrb[4].mxu1  ;;  %v1346_v8 = vpop.f32.mrb[8].mxu0 }
 0x2f3   : > { %v1354_v9 = vmul.f32 0.35355338, %v1300_v6  ;;  %v1355_v10 = vmul.f32 0.35355338, %v1346_v8  ;;  %v2327_v14 = vpop.f32.mrb[5].mxu1  ;;  %v2333_v15 = vpop.f32.mrb[9].mxu0 }
 0x2f4   : > { %v1303_v16 = vpop.f32.mrb[6].mxu1  ;;  %v1349_v17 = vpop.f32.mrb[10].mxu0 }
 0x2f5   : > { %v2328_v18 = vpop.f32.mrb[7].mxu1  ;;  %v2334_v19 = vpop.f32.mrb[11].mxu0  ;;  %v1362_v20 = vsel %vm1167_vm3, %v1354_v9, -inf  ;;  %v1365_v21 = vsel %vm1167_vm3, %v1355_v10, -inf }
 0x2f6   : > { %1363 = vmax.xlane.f32.xlu0 %v1362_v20  ;;  %1366 = vmax.xlane.f32.xlu1 %v1365_v21 }
 0x307   : > { %1013 = vrot.lane.b32.xlu1 %v2715_v11, %s2517_s26 }
 0x30c   : > { %1011 = vrot.lane.b32.xlu0 %v2709_v7, %s2517_s26 }
 0x37b   : > { %v1358_v22 = vpop.xlane.xlu1 %1357  ;;  %v1361_v24 = vpop.xlane.xlu0 %1360 }
 0x37c   : > { %v1368_v25 = vsub.f32 %v1352_v58, %v1358_v22  ;;  %v1369_v26 = vsub.f32 %v1353_v59, %v1361_v24 }
 0x37e   : > { %v1372_v27 = vmul.f32 1.442695, %v1368_v25  ;;  %v1374_v28 = vmul.f32 1.442695, %v1369_v26 }
 0x380   : > { %2449 = vpow2.f32 %v1372_v27 }
 0x381   : > { %2451 = vpow2.f32 %v1374_v28 }
 0x383   : > { %v1367_v7 = vpop.xlane.xlu1 %1366  ;;  %v1364_v32 = vpop.xlane.xlu0 %1363 }
 0x384   : > { %v1371_v34 = vsub.f32 %v1355_v10, %v1367_v7  ;;  %v1370_v35 = vsub.f32 %v1354_v9, %v1364_v32 }
 0x386   : > { %v1378_v36 = vmul.f32 1.442695, %v1371_v34  ;;  %v1376_v37 = vmul.f32 1.442695, %v1370_v35 }
 0x387   : > { %v1014_v41 = vpop.permute.xlu1 %1013 }
 0x388   : > { %2453 = vpow2.f32 %v1378_v36 }
 0x389   : > { %2455 = vpow2.f32 %v1376_v37 }
 0x38a   : > { %v2794_v29 = vpop.eup %2449 }
 0x38b   : > { %v2796_v30 = vpop.eup %2451  ;;  %v1380_v31 = vsel %vm1167_vm3, %v2794_v29, 0.0 }
 0x38c   : > { %1381 = vadd.xlane.f32.xlu0 %v1380_v31  ;;  %v1383_v11 = vsel %vm1167_vm3, %v2796_v30, 0.0 }
 0x38d   : > { %1384 = vadd.xlane.f32.xlu1 %v1383_v11 }
 0x392   : > { %v2804_v38 = vpop.eup %2453 }
 0x393   : > { %v2806_v39 = vpop.eup %2455  ;;  %v1389_v40 = vsel %vm1167_vm3, %v2804_v38, 0.0 }
 0x39e   : > { %1015 = vrot.lane.b32.xlu1 %v2720_v13, %s2517_s26  ;;  %v1386_v13 = vsel %vm1167_vm3, %v2806_v39, 0.0 }
 0x3a2   : > { %1017 = vrot.lane.b32.xlu0 %v2718_v12, %s2517_s26  ;;  %v1012_v12 = vpop.permute.xlu0 %1011 }
 0x3c1   : > { %1390 = vadd.xlane.f32.xlu0 %v1389_v40 }
 0x3c2   : > { %1387 = vadd.xlane.f32.xlu1 %v1386_v13 }
 0x419   : > { %v1382_v42 = vpop.xlane.xlu0 %1381 }
 0x41a   : > { %v1385_v43 = vpop.xlane.xlu1 %1384  ;;  %2457 = vrcp.f32 %v1382_v42 }
 0x41b   : > { %2459 = vrcp.f32 %v1385_v43 }
 0x41d   : > { %v1018_v44 = vpop.permute.xlu0 %1017 }
 0x41e   : > { %v1039_v45 = vcombine.low %v1014_v41, %v1018_v44  ;;  %v1040_v46 = vcombine.high %v1014_v41, %v1018_v44  ;;  %v1016_v47 = vpop.permute.xlu1 %1015 }
 0x41f   : > { %v1023_v48 = vcombine.low %v1012_v12, %v1016_v47  ;;  %v1024_v49 = vcombine.high %v1012_v12, %v1016_v47 }
 0x420   : > { %v1047_v50 = vrot.slane %v1039_v45, %v2728_v23  ;;  %v1054_v51 = vrot.slane %v1040_v46, %v2728_v23 }
 0x421   : > { %v1031_v52 = vrot.slane %v1023_v48, %v2728_v23  ;;  %v1038_v53 = vrot.slane %v1024_v49, %v2728_v23 }
 0x423   : > { %v1055_v54 = vcombine.low %v1031_v52, %v1047_v50  ;;  %v1056_v55 = vcombine.high %v1031_v52, %v1047_v50  ;;  %v1071_v56 = vcombine.low %v1038_v53, %v1054_v51  ;;  %v1072_v57 = vcombine.high %v1038_v53, %v1054_v51 }
 0x424   : > { %v2458_v18 = vpop.eup %2457 }
 0x425   : > { %v1063_v58 = vrot.slane %v1055_v54, %v2738_v33  ;;  %v1070_v59 = vrot.slane %v1056_v55, %v2738_v33  ;;  %v1079_v60 = vrot.slane %v1071_v56, %v2738_v33  ;;  %v1086_v61 = vrot.slane %v1072_v57, %v2738_v33  ;;  %v2460_v21 = vpop.eup %2459 }
 0x426   : > { %v1396_v27 = vmul.f32 %v2458_v18, %v2794_v29  ;;  %v1397_v28 = vmul.f32 %v2460_v21, %v2796_v30 }
 0x427   : > { %v1091_v62 = vcombine.low %v1063_v58, %v1070_v59  ;;  %v2237_v63 = vcombine.high %v1063_v58, %v1070_v59  ;;  %v1107_v0 = vcombine.low %v1079_v60, %v1086_v61  ;;  %v2238_v1 = vcombine.high %v1079_v60, %v1086_v61 }
 0x428   : > { %v1400_v36 = vpack.c.bf16 %v1396_v27, %v1396_v27  ;;  %v1401_v37 = vpack.c.bf16 %v1397_v28, %v1397_v28 }
 0x429   : > { %v1098_v3 = vrot.slane %v1091_v62, %v2728_v23  ;;  %v1106_v5 = vrot.slane %v2237_v63, %v2728_v23  ;;  %v1114_v6 = vrot.slane %v1107_v0, %v2728_v23  ;;  %v1122_v8 = vrot.slane %v2238_v1, %v2728_v23 }
 0x42b   : > { %v1123_v9 = vcombine.low %v1098_v3, %v1106_v5  ;;  %v1124_v10 = vcombine.high %v1098_v3, %v1106_v5  ;;  %v1139_v14 = vcombine.low %v1114_v6, %v1122_v8  ;;  %v1140_v15 = vcombine.high %v1114_v6, %v1122_v8 }
 0x42d   : > { %v1131_v16 = vrot.slane %v1123_v9, %v2738_v33  ;;  %v1138_v17 = vrot.slane %v1124_v10, %v2738_v33  ;;  %v1147_v19 = vrot.slane %v1139_v14, %v2738_v33  ;;  %v1154_v20 = vrot.slane %v1140_v15, %v2738_v33  ;;  %v2441_v14 = vld [vmem:[%s2983_s20] sm:$0xff]  }
 0x42f   : > { %v1155_v22 = vcombine.low %v1131_v16, %v1147_v19  ;;  %v1156_v24 = vcombine.high %v1131_v16, %v1147_v19  ;;  %v1157_v25 = vcombine.low %v1138_v17, %v1154_v20  ;;  %v1158_v26 = vcombine.high %v1138_v17, %v1154_v20 }
 0x431   : > { %v1404_v31 = vpack.c.bf16 %v1155_v22, %v1155_v22  ;;  %v1405_v11 = vpack.c.bf16 %v1156_v24, %v1156_v24  ;;  %v1406_v34 = vpack.c.bf16 %v1157_v25, %v1157_v25  ;;  %v1407_v35 = vpack.c.bf16 %v1158_v26, %v1158_v26  ;;  %v2442_v24 = vld [vmem:[%s2983_s20 + $0x8] sm:$0xff]  }
 0x433   : > { %v1413_v7 = vsel %vm1411_vm4, %v1404_v31, 0  ;;  %v1459_v32 = vsel %vm1411_vm4, %v1405_v11, 0  ;;  %v1505_v29 = vsel %vm1411_vm4, %v1406_v34, 0  ;;  %v1551_v30 = vsel %vm1411_vm4, %v1407_v35, 0 }
 0x434   : > { %2336 = vmatpush3.bf16.msra.mxu1 %v1413_v7  ;;  %2342 = vmatpush3.bf16.msra.mxu0 %v1459_v32 }
 0x435   : > { %2347 = vmatprep.subr.bf16.mxu1 %v2509_v2  ;;  %2353 = vmatprep.subr.bf16.mxu0 %v2509_v2 }
 0x437   : > { %2338 = vmatmul.mubr.msk.bf16.vlgmr.msra.gmra.mrb[8].mxu1 %vm1167_vm3, %v1400_v36  ;;  %2344 = vmatmul.mubr.msk.bf16.vlgmr.msra.gmra.mrb[12].mxu0 %vm1167_vm3, %v1401_v37 }
 0x438   : > { %2348 = vmatpush3.bf16.msra.mxu1 %v1505_v29  ;;  %2354 = vmatpush3.bf16.msra.mxu0 %v1551_v30 }
 0x439   : > { %2349 = vmatprep.mubr.msk.bf16.mxu1 %vm2510_vm1, %v2509_v2  ;;  %2355 = vmatprep.mubr.msk.bf16.mxu0 %vm2510_vm1, %v2509_v2 }
 0x43a   : > { %2359 = vmatprep.subr.bf16.mxu1 %v2509_v2  ;;  %2367 = vmatprep.subr.bf16.mxu0 %v2509_v2 }
 0x44e   : > { %v1391_v40 = vpop.xlane.xlu0 %1390 }
 0x44f   : > { %2461 = vrcp.f32 %v1391_v40  ;;  %v1388_v13 = vpop.xlane.xlu1 %1387 }
 0x450   : > { %2463 = vrcp.f32 %v1388_v13 }
 0x459   : > { %v2462_v12 = vpop.eup %2461 }
 0x45a   : > { %v2464_v41 = vpop.eup %2463  ;;  %v1399_v42 = vmul.f32 %v2462_v12, %v2804_v38 }
 0x45b   : > { %v1398_v43 = vmul.f32 %v2464_v41, %v2806_v39 }
 0x45c   : > { %v1403_v44 = vpack.c.bf16 %v1399_v42, %v1399_v42 }
 0x45d   : > { %v1402_v45 = vpack.c.bf16 %v1398_v43, %v1398_v43 }
 0x45e   : > { %2356 = vmatmul.mubr.msk.bf16.vlgmr.msra.gmra.mrb[16].mxu0 %vm1167_vm3, %v1403_v44 }
 0x45f   : > { %2350 = vmatmul.mubr.msk.bf16.vlgmr.msra.gmra.mrb[12].mxu1 %vm1167_vm3, %v1402_v45  ;;  %2371 = vmatprep.mubr.msk.bf16.mxu0 %vm2510_vm1, %v2509_v2  ;;  %v2249_v45 = vld [vmem:[%s2984_s14] ss:$0 sm:$0xff] }
 0x460   : > { %2363 = vmatprep.mubr.msk.bf16.mxu1 %vm2510_vm1, %v2509_v2  ;;  %2360 = vmatpush3.bf16.msra.mxu1 %v2441_v14  ;;  %v2255_v14 = vld [vmem:[%s2985_s23] ss:$0 sm:$0xff] }
 0x461   : > { %2361 = vmatprep.subr.bf16.mxu1 %v2509_v2 }
 0x464   : > { %2362 = vmatpush3.bf16.msra.mxu1 %v2442_v24 }
 0x465   : > { %2375 = vmatprep.subr.bf16.mxu1 %v2509_v2 }
 0x50a   : > { %v1449_v46 = vpop.f32.mrb[8].mxu1  ;;  %v1495_v47 = vpop.f32.mrb[12].mxu0 }
 0x50b   : > { %v2339_v48 = vpop.f32.mrb[9].mxu1  ;;  %v2345_v49 = vpop.f32.mrb[13].mxu0 }
 0x50c   : > { %v1452_v50 = vpop.f32.mrb[10].mxu1  ;;  %v1498_v38 = vpop.f32.mrb[14].mxu0 }
 0x50d   : > { %v2340_v51 = vpop.f32.mrb[11].mxu1  ;;  %v2346_v39 = vpop.f32.mrb[15].mxu0 }
 0x531   : > { %v1587_v52 = vpop.f32.mrb[16].mxu0 }
 0x532   : > { %v1541_v53 = vpop.f32.mrb[12].mxu1  ;;  %v1609_v54 = vcombine.low %v1495_v47, %v1587_v52  ;;  %v1610_v55 = vcombine.high %v1495_v47, %v1587_v52  ;;  %v2357_v56 = vpop.f32.mrb[17].mxu0 }
 0x533   : > { %v1593_v57 = vcombine.low %v1449_v46, %v1541_v53  ;;  %v1594_v58 = vcombine.high %v1449_v46, %v1541_v53  ;;  %v2351_v59 = vpop.f32.mrb[13].mxu1  ;;  %v1590_v60 = vpop.f32.mrb[18].mxu0  ;;  %v649_v46 = vunpack.c.l.bf16 %v2697_v4  ;;  %v2443_v4 = vld [vmem:[%s2650_s0] sm:$0xff]  }
 0x534   : > { %v1617_v61 = vrot.slane %v1609_v54, %v2728_v23  ;;  %v1624_v62 = vrot.slane %v1610_v55, %v2728_v23  ;;  %v1544_v63 = vpop.f32.mrb[14].mxu1  ;;  %v2358_v0 = vpop.f32.mrb[19].mxu0  ;;  %2368 = vmatpush3.bf16.msra.mxu0 %v2443_v4  ;;  %v2446_v59 = vld [vmem:[%s2664_s29 + $0x8] sm:$0xff]  }
 0x535   : > { %v1601_v1 = vrot.slane %v1593_v57, %v2728_v23  ;;  %v1608_v3 = vrot.slane %v1594_v58, %v2728_v23  ;;  %v2352_v5 = vpop.f32.mrb[15].mxu1  ;;  %v2444_v57 = vld [vmem:[%s2650_s0 + $0x8] sm:$0xff]   ;;  %2369 = vmatprep.subr.bf16.mxu0 %v2509_v2  ;;  %v2445_v58 = vld [vmem:[%s2664_s29] sm:$0xff]  }
 0x536   : > { %v2253_v0 = vld [vmem:[%s626_s17] ss:$0 sm:$0xff] }
 0x537   : > { %v1625_v6 = vcombine.low %v1601_v1, %v1617_v61  ;;  %v1626_v8 = vcombine.high %v1601_v1, %v1617_v61  ;;  %v1641_v9 = vcombine.low %v1608_v3, %v1624_v62  ;;  %v1642_v10 = vcombine.high %v1608_v3, %v1624_v62  ;;  %v2254_v3 = vld [vmem:[%s629_s13] ss:$0 sm:$0xff] }
 0x538   : > { %2370 = vmatpush3.bf16.msra.mxu0 %v2444_v57 }
 0x539   : > { %v1633_v15 = vrot.slane %v1625_v6, %v2738_v33  ;;  %v1640_v16 = vrot.slane %v1626_v8, %v2738_v33  ;;  %v1649_v17 = vrot.slane %v1641_v9, %v2738_v33  ;;  %v1656_v18 = vrot.slane %v1642_v10, %v2738_v33  ;;  %v2447_v9 = vld [vmem:[%s2664_s29 + $0x10] sm:$0xff]   ;;  %v2448_v10 = vld [vmem:[%s2664_s29 + $0x18] sm:$0xff]  }
 0x53b   : > { %v1661_v19 = vcombine.low %v1633_v15, %v1640_v16  ;;  %v2247_v20 = vcombine.high %v1633_v15, %v1640_v16  ;;  %v1677_v21 = vcombine.low %v1649_v17, %v1656_v18  ;;  %v2248_v22 = vcombine.high %v1649_v17, %v1656_v18 }
 0x53d   : > { %v1668_v25 = vrot.slane %v1661_v19, %v2728_v23  ;;  %v1676_v26 = vrot.slane %v2247_v20, %v2728_v23  ;;  %v1684_v27 = vrot.slane %v1677_v21, %v2728_v23  ;;  %v1692_v28 = vrot.slane %v2248_v22, %v2728_v23 }
 0x53f   : > { %v1694_v31 = vcombine.high %v1668_v25, %v1676_v26  ;;  %v1710_v11 = vcombine.high %v1684_v27, %v1692_v28  ;;  %v1693_v7 = vcombine.low %v1668_v25, %v1676_v26  ;;  %v1709_v32 = vcombine.low %v1684_v27, %v1692_v28 }
 0x541   : > { %v1708_v34 = vrot.slane %v1694_v31, %v2738_v33  ;;  %v1724_v35 = vrot.slane %v1710_v11, %v2738_v33  ;;  %v1701_v36 = vrot.slane %v1693_v7, %v2738_v33  ;;  %v1717_v37 = vrot.slane %v1709_v32, %v2738_v33 }
 0x543   : > { %v1727_v29 = vcombine.low %v1708_v34, %v1724_v35  ;;  %v1726_v30 = vcombine.high %v1701_v36, %v1717_v37  ;;  %v1728_v40 = vcombine.high %v1708_v34, %v1724_v35  ;;  %v1725_v13 = vcombine.low %v1701_v36, %v1717_v37 }
 0x545   : > { %1734 = vrot.lane.b32.xlu1 %v1727_v29, %s2518_s18  ;;  %1730 = vrot.lane.b32.xlu0 %v1726_v30, %s2519_s21 }
 0x549   : > { %1738 = vrot.lane.b32.xlu1 %v1728_v40, %s2520_s22  ;;  %v2265_v40 = vld [vmem:[%s632_s1] ss:$0 sm:$0xff] }
 0x5b7   : > { %v1735_v23 = vpop.permute.xlu1 %1734  ;;  %v1731_v12 = vpop.permute.xlu0 %1730 }
 0x5b8   : > { %v1741_v41 = vsel %vm1167_vm3, %v1725_v13, %v1731_v12 }
 0x5b9   : > { %v1743_v43 = vsel %vm1742_vm5, %v1741_v41, %v1735_v23  ;;  %v2266_v23 = vld [vmem:[%s635_s24] ss:$0 sm:$0xff] }
 0x5bb   : > { %v1739_v42 = vpop.permute.xlu1 %1738 }
 0x5bc   : > { %v1745_v33 = vsel %vm1744_vm6, %v1743_v43, %v1739_v42 }
 0x5bd   : > { %v1746_v44 = vpack.c.bf16 %v1745_v33, %v1745_v33 }
 0x5bf   : > { %2364 = vmatmul.mubr.msk.bf16.vlgmr.msra.gmra.mrb[16].mxu1 %vm673_vm2, %v1746_v44 }
 0x5c0   : > { %2383 = vmatprep.mubr.msk.bf16.mxu1 %vm2510_vm1, %v2509_v2  ;;  %2376 = vmatpush3.bf16.msra.mxu1 %v2445_v58 }
 0x5c1   : > { %2377 = vmatprep.subr.bf16.mxu1 %v2509_v2 }
 0x5c4   : > { %2378 = vmatpush3.bf16.msra.mxu1 %v2446_v59 }
 0x5c5   : > { %2379 = vmatprep.subr.bf16.mxu1 %v2509_v2 }
 0x5c8   : > { %2380 = vmatpush3.bf16.msra.mxu1 %v2447_v9 }
 0x5c9   : > { %2381 = vmatprep.subr.bf16.mxu1 %v2509_v2  ;;  %v2259_v2 = vld [vmem:[%s2986_s25] ss:$0 sm:$0xff] }
 0x5cc   : > { %2382 = vmatpush3.bf16.msra.mxu1 %v2448_v10 }
 0x692   : > { %v1807_v47 = vpop.f32.mrb[16].mxu1 }
 0x693   : > { %v1808_v48 = vadd.f32 %v2249_v45, %v1807_v47  ;;  %v2365_v49 = vpop.f32.mrb[17].mxu1 }
 0x694   : > { %v1810_v50 = vpop.f32.mrb[18].mxu1 }
 0x695   : > { %v2366_v38 = vpop.f32.mrb[19].mxu1  ;;  %v1813_v51 = vadd.f32 %v1808_v48, %v649_v46 }
 0x697   : > { %v1816_v39 = vsel %vm673_vm2, %v1813_v51, 0.0 }
 0x698   : > { %1817 = vadd.xlane.f32.xlu0 %v1816_v39 }
 0x725   : > { %v1818_v52 = vpop.xlane.xlu0 %1817 }
 0x726   : > { %v1820_v53 = vmul.f32 0.03125, %v1818_v52 }
 0x728   : > { %v1821_v54 = vsub.f32 %v1813_v51, %v1820_v53 }
 0x72a   : > { %v1822_v55 = vmul.f32 %v1821_v54, %v1821_v54 }
 0x72c   : > { %v1823_v56 = vsel %vm673_vm2, %v1822_v55, 0.0 }
 0x72d   : > { %1824 = vadd.xlane.f32.xlu1 %v1823_v56 }
 0x7ba   : > { %v1825_v60 = vpop.xlane.xlu1 %1824 }
 0x7bb   : > { %v1826_v61 = vmul.f32 0.03125, %v1825_v60 }
 0x7bd   : > { %v1827_v62 = vadd.f32 1e-05, %v1826_v61 }
 0x7bf   : > { %2465 = vrsqrt.f32 %v1827_v62 }
 0x7c9   : > { %v2466_v63 = vpop.eup %2465 }
 0x7ca   : > { %v1829_v1 = vmul.f32 %v2466_v63, %v1821_v54 }
 0x7cc   : > { %v1836_v5 = vmul.f32 %v2253_v0, %v1829_v1 }
 0x7ce   : > { %v1843_v6 = vadd.f32 %v2254_v3, %v1836_v5 }
 0x7d0   : > { %v1844_v8 = vpack.c.bf16 %v1843_v6, %v1843_v6 }
 0x7d2   : > { %2372 = vmatmul.mubr.msk.bf16.vlgmr.msra.gmra.mrb[20].mxu0 %vm673_vm2, %v1844_v8 }
 0x8a5   : > { %v1905_v15 = vpop.f32.mrb[20].mxu0 }
 0x8a6   : > { %v1906_v16 = vadd.f32 %v2255_v14, %v1905_v15  ;;  %v2373_v17 = vpop.f32.mrb[21].mxu0 }
 0x8a7   : > { %v1908_v18 = vpop.f32.mrb[22].mxu0 }
 0x8a8   : > { %v1911_v19 = vmax.f32 %v1906_v16, 0.0  ;;  %v2374_v20 = vpop.f32.mrb[23].mxu0 }
 0x8aa   : > { %v1912_v21 = vpack.c.bf16 %v1911_v19, %v1911_v19 }
 0x8ac   : > { %2384 = vmatmul.mubr.msk.bf16.vlgmr.msra.gmra.mrb[20].mxu1 %vm1952_vm7, %v1912_v21 }
 0x97f   : > { %v1990_v22 = vpop.f32.mrb[20].mxu1 }
 0x980   : > { %v1991_v24 = vadd.f32 %v2259_v2, %v1990_v22  ;;  %v2385_v25 = vpop.f32.mrb[21].mxu1 }
 0x981   : > { %v1993_v26 = vpop.f32.mrb[22].mxu1 }
 0x982   : > { %v2386_v27 = vpop.f32.mrb[23].mxu1  ;;  %v1996_v28 = vadd.f32 %v1991_v24, %v1843_v6 }
 0x984   : > { %v1999_v31 = vsel %vm673_vm2, %v1996_v28, 0.0 }
 0x985   : > { %2000 = vadd.xlane.f32.xlu0 %v1999_v31 }
 0xa12   : > { %v2001_v11 = vpop.xlane.xlu0 %2000 }
 0xa13   : > { %v2002_v7 = vmul.f32 0.03125, %v2001_v11 }
 0xa15   : > { %v2003_v32 = vsub.f32 %v1996_v28, %v2002_v7 }
 0xa17   : > { %v2004_v34 = vmul.f32 %v2003_v32, %v2003_v32 }
 0xa19   : > { %v2005_v35 = vsel %vm673_vm2, %v2004_v34, 0.0 }
 0xa1a   : > { %2006 = vadd.xlane.f32.xlu0 %v2005_v35 }
 0xaa7   : > { %v2007_v36 = vpop.xlane.xlu0 %2006 }
 0xaa8   : > { %v2008_v37 = vmul.f32 0.03125, %v2007_v36 }
 0xaaa   : > { %v2009_v29 = vadd.f32 1e-05, %v2008_v37 }
 0xaac   : > { %2467 = vrsqrt.f32 %v2009_v29 }
 0xab6   : > { %v2468_v30 = vpop.eup %2467 }
 0xab7   : > { %v2011_v13 = vmul.f32 %v2468_v30, %v2003_v32 }
 0xab9   : > { %v2018_v12 = vmul.f32 %v2265_v40, %v2011_v13 }
 0xabb   : > { %v2025_v41 = vadd.f32 %v2266_v23, %v2018_v12 }
 0xabd   : > { %v2026_v42 = vpack.c.bf16 %v2025_v41, %v2025_v41 }
 0xabf   : > { %2028 = vst.msk [vmem:[%s2685_s28] sm:$0xf] %vm2027_vm8, %v2026_v42 }
 0xac0 PF: > { %s2987_s21 = sld [smem:[#allocation5_spill]]  ;;  %s2988_s25 = sld [smem:[#allocation3_spill]] }
 0xac1   : > { %s2989_s26 = sld [smem:[#allocation4_spill]]  ;;  %s2990_s27 = sld [smem:[#allocation6_spill]] }
 0xac2   : > { %s2991_s28 = sld [smem:[#allocation7_spill]] }
 0xac6   : > { %s23_s29 = sadd.s32 1, %s2987_s21  }
 0xac7   : > { %p20_p8 = scmp.ge.s32.totalorder %s23_s29, 10  }
 0xac9   :  { %22 = sbr.rel (!%p20_p8) target bundleno = 7 (0x7), region = 142 }

// kernel: emotionwave_forward.9
= control target key start
LH: loop header
LB: loop body
LE: loop exit
PB: predicated region body
PF: predicated region fallthrough
CT: control target
= control target key end

     0   :  { %vm52_vm0 = vcmask 261120   ;;  %s186_s1 = inlined_call_operand.vmem [shape: bf16[32,128], index: 1, kind: input, shape index: {}]   ;;  %s187_s0 = inlined_call_operand.vmem [shape: bf16[32,32], index: 0, kind: input, shape index: {}]   ;;  %s188_s2 = inlined_call_operand.vmem [shape: f32[1,128], index: 2, kind: input, shape index: {}]   ;;  %s189_s3 = inlined_call_operand.vmem [shape: f32[32,128], index: 3, kind: output, shape index: {}]  }
   0x1   :  { %v135_v0 = vld [vmem:[%s186_s1] sm:$0xff]   ;;  %v136_v1 = vld [vmem:[%s186_s1 + $0x8] sm:$0xff]  }
   0x2   :  { %127 = vmatprep.subr.bf16.mxu0 %v135_v0  ;;  %v137_v2 = vld [vmem:[%s187_s0] sm:$0xff]   ;;  %v138_v3 = vld [vmem:[%s187_s0 + $0x8] sm:$0xff]  }
   0x3   :  { %128 = vmatpush3.bf16.msra.mxu0 %v135_v0  ;;  %131 = vmatprep.mubr.msk.bf16.mxu0 %vm52_vm0, %v137_v2  ;;  %v116_v4 = vld [vmem:[%s188_s2] ss:$0 sm:$0xff] }
   0x4   :  { %129 = vmatprep.subr.bf16.mxu0 %v136_v1 }
   0x7   :  { %130 = vmatpush3.bf16.msra.mxu0 %v136_v1 }
   0xa   :  { %132 = vmatmul.mubr.msk.bf16.vlgmr.msra.gmra.mrb[0].mxu0 %vm52_vm0, %v138_v3 }
  0xdd   :  { %v133_v5 = vpop.f32.mrb[0].mxu0 }
  0xde   :  { %v102_v6 = vadd.f32 %v133_v5, %v116_v4  ;;  %v93_v7 = vpop.f32.mrb[1].mxu0 }
  0xdf   :  { %v94_v8 = vadd.f32 %v116_v4, %v93_v7  ;;  %v134_v9 = vpop.f32.mrb[2].mxu0 }
  0xe0   :  { %110 = vst [vmem:[%s189_s3 + $0x10] sm:$0xff] %v102_v6  ;;  %v105_v10 = vadd.f32 %v134_v9, %v116_v4  ;;  %v96_v11 = vpop.f32.mrb[3].mxu0 }
  0xe1   :  { %108 = vst [vmem:[%s189_s3] sm:$0xff] %v94_v8  ;;  %v97_v12 = vadd.f32 %v116_v4, %v96_v11 }
  0xe2   :  { %111 = vst [vmem:[%s189_s3 + $0x18] sm:$0xff] %v105_v10 }
  0xe3   :  { %109 = vst [vmem:[%s189_s3 + $0x8] sm:$0xff] %v97_v12 }

// kernel: emotionwave_forward.8
= control target key start
LH: loop header
LB: loop body
LE: loop exit
PB: predicated region body
PF: predicated region fallthrough
CT: control target
= control target key end

     0   :  { %s3435_s29 = smov 0   ;;  %s3437_s30 = smov 0   ;;  %s3987_s0 = inlined_call_operand.vmem [shape: bf16[2,16,32], index: 0, kind: input, shape index: {}]   ;;  %s3988_s1 = inlined_call_operand.vmem [shape: bf16[2,16,32], index: 1, kind: input, shape index: {}]   ;;  %s3989_s2 = inlined_call_operand.vmem [shape: bf16[2,32,96], index: 2, kind: input, shape index: {}]   ;;  %s3990_s3 = inlined_call_operand.vmem [shape: f32[2,1,96], index: 3, kind: input, shape index: {}]   ;;  %s3991_s4 = inlined_call_operand.vmem [shape: bf16[2,32,32], index: 4, kind: input, shape index: {}]   ;;  %s3992_s5 = inlined_call_operand.vmem [shape: f32[2,1,32], index: 5, kind: input, shape index: {}, may-alias: {5,9,11,13}]   ;;  %s3993_s6 = inlined_call_operand.vmem [shape: bf16[2,32,64], index: 6, kind: input, shape index: {}]   ;;  %s3994_s7 = inlined_call_operand.vmem [shape: f32[2,1,64], index: 7, kind: input, shape index: {}]   ;;  %s3995_s8 = inlined_call_operand.vmem [shape: bf16[2,64,32], index: 8, kind: input, shape index: {}]   ;;  %s3996_s9 = inlined_call_operand.vmem [shape: f32[2,1,32], index: 9, kind: input, shape index: {}, may-alias: {5,9,11,13}]   ;;  %s3997_s10 = inlined_call_operand.vmem [shape: f32[2,1,32], index: 10, kind: input, shape index: {}, may-alias: {10,12}]   ;;  %s3998_s11 = inlined_call_operand.vmem [shape: f32[2,1,32], index: 11, kind: input, shape index: {}, may-alias: {5,9,11,13}]   ;;  %s3999_s12 = inlined_call_operand.vmem [shape: f32[2,1,32], index: 12, kind: input, shape index: {}, may-alias: {10,12}]   ;;  %s4000_s13 = inlined_call_operand.vmem [shape: f32[2,1,32], index: 13, kind: input, shape index: {}, may-alias: {5,9,11,13}]   ;;  %s4001_s14 = inlined_call_operand.vmem [shape: bf16[2,16,32], index: 14, kind: output, shape index: {}]  }
   0x1   :  { %4006 = sst [smem:[#allocation8_spill]] %s3987_s0  ;;  %s3439_s15 = smov 0  }
   0x2   :  { %4007 = sst [smem:[#allocation9_spill]] %s3988_s1  ;;  %s3441_s16 = smov 0  }
   0x3   :  { %4008 = sst [smem:[#allocation10_spill]] %s3989_s2  ;;  %s3443_s17 = smov 0  }
   0x4   :  { %4009 = sst [smem:[#allocation11_spill]] %s3991_s4 }
   0x5   :  { %4010 = sst [smem:[#allocation12_spill]] %s3993_s6 }
   0x6   :  { %4011 = sst [smem:[#allocation13_spill]] %s3994_s7 }
   0x7   :  { %4012 = sst [smem:[#allocation14_spill]] %s3995_s8 }
   0x8   :  { %4013 = sst [smem:[#allocation15_spill]] %s4001_s14 }
   0x9 LB: > { %4014 = sst [smem:[#allocation2_spill]] %s3329_s29  ;;  %s33_s18 = sadd.s32 1, %s3337_s15  ;;  %s3345_s17 = sphi %s3443_s17, %s24_s17   ;;  %s3341_s16 = sphi %s3441_s16, %s4040_s16   ;;  %s3337_s15 = sphi %s3439_s15, %s4039_s15   ;;  %s3333_s30 = sphi %s3437_s30, %s4038_s30   ;;  %s3329_s29 = sphi %s3435_s29, %s4037_s29  }
   0xa   : > { %4015 = sst [smem:[#allocation3_spill]] %s3337_s15  ;;  %s36_s19 = sadd.s32 1, %s3341_s16 }
   0xb   : > { %4016 = sst [smem:[#allocation4_spill]] %s3341_s16  ;;  %p34_p0 = scmp.ge.s32.totalorder %s33_s18, 2 }
   0xc   : > { %4017 = sst [smem:[#allocation5_spill]] %s3345_s17  ;;  %p2992_p1 = scmp.ge.s32.totalorder %s3345_s17, 1 }
   0xd   : > { %p538_p2 = scmp.lt.s32.totalorder %s3345_s17, 5  ;;  %s4042_s18 = smov (%p34_p0, %s33_s18), 0 }
   0xe   : > { %4018 = sst [smem:[#allocation6_spill]] %s4042_s18  ;;  %s4044_s19 = smov (!%p34_p0, %s36_s19), %s3341_s16 }
   0xf   : > { %p539_p3 = pnand %p2992_p1, %p538_p2  ;;  %p38_p4 = scmp.ge.s32.totalorder %s4044_s19, 2 }
  0x10   : > { %p633_p5 = scmp.lt.s32.totalorder (!%p539_p3), %s3333_s30, 1  ;;  %p643_p6 = scmp.lt.s32.totalorder (!%p539_p3), %s3329_s29, 1 }
  0x11   : > { %s4046_s19 = smov (%p38_p4, %s4044_s19), 0  ;;  %542 = sbr.rel (%p539_p3) target bundleno = 2781 (0xadd), region = 76 }
  0x12   : > { %4019 = sst [smem:[#allocation7_spill]] %s4046_s19  ;;  %s4020_s0 = sld [smem:[#allocation8_spill]] (!%p539_p3) }
  0x13   : > { %s4022_s2 = sld [smem:[#allocation10_spill]] (!%p539_p3)  ;;  %s4023_s4 = sld [smem:[#allocation11_spill]] (!%p539_p3) }
  0x14   : > { %s4024_s6 = sld [smem:[#allocation12_spill]] (!%p539_p3)  ;;  %s4026_s8 = sld [smem:[#allocation14_spill]] (!%p539_p3) }
  0x18   : > { %s4048_s30 = smov (!%p633_p5, %s3333_s30), 1 }
  0x19   : > { %s3469_s20 = scalar_select %p643_p6, %s3329_s29, 1 }
  0x1a   : > { %s3471_s21 = sshll.u32 %s4048_s30, 3 }
  0x1b   : > { %s637_s24 = scalar_lea.vmem %s4020_s0, %s3471_s21  ;;  %s3060_s28 = sshll.u32 %s3469_s20, 4 }
  0x1c   : > { %s647_s17 = scalar_lea.vmem %s4022_s2, %s3060_s28  ;;  %s3492_s22 = scalar_lea.vmem %s4023_s4, %s3060_s28 }
  0x1d   : > { %s3501_s1 = scalar_lea.vmem %s4024_s6, %s3060_s28  ;;  %s3063_s15 = sshll.u32 %s3469_s20, 5 }
  0x1e   : > { %s3511_s14 = scalar_lea.vmem %s4026_s8, %s3063_s15  ;;  %s677_s27 = scalar_lea.vmem %s3997_s10, %s3469_s20 }
  0x1f   : > { %s680_s6 = scalar_lea.vmem %s3998_s11, %s3469_s20  ;;  %s683_s16 = scalar_lea.vmem %s3999_s12, %s3469_s20 }
  0x20   : > { %s686_s15 = scalar_lea.vmem %s4000_s13, %s3469_s20  ;;  %s4027_s4 = sld [smem:[#allocation15_spill]] }
  0x21   : > { %s4028_s0 = sld [smem:[#allocation2_spill]] }
  0x26   : > { %s3537_s29 = scalar_lea.vmem %s4027_s4, %s3471_s21 }
  0x27   : > { %p3007_p7 = scmp.ne.s32.totalorder %s4028_s0, 0 }
  0x28   : > { %v697_v0 = vld [vmem:[%s637_s24] sm:$0xf] (!%p3007_p7)  ;;  %vm699_vm0 = vcmask (!%p3007_p7), 257024   ;;  %v698_v1 = vld [vmem:[%s637_s24 + $0x4] sm:$0xf] (!%p3007_p7) }
  0x29   : > { %696 = sbr.rel (%p3007_p7) target bundleno = 48 (0x30), region = 80  ;;  %700 = vst.msk [vmem:[%s3537_s29] sm:$0xf] (!%p3007_p7), %vm699_vm0, %v697_v0  ;;  %701 = vst.msk [vmem:[%s3537_s29 + $0x4] sm:$0xf] (!%p3007_p7), %vm699_vm0, %v698_v1 }
  0x30 PF: > { %v3257_v2 = vld [vmem:[%s647_s17] sm:$0xff]   ;;  %v3347_v3 = vmov 0.0   ;;  %v3258_v4 = vld [vmem:[%s647_s17 + $0x8] sm:$0xff]   ;;  %vm3348_vm1 = vmmov 0   ;;  %s4029_s24 = sld [smem:[#allocation9_spill]]  ;;  %vm736_vm2 = vcmask 261120   ;;  %s4031_s0 = scalar_lea.vmem %s3990_s3, %s3469_s20  ;;  %v806_v29 = vlaneseq }
  0x31   : > { %3105 = vmatprep.subr.bf16.mxu0 %v3347_v3  ;;  %3113 = vmatprep.subr.bf16.mxu1 %v3347_v3  ;;  %v3068_v5 = vld [vmem:[%s3537_s29] sm:$0xff]   ;;  %s3349_s23 = smov 112   ;;  %s3350_s28 = smov 120   ;;  %v3353_v27 = vmov 1983009808   ;;  %vm1673_vm3 = vcmask 64512  }
  0x32   : > { %3106 = vmatpush3.bf16.msra.mxu0 %v3257_v2  ;;  %3109 = vmatprep.mubr.msk.bf16.mxu0 %vm3348_vm1, %v3347_v3  ;;  %v3069_v7 = vunpack.c.l.bf16 %v3068_v5  ;;  %v3070_v8 = vunpack.c.h.bf16 %v3068_v5  ;;  %v3008_v14 = vld [vmem:[%s4031_s0] ss:$0 sm:$0xff]  ;;  %s3351_s26 = smov 104   ;;  %s3352_s18 = smov 96   ;;  %v804_v28 = vunpack.c.l.s4 %v3353_v27  ;;  %v3601_v31 = vshrl.u32 %v806_v29, 7 }
  0x33   : > { %3107 = vmatprep.subr.bf16.mxu0 %v3347_v3  ;;  %3115 = vmatprep.mubr.msk.bf16.mxu1 %vm3348_vm1, %v3347_v3  ;;  %v3354_v32 = vmov 1934713408   ;;  %vm1887_vm6 = vcmask 130048   ;;  %s3356_s19 = smov 64   ;;  %s3358_s2 = smov 8   ;;  %vm2460_vm7 = vcmask 195584  }
  0x34   : > { %v805_v30 = vunpack.c.0.s8 %v804_v28  ;;  %v836_v33 = vunpack.c.l.s4 %v3354_v32  ;;  %s3359_s30 = smov 24   ;;  %s4032_s8 = scalar_lea.vmem %s3992_s5, %s3469_s20  ;;  %vm2688_vm8 = vcmask 523264   ;;  %vm2787_vm9 = vcmask 257024  }
  0x35   : > { %s4033_s0 = sld [smem:[#allocation13_spill]] }
  0x36   : > { %s4030_s25 = scalar_lea.vmem %s4029_s24, %s3471_s21  ;;  %3108 = vmatpush3.bf16.msra.mxu0 %v3258_v4  ;;  %v3610_v37 = vsub.s32 %v805_v30, %v3601_v31  ;;  %v837_v43 = vunpack.c.0.s8 %v836_v33 }
  0x37   : > { %v3072_v6 = vld [vmem:[%s4030_s25] sm:$0xff]   ;;  %3119 = vmatprep.subr.bf16.mxu0 %v3347_v3 }
  0x38   : > { %v3073_v9 = vunpack.c.l.bf16 %v3072_v6  ;;  %v3074_v10 = vunpack.c.h.bf16 %v3072_v6  ;;  %v3631_v53 = vsub.s32 %v837_v43, %v3601_v31 }
  0x3a   : > { %v3555_v11 = vadd.f32 %v3073_v9, %v3069_v7  ;;  %v3557_v12 = vadd.f32 %v3074_v10, %v3070_v8 }
  0x3c   : > { %v712_v13 = vpack.c.bf16 %v3557_v12, %v3555_v11 }
  0x3e   : > { %3110 = vmatmul.mubr.msk.bf16.vlgmr.msra.gmra.mrb[0].mxu0 %vm736_vm2, %v712_v13 }
  0x3f   : > { %3121 = vmatprep.mubr.msk.bf16.mxu0 %vm3348_vm1, %v3347_v3 }
 0x111   : > { %v774_v15 = vpop.f32.mrb[0].mxu0 }
 0x112   : > { %v3570_v16 = vadd.f32 %v3008_v14, %v774_v15  ;;  %v3111_v17 = vpop.f32.mrb[1].mxu0 }
 0x113   : > { %v777_v18 = vpop.f32.mrb[2].mxu0 }
 0x114   : > { %789 = vrot.lane.b32.xlu1 %v3570_v16, %s3349_s23  ;;  %783 = vrot.lane.b32.xlu0 %v3570_v16, %s3350_s28  ;;  %v3112_v19 = vpop.f32.mrb[3].mxu0  ;;  %v3574_v20 = vadd.f32 %v3008_v14, %v777_v18 }
 0x118   : > { %791 = vrot.lane.b32.xlu1 %v3574_v20, %s3349_s23  ;;  %785 = vrot.lane.b32.xlu0 %v3574_v20, %s3350_s28  ;;  %s4034_s23 = scalar_lea.vmem %s4033_s0, %s3469_s20 }
 0x11c   : > { %797 = vrot.lane.b32.xlu1 %v3574_v20, %s3351_s26  ;;  %795 = vrot.lane.b32.xlu0 %v3570_v16, %s3351_s26 }
 0x120   : > { %1075 = vrot.lane.b32.xlu1 %v3574_v20, %s3352_s18  ;;  %1073 = vrot.lane.b32.xlu0 %v3570_v16, %s3352_s18 }
 0x186   : > { %v3582_v21 = vpop.permute.xlu1 %789  ;;  %v3584_v22 = vpop.permute.xlu0 %783 }
 0x187   : > { %1077 = vrot.lane.b32.xlu0 %v3584_v22, %s3352_s18  ;;  %v801_v39 = vcombine.low %v3570_v16, %v3582_v21  ;;  %v802_v42 = vcombine.high %v3570_v16, %v3582_v21 }
 0x189   : > { %v809_v49 = vrot.slane %v801_v39, %v3610_v37  ;;  %v816_v52 = vrot.slane %v802_v42, %v3610_v37 }
 0x18a   : > { %v3587_v23 = vpop.permute.xlu0 %785  ;;  %v3591_v24 = vpop.permute.xlu1 %791 }
 0x18b   : > { %1081 = vrot.lane.b32.xlu0 %v3582_v21, %s3352_s18  ;;  %1079 = vrot.lane.b32.xlu1 %v3587_v23, %s3352_s18  ;;  %v869_v38 = vcombine.low %v3574_v20, %v3591_v24  ;;  %v870_v40 = vcombine.high %v3574_v20, %v3591_v24 }
 0x18d   : > { %v877_v47 = vrot.slane %v869_v38, %v3610_v37  ;;  %v884_v50 = vrot.slane %v870_v40, %v3610_v37 }
 0x18e   : > { %v3593_v25 = vpop.permute.xlu0 %795  ;;  %v3597_v26 = vpop.permute.xlu1 %797 }
 0x18f   : > { %1083 = vrot.lane.b32.xlu1 %v3591_v24, %s3352_s18  ;;  %1085 = vrot.lane.b32.xlu0 %v3593_v25, %s3352_s18  ;;  %v885_v34 = vcombine.low %v3587_v23, %v3597_v26  ;;  %v886_v35 = vcombine.high %v3587_v23, %v3597_v26  ;;  %v817_v36 = vcombine.low %v3584_v22, %v3593_v25 }
 0x190   : > { %v818_v41 = vcombine.high %v3584_v22, %v3593_v25 }
 0x191   : > { %v893_v44 = vrot.slane %v885_v34, %v3610_v37  ;;  %v900_v45 = vrot.slane %v886_v35, %v3610_v37  ;;  %v825_v46 = vrot.slane %v817_v36, %v3610_v37 }
 0x192   : > { %v1074_v48 = vpop.permute.xlu0 %1073  ;;  %v832_v51 = vrot.slane %v818_v41, %v3610_v37  ;;  %v1076_v60 = vpop.permute.xlu1 %1075 }
 0x193   : > { %1087 = vrot.lane.b32.xlu1 %v3597_v26, %s3352_s18  ;;  %v901_v54 = vcombine.low %v877_v47, %v893_v44  ;;  %v902_v55 = vcombine.high %v877_v47, %v893_v44  ;;  %v917_v56 = vcombine.low %v884_v50, %v900_v45  ;;  %v918_v57 = vcombine.high %v884_v50, %v900_v45 }
 0x194   : > { %v833_v58 = vcombine.low %v809_v49, %v825_v46  ;;  %v834_v59 = vcombine.high %v809_v49, %v825_v46  ;;  %v849_v62 = vcombine.low %v816_v52, %v832_v51  ;;  %v850_v63 = vcombine.high %v816_v52, %v832_v51 }
 0x195   : > { %v909_v0 = vrot.slane %v901_v54, %v3631_v53  ;;  %v916_v1 = vrot.slane %v902_v55, %v3631_v53  ;;  %v3636_v2 = vrot.slane %v917_v56, %v3631_v53  ;;  %v3639_v4 = vrot.slane %v918_v57, %v3631_v53 }
 0x196   : > { %v841_v5 = vrot.slane %v833_v58, %v3631_v53  ;;  %v848_v6 = vrot.slane %v834_v59, %v3631_v53  ;;  %v3644_v9 = vrot.slane %v849_v62, %v3631_v53  ;;  %v3647_v10 = vrot.slane %v850_v63, %v3631_v53 }
 0x197   : > { %v1005_v13 = vcombine.low %v909_v0, %v916_v1  ;;  %v3014_v14 = vcombine.high %v909_v0, %v916_v1  ;;  %v1021_v15 = vcombine.low %v3636_v2, %v3639_v4  ;;  %v3015_v28 = vcombine.high %v3636_v2, %v3639_v4 }
 0x198   : > { %v937_v17 = vcombine.low %v841_v5, %v848_v6  ;;  %v3012_v30 = vcombine.high %v841_v5, %v848_v6  ;;  %v953_v32 = vcombine.low %v3644_v9, %v3647_v10  ;;  %v3013_v33 = vcombine.high %v3644_v9, %v3647_v10 }
 0x199   : > { %v3658_v38 = vrot.slane %v1005_v13, %v3610_v37  ;;  %v3661_v39 = vrot.slane %v3014_v14, %v3610_v37  ;;  %v3667_v43 = vrot.slane %v1021_v15, %v3610_v37 }
 0x19a   : > { %v3664_v42 = vrot.slane %v937_v17, %v3610_v37  ;;  %v3674_v51 = vrot.slane %v3012_v30, %v3610_v37  ;;  %v3677_v52 = vrot.slane %v953_v32, %v3610_v37 }
 0x1f9   : > { %v1078_v61 = vpop.permute.xlu0 %1077 }
 0x1fd   : > { %v1080_v7 = vpop.permute.xlu1 %1079  ;;  %v1082_v8 = vpop.permute.xlu0 %1081 }
 0x1fe   : > { %v1097_v18 = vcombine.low %v1074_v48, %v1082_v8  ;;  %v1098_v19 = vcombine.high %v1074_v48, %v1082_v8 }
 0x200   : > { %v1105_v44 = vrot.slane %v1097_v18, %v3610_v37  ;;  %v1112_v45 = vrot.slane %v1098_v19, %v3610_v37 }
 0x201   : > { %v1084_v27 = vpop.permute.xlu1 %1083  ;;  %v1086_v34 = vpop.permute.xlu0 %1085 }
 0x202   : > { %v1113_v35 = vcombine.low %v1078_v61, %v1086_v34  ;;  %v1114_v36 = vcombine.high %v1078_v61, %v1086_v34  ;;  %v1165_v40 = vcombine.low %v1076_v60, %v1084_v27  ;;  %v1166_v41 = vcombine.high %v1076_v60, %v1084_v27 }
 0x204   : > { %v1121_v46 = vrot.slane %v1113_v35, %v3610_v37  ;;  %v1128_v47 = vrot.slane %v1114_v36, %v3610_v37  ;;  %v1173_v58 = vrot.slane %v1165_v40, %v3610_v37  ;;  %v1180_v59 = vrot.slane %v1166_v41, %v3610_v37 }
 0x205   : > { %v1088_v48 = vpop.permute.xlu1 %1087 }
 0x206   : > { %v1181_v49 = vcombine.low %v1080_v7, %v1088_v48  ;;  %v1182_v50 = vcombine.high %v1080_v7, %v1088_v48  ;;  %v1129_v54 = vcombine.low %v1105_v44, %v1121_v46  ;;  %v1130_v55 = vcombine.high %v1105_v44, %v1121_v46 }
 0x207   : > { %v1145_v56 = vcombine.low %v1112_v45, %v1128_v47  ;;  %v1146_v57 = vcombine.high %v1112_v45, %v1128_v47  ;;  %v968_v44 = vrot.slane %v3013_v33, %v3610_v37  ;;  %v1036_v45 = vrot.slane %v3015_v28, %v3610_v37 }
 0x208   : > { %v1189_v60 = vrot.slane %v1181_v49, %v3610_v37  ;;  %v1196_v61 = vrot.slane %v1182_v50, %v3610_v37  ;;  %v1137_v62 = vrot.slane %v1129_v54, %v3631_v53  ;;  %v1144_v63 = vrot.slane %v1130_v55, %v3631_v53 }
 0x209   : > { %v1153_v0 = vrot.slane %v1145_v56, %v3631_v53  ;;  %v1160_v1 = vrot.slane %v1146_v57, %v3631_v53  ;;  %v969_v33 = vcombine.low %v3664_v42, %v3674_v51  ;;  %v985_v28 = vcombine.low %v3677_v52, %v968_v44 }
 0x20a   : > { %v1197_v2 = vcombine.low %v1173_v58, %v1189_v60  ;;  %v1198_v4 = vcombine.high %v1173_v58, %v1189_v60  ;;  %v1213_v5 = vcombine.low %v1180_v59, %v1196_v61  ;;  %v1214_v6 = vcombine.high %v1180_v59, %v1196_v61 }
 0x20b   : > { %v1233_v7 = vcombine.low %v1137_v62, %v1144_v63  ;;  %v3016_v8 = vcombine.high %v1137_v62, %v1144_v63  ;;  %v1249_v9 = vcombine.low %v1153_v0, %v1160_v1  ;;  %v3017_v10 = vcombine.high %v1153_v0, %v1160_v1 }
 0x20c   : > { %v1205_v13 = vrot.slane %v1197_v2, %v3631_v53  ;;  %v1212_v14 = vrot.slane %v1198_v4, %v3631_v53  ;;  %v1221_v15 = vrot.slane %v1213_v5, %v3631_v53  ;;  %v1228_v17 = vrot.slane %v1214_v6, %v3631_v53 }
 0x20d   : > { %v1240_v18 = vrot.slane %v1233_v7, %v3610_v37  ;;  %v1248_v19 = vrot.slane %v3016_v8, %v3610_v37  ;;  %v1256_v27 = vrot.slane %v1249_v9, %v3610_v37  ;;  %v1264_v30 = vrot.slane %v3017_v10, %v3610_v37 }
 0x20e   : > { %v1301_v32 = vcombine.low %v1205_v13, %v1212_v14  ;;  %v3018_v34 = vcombine.high %v1205_v13, %v1212_v14  ;;  %v1317_v35 = vcombine.low %v1221_v15, %v1228_v17  ;;  %v3019_v36 = vcombine.high %v1221_v15, %v1228_v17 }
 0x20f   : > { %v1265_v40 = vcombine.low %v1240_v18, %v1248_v19  ;;  %v1281_v41 = vcombine.low %v1256_v27, %v1264_v30  ;;  %v1037_v59 = vcombine.low %v3658_v38, %v3661_v39  ;;  %v1053_v60 = vcombine.low %v3667_v43, %v1036_v45 }
 0x210   : > { %v1308_v46 = vrot.slane %v1301_v32, %v3610_v37  ;;  %v1316_v47 = vrot.slane %v3018_v34, %v3610_v37  ;;  %v1324_v48 = vrot.slane %v1317_v35, %v3610_v37  ;;  %v1332_v49 = vrot.slane %v3019_v36, %v3610_v37 }
 0x211   : > { %v1273_v50 = vrot.slane %v1265_v40, %v3631_v53  ;;  %v1289_v54 = vrot.slane %v1281_v41, %v3631_v53  ;;  %v1266_v63 = vcombine.high %v1240_v18, %v1248_v19  ;;  %v1282_v0 = vcombine.high %v1256_v27, %v1264_v30 }
 0x212   : > { %v1333_v55 = vcombine.low %v1308_v46, %v1316_v47  ;;  %v1349_v56 = vcombine.low %v1324_v48, %v1332_v49  ;;  %v1334_v57 = vcombine.high %v1308_v46, %v1316_v47  ;;  %v1350_v58 = vcombine.high %v1324_v48, %v1332_v49 }
 0x213   : > { %v1297_v1 = vcombine.low %v1273_v50, %v1289_v54  ;;  %v1298_v2 = vcombine.high %v1273_v50, %v1289_v54  ;;  %v977_v8 = vrot.slane %v969_v33, %v3631_v53  ;;  %v993_v9 = vrot.slane %v985_v28, %v3631_v53 }
 0x214   : > { %v1341_v61 = vrot.slane %v1333_v55, %v3631_v53  ;;  %v1357_v62 = vrot.slane %v1349_v56, %v3631_v53  ;;  %v1348_v6 = vrot.slane %v1334_v57, %v3631_v53  ;;  %v1364_v7 = vrot.slane %v1350_v58, %v3631_v53 }
 0x215   : > { %v1045_v10 = vrot.slane %v1037_v59, %v3631_v53  ;;  %v1061_v13 = vrot.slane %v1053_v60, %v3631_v53  ;;  %v1280_v17 = vrot.slane %v1266_v63, %v3631_v53  ;;  %v1296_v18 = vrot.slane %v1282_v0, %v3631_v53 }
 0x216   : > { %v1365_v4 = vcombine.low %v1341_v61, %v1357_v62  ;;  %v1366_v5 = vcombine.high %v1341_v61, %v1357_v62  ;;  %v970_v19 = vcombine.high %v3664_v42, %v3674_v51  ;;  %v986_v27 = vcombine.high %v3677_v52, %v968_v44 }
 0x217   : > { %v1038_v30 = vcombine.high %v3658_v38, %v3661_v39  ;;  %v1054_v32 = vcombine.high %v3667_v43, %v1036_v45  ;;  %v1367_v36 = vcombine.low %v1348_v6, %v1364_v7  ;;  %v1368_v40 = vcombine.high %v1348_v6, %v1364_v7 }
 0x218   : > { %v1669_v14 = vpack.c.bf16 %v1365_v4, %v1297_v1  ;;  %v1670_v15 = vpack.c.bf16 %v1366_v5, %v1298_v2  ;;  %v1001_v41 = vcombine.low %v977_v8, %v993_v9  ;;  %v1002_v46 = vcombine.high %v977_v8, %v993_v9 }
 0x219   : > { %v1069_v47 = vcombine.low %v1045_v10, %v1061_v13  ;;  %v1070_v48 = vcombine.high %v1045_v10, %v1061_v13  ;;  %v1299_v42 = vcombine.low %v1280_v17, %v1296_v18  ;;  %v1300_v38 = vcombine.high %v1280_v17, %v1296_v18 }
 0x21a   : > { %v1678_v34 = vsel %vm1673_vm3, %v1669_v14, 0  ;;  %v1725_v35 = vsel %vm1673_vm3, %v1670_v15, 0  ;;  %v984_v51 = vrot.slane %v970_v19, %v3631_v53  ;;  %v1000_v52 = vrot.slane %v986_v27, %v3631_v53 }
 0x21b   : > { %3114 = vmatpush3.bf16.xpose.msra.mxu1 %v1678_v34  ;;  %3120 = vmatpush3.bf16.xpose.msra.mxu0 %v1725_v35  ;;  %v1671_v39 = vpack.c.bf16 %v1367_v36, %v1299_v42  ;;  %v1672_v43 = vpack.c.bf16 %v1368_v40, %v1300_v38  ;;  %v1665_v44 = vpack.c.bf16 %v1069_v47, %v1001_v41  ;;  %v1874_v60 = vand.u32 127, %v806_v29 }
 0x21c   : > { %3125 = vmatprep.subr.bf16.mxu1 %v3347_v3  ;;  %3131 = vmatprep.subr.bf16.mxu0 %v3347_v3  ;;  %v1666_v45 = vpack.c.bf16 %v1070_v48, %v1002_v46  ;;  %v1052_v49 = vrot.slane %v1038_v30, %v3631_v53  ;;  %v1068_v50 = vrot.slane %v1054_v32, %v3631_v53  ;;  %v1872_v61 = vadd.s32 8, %v3601_v31 }
 0x21d   : > { %v1772_v54 = vsel %vm1673_vm3, %v1671_v39, 0  ;;  %v1819_v55 = vsel %vm1673_vm3, %v1672_v43, 0  ;;  %v1003_v56 = vcombine.low %v984_v51, %v1000_v52  ;;  %v1004_v58 = vcombine.high %v984_v51, %v1000_v52 }
 0x21e   : > { %v1071_v57 = vcombine.low %v1052_v49, %v1068_v50  ;;  %v1072_v33 = vcombine.high %v1052_v49, %v1068_v50  ;;  %vm1875_vm4 = vcmp.le.s32.totalorder %v1874_v60, %v3601_v31  ;;  %vm1876_vm5 = vcmp.le.s32.totalorder %v1874_v60, %v1872_v61 }
 0x21f   : > { %v3355_v0 = vmov -1e+09  }
 0x220   : > { %v1667_v28 = vpack.c.bf16 %v1071_v57, %v1003_v56  ;;  %v1668_v59 = vpack.c.bf16 %v1072_v33, %v1004_v58  ;;  %v1877_v1 = vsel %vm1875_vm4, 0.0, %v3355_v0  ;;  %v1878_v9 = vsel %vm1876_vm5, 0.0, %v3355_v0 }
 0x222   : > { %3116 = vmatmul.mubr.msk.bf16.vlgmr.msra.gmra.mrb[0].mxu1 %vm1673_vm3, %v1665_v44  ;;  %3122 = vmatmul.mubr.msk.bf16.vlgmr.msra.gmra.mrb[4].mxu0 %vm1673_vm3, %v1666_v45 }
 0x223   : > { %3126 = vmatpush3.bf16.xpose.msra.mxu1 %v1772_v54  ;;  %3132 = vmatpush3.bf16.xpose.msra.mxu0 %v1819_v55 }
 0x224   : > { %3127 = vmatprep.mubr.msk.bf16.mxu1 %vm3348_vm1, %v3347_v3  ;;  %3133 = vmatprep.mubr.msk.bf16.mxu0 %vm3348_vm1, %v3347_v3 }
 0x225   : > { %3137 = vmatprep.subr.bf16.mxu1 %v3347_v3  ;;  %3143 = vmatprep.subr.bf16.mxu0 %v3347_v3 }
 0x22a   : > { %3128 = vmatmul.mubr.msk.bf16.vlgmr.msra.gmra.mrb[4].mxu1 %vm1673_vm3, %v1667_v28  ;;  %3134 = vmatmul.mubr.msk.bf16.vlgmr.msra.gmra.mrb[8].mxu0 %vm1673_vm3, %v1668_v59 }
 0x22b   : > { %3139 = vmatprep.mubr.msk.bf16.mxu1 %vm3348_vm1, %v3347_v3  ;;  %3145 = vmatprep.mubr.msk.bf16.mxu0 %vm3348_vm1, %v3347_v3 }
 0x2f5   : > { %v1714_v62 = vpop.f32.mrb[0].mxu1  ;;  %v1761_v63 = vpop.f32.mrb[4].mxu0 }
 0x2f6   : > { %v1862_v2 = vmul.f32 0.35355338, %v1714_v62  ;;  %v1864_v4 = vmul.f32 0.35355338, %v1761_v63  ;;  %v3117_v5 = vpop.f32.mrb[1].mxu1  ;;  %v3123_v6 = vpop.f32.mrb[5].mxu0 }
 0x2f7   : > { %v1717_v7 = vpop.f32.mrb[2].mxu1  ;;  %v1764_v8 = vpop.f32.mrb[6].mxu0 }
 0x2f8   : > { %v1863_v10 = vmul.f32 0.35355338, %v1717_v7  ;;  %v3118_v13 = vpop.f32.mrb[3].mxu1  ;;  %v3124_v29 = vpop.f32.mrb[7].mxu0  ;;  %v1879_v14 = vadd.f32 %v1877_v1, %v1862_v2  ;;  %v1865_v15 = vmul.f32 0.35355338, %v1764_v8  ;;  %v1881_v17 = vadd.f32 %v1877_v1, %v1864_v4 }
 0x2fa   : > { %v1888_v31 = vsel %vm1887_vm6, %v1879_v14, -inf  ;;  %v1880_v18 = vadd.f32 %v1878_v9, %v1863_v10  ;;  %v1894_v32 = vsel %vm1887_vm6, %v1881_v17, -inf  ;;  %v1882_v34 = vadd.f32 %v1878_v9, %v1865_v15 }
 0x2fb   : > { %1889 = vmax.xlane.f32.xlu0 %v1888_v31 }
 0x2fc   : > { %v1891_v19 = vsel %vm1887_vm6, %v1880_v18, -inf  ;;  %v1897_v43 = vsel %vm1887_vm6, %v1882_v34, -inf }
 0x2fd   : > { %1892 = vmax.xlane.f32.xlu1 %v1891_v19  ;;  %v1808_v27 = vpop.f32.mrb[4].mxu1  ;;  %v1855_v30 = vpop.f32.mrb[8].mxu0 }
 0x2fe   : > { %v1866_v35 = vmul.f32 0.35355338, %v1808_v27  ;;  %v1868_v36 = vmul.f32 0.35355338, %v1855_v30  ;;  %v3129_v40 = vpop.f32.mrb[5].mxu1  ;;  %v3135_v41 = vpop.f32.mrb[9].mxu0 }
 0x2ff   : > { %v1811_v46 = vpop.f32.mrb[6].mxu1  ;;  %1895 = vmax.xlane.f32.xlu0 %v1894_v32  ;;  %v1858_v47 = vpop.f32.mrb[10].mxu0 }
 0x300   : > { %v1867_v48 = vmul.f32 0.35355338, %v1811_v46  ;;  %v3130_v42 = vpop.f32.mrb[7].mxu1  ;;  %v3136_v38 = vpop.f32.mrb[11].mxu0  ;;  %v1883_v39 = vadd.f32 %v1877_v1, %v1866_v35  ;;  %v1869_v51 = vmul.f32 0.35355338, %v1858_v47  ;;  %v1885_v45 = vadd.f32 %v1877_v1, %v1868_v36 }
 0x302   : > { %v1900_v52 = vsel %vm1887_vm6, %v1883_v39, -inf  ;;  %v3757_v44 = vadd.f32 %v1878_v9, %v1867_v48  ;;  %v1906_v50 = vsel %vm1887_vm6, %v1885_v45, -inf  ;;  %v1886_v54 = vadd.f32 %v1878_v9, %v1869_v51 }
 0x303   : > { %1901 = vmax.xlane.f32.xlu1 %v1900_v52  ;;  %1898 = vmax.xlane.f32.xlu0 %v1897_v43 }
 0x304   : > { %v1903_v49 = vsel %vm1887_vm6, %v3757_v44, -inf  ;;  %v1909_v55 = vsel %vm1887_vm6, %v1886_v54, -inf }
 0x307   : > { %1904 = vmax.xlane.f32.xlu0 %v1903_v49  ;;  %1907 = vmax.xlane.f32.xlu1 %v1906_v50 }
 0x30b   : > { %1910 = vmax.xlane.f32.xlu0 %v1909_v55 }
 0x318   : > { %1369 = vrot.lane.b32.xlu1 %v3570_v16, %s3356_s19 }
 0x31c   : > { %1373 = vrot.lane.b32.xlu1 %v3584_v22, %s3356_s19 }
 0x320   : > { %1375 = vrot.lane.b32.xlu1 %v3587_v23, %s3356_s19 }
 0x321   : > { %1371 = vrot.lane.b32.xlu0 %v3574_v20, %s3356_s19 }
 0x324   : > { %1379 = vrot.lane.b32.xlu1 %v3591_v24, %s3356_s19 }
 0x325   : > { %1377 = vrot.lane.b32.xlu0 %v3582_v21, %s3356_s19 }
 0x329   : > { %1381 = vrot.lane.b32.xlu0 %v3593_v25, %s3356_s19 }
 0x388   : > { %v1890_v56 = vpop.xlane.xlu0 %1889 }
 0x389   : > { %v1912_v16 = vsub.f32 %v1879_v14, %v1890_v56 }
 0x38a   : > { %v1893_v57 = vpop.xlane.xlu1 %1892 }
 0x38b   : > { %v1920_v58 = vmul.f32 1.442695, %v1912_v16  ;;  %v1913_v22 = vsub.f32 %v1880_v18, %v1893_v57 }
 0x38c   : > { %v1896_v33 = vpop.xlane.xlu0 %1895 }
 0x38d   : > { %3267 = vpow2.f32 %v1920_v58  ;;  %v1922_v23 = vmul.f32 1.442695, %v1913_v22  ;;  %v1914_v28 = vsub.f32 %v1881_v17, %v1896_v33 }
 0x38f   : > { %3269 = vpow2.f32 %v1922_v23  ;;  %v1924_v20 = vmul.f32 1.442695, %v1914_v28 }
 0x390   : > { %v1902_v59 = vpop.xlane.xlu1 %1901  ;;  %v1899_v60 = vpop.xlane.xlu0 %1898 }
 0x391   : > { %3271 = vpow2.f32 %v1924_v20  ;;  %v1916_v24 = vsub.f32 %v1883_v39, %v1902_v59  ;;  %v1915_v61 = vsub.f32 %v1882_v34, %v1899_v60 }
 0x393   : > { %v1926_v21 = vmul.f32 1.442695, %v1915_v61  ;;  %v1928_v62 = vmul.f32 1.442695, %v1916_v24 }
 0x394   : > { %v1905_v63 = vpop.xlane.xlu0 %1904  ;;  %v1908_v25 = vpop.xlane.xlu1 %1907 }
 0x395   : > { %v1918_v0 = vsub.f32 %v1885_v45, %v1908_v25  ;;  %3273 = vpow2.f32 %v1926_v21  ;;  %v1917_v30 = vsub.f32 %v3757_v44, %v1905_v63 }
 0x396   : > { %3275 = vpow2.f32 %v1928_v62 }
 0x397   : > { %v3777_v1 = vpop.eup %3267  ;;  %v1932_v2 = vmul.f32 1.442695, %v1918_v0  ;;  %v1930_v32 = vmul.f32 1.442695, %v1917_v30 }
 0x398   : > { %v1911_v4 = vpop.xlane.xlu0 %1910  ;;  %v1936_v5 = vsel %vm1887_vm6, %v3777_v1, 0.0  ;;  %v1370_v40 = vpop.permute.xlu1 %1369 }
 0x399   : > { %v3781_v6 = vpop.eup %3269  ;;  %v1919_v7 = vsub.f32 %v1886_v54, %v1911_v4  ;;  %1937 = vadd.xlane.f32.xlu1 %v1936_v5  ;;  %3277 = vpow2.f32 %v1932_v2 }
 0x39a   : > { %v1939_v8 = vsel %vm1887_vm6, %v3781_v6, 0.0 }
 0x39b   : > { %v3785_v9 = vpop.eup %3271  ;;  %1940 = vadd.xlane.f32.xlu0 %v1939_v8  ;;  %v1934_v10 = vmul.f32 1.442695, %v1919_v7 }
 0x39c   : > { %v1942_v13 = vsel %vm1887_vm6, %v3785_v9, 0.0  ;;  %v1372_v36 = vpop.permute.xlu0 %1371  ;;  %v1374_v46 = vpop.permute.xlu1 %1373 }
 0x39d   : > { %1943 = vadd.xlane.f32.xlu1 %v1942_v13  ;;  %3279 = vpow2.f32 %v1934_v10 }
 0x39e   : > { %3281 = vpow2.f32 %v1930_v32 }
 0x39f   : > { %v3789_v29 = vpop.eup %3273 }
 0x3a0   : > { %v1945_v14 = vsel %vm1887_vm6, %v3789_v29, 0.0  ;;  %v3793_v15 = vpop.eup %3275  ;;  %v1378_v41 = vpop.permute.xlu0 %1377 }
 0x3a1   : > { %1946 = vadd.xlane.f32.xlu0 %v1945_v14  ;;  %v1948_v17 = vsel %vm1887_vm6, %v3793_v15, 0.0  ;;  %v1376_v48 = vpop.permute.xlu1 %1375  ;;  %v1393_v39 = vcombine.low %v1370_v40, %v1378_v41 }
 0x3a3   : > { %v3797_v31 = vpop.eup %3277  ;;  %v1401_v44 = vrot.slane %v1393_v39, %v3610_v37 }
 0x3a4   : > { %v1954_v18 = vsel %vm1887_vm6, %v3797_v31, 0.0  ;;  %v1382_v47 = vpop.permute.xlu0 %1381 }
 0x3a5   : > { %1949 = vadd.xlane.f32.xlu0 %v1948_v17  ;;  %v1409_v42 = vcombine.low %v1374_v46, %v1382_v47  ;;  %v1410_v38 = vcombine.high %v1374_v46, %v1382_v47  ;;  %v1380_v51 = vpop.permute.xlu1 %1379 }
 0x3a6   : > { %v1461_v28 = vcombine.low %v1372_v36, %v1380_v51  ;;  %v1462_v20 = vcombine.high %v1372_v36, %v1380_v51 }
 0x3a7   : > { %v3801_v19 = vpop.eup %3279  ;;  %v1417_v43 = vrot.slane %v1409_v42, %v3610_v37  ;;  %v1424_v52 = vrot.slane %v1410_v38, %v3610_v37 }
 0x3a8   : > { %v1957_v27 = vsel %vm1887_vm6, %v3801_v19, 0.0  ;;  %v3808_v34 = vpop.eup %3281  ;;  %v1469_v0 = vrot.slane %v1461_v28, %v3610_v37  ;;  %v1476_v2 = vrot.slane %v1462_v20, %v3610_v37 }
 0x3a9   : > { %1955 = vadd.xlane.f32.xlu0 %v1954_v18  ;;  %v1951_v35 = vsel %vm1887_vm6, %v3808_v34, 0.0  ;;  %v1425_v49 = vcombine.low %v1401_v44, %v1417_v43  ;;  %v1426_v50 = vcombine.high %v1401_v44, %v1417_v43 }
 0x3ab   : > { %v1433_v16 = vrot.slane %v1425_v49, %v3631_v53  ;;  %v1440_v57 = vrot.slane %v1426_v50, %v3631_v53 }
 0x3ad   : > { %1958 = vadd.xlane.f32.xlu0 %v1957_v27  ;;  %v1529_v59 = vcombine.low %v1433_v16, %v1440_v57  ;;  %v3020_v60 = vcombine.high %v1433_v16, %v1440_v57 }
 0x3ae   : > { %1383 = vrot.lane.b32.xlu1 %v3597_v26, %s3356_s19  ;;  %v1394_v26 = vcombine.high %v1370_v40, %v1378_v41 }
 0x3af   : > { %v1536_v4 = vrot.slane %v1529_v59, %v3610_v37  ;;  %v1544_v8 = vrot.slane %v3020_v60, %v3610_v37 }
 0x3b0   : > { %v1408_v45 = vrot.slane %v1394_v26, %v3610_v37 }
 0x3b1   : > { %v1561_v41 = vcombine.low %v1536_v4, %v1544_v8  ;;  %v1562_v49 = vcombine.high %v1536_v4, %v1544_v8 }
 0x3b2   : > { %v1441_v54 = vcombine.low %v1408_v45, %v1424_v52  ;;  %v1442_v55 = vcombine.high %v1408_v45, %v1424_v52 }
 0x3b3   : > { %v1569_v45 = vrot.slane %v1561_v41, %v3631_v53  ;;  %v1576_v60 = vrot.slane %v1562_v49, %v3631_v53 }
 0x3b4   : > { %v1449_v58 = vrot.slane %v1441_v54, %v3631_v53  ;;  %v1456_v22 = vrot.slane %v1442_v55, %v3631_v53 }
 0x3b6   : > { %v1545_v24 = vcombine.low %v1449_v58, %v1456_v22  ;;  %v3021_v61 = vcombine.high %v1449_v58, %v1456_v22 }
 0x3b8   : > { %v1552_v10 = vrot.slane %v1545_v24, %v3610_v37  ;;  %v1560_v13 = vrot.slane %v3021_v61, %v3610_v37 }
 0x3ba   : > { %v1577_v46 = vcombine.low %v1552_v10, %v1560_v13  ;;  %v1578_v50 = vcombine.high %v1552_v10, %v1560_v13 }
 0x3bc   : > { %v1592_v24 = vrot.slane %v1578_v50, %v3631_v53 }
 0x3d2   : > { %1952 = vadd.xlane.f32.xlu1 %v1951_v35 }
 0x426   : > { %v1938_v56 = vpop.xlane.xlu1 %1937 }
 0x427   : > { %3283 = vrcp.f32 %v1938_v56  ;;  %v1585_v56 = vrot.slane %v1577_v46, %v3631_v53 }
 0x428   : > { %v1941_v23 = vpop.xlane.xlu0 %1940 }
 0x429   : > { %3285 = vrcp.f32 %v1941_v23 }
 0x42a   : > { %v1944_v33 = vpop.xlane.xlu1 %1943 }
 0x42e   : > { %v1384_v21 = vpop.permute.xlu1 %1383  ;;  %v1947_v25 = vpop.xlane.xlu0 %1946 }
 0x42f   : > { %v1477_v62 = vcombine.low %v1376_v48, %v1384_v21  ;;  %v1478_v63 = vcombine.high %v1376_v48, %v1384_v21  ;;  %3287 = vrcp.f32 %v1947_v25  ;;  %v1593_v21 = vcombine.low %v1569_v45, %v1585_v56 }
 0x430   : > { %3289 = vrcp.f32 %v1944_v33 }
 0x431   : > { %v1485_v5 = vrot.slane %v1477_v62, %v3610_v37  ;;  %v1492_v7 = vrot.slane %v1478_v63, %v3610_v37  ;;  %v3284_v44 = vpop.eup %3283  ;;  %v1594_v63 = vcombine.high %v1569_v45, %v1585_v56 }
 0x432   : > { %v3828_v30 = vpop.xlane.xlu0 %1949  ;;  %v1968_v10 = vmul.f32 %v3284_v44, %v3777_v1 }
 0x433   : > { %v1493_v14 = vcombine.low %v1469_v0, %v1485_v5  ;;  %v1494_v17 = vcombine.high %v1469_v0, %v1485_v5  ;;  %v1509_v18 = vcombine.low %v1476_v2, %v1492_v7  ;;  %v1510_v27 = vcombine.high %v1476_v2, %v1492_v7  ;;  %v3286_v54 = vpop.eup %3285 }
 0x434   : > { %v1969_v0 = vmul.f32 %v3286_v54, %v3781_v6 }
 0x435   : > { %v1501_v32 = vrot.slane %v1493_v14, %v3631_v53  ;;  %v1508_v35 = vrot.slane %v1494_v17, %v3631_v53  ;;  %v1517_v36 = vrot.slane %v1509_v18, %v3631_v53  ;;  %v1524_v40 = vrot.slane %v1510_v27, %v3631_v53 }
 0x436   : > { %v1956_v39 = vpop.xlane.xlu0 %1955  ;;  %v1595_v14 = vcombine.low %v1576_v60, %v1592_v24  ;;  %v1596_v17 = vcombine.high %v1576_v60, %v1592_v24  ;;  %v1976_v18 = vpack.c.bf16 %v1969_v0, %v1968_v10 }
 0x437   : > { %v1597_v47 = vcombine.low %v1501_v32, %v1508_v35  ;;  %v3022_v48 = vcombine.high %v1501_v32, %v1508_v35  ;;  %v1613_v42 = vcombine.low %v1517_v36, %v1524_v40  ;;  %v3023_v38 = vcombine.high %v1517_v36, %v1524_v40 }
 0x439   : > { %v1604_v26 = vrot.slane %v1597_v47, %v3610_v37  ;;  %v1612_v43 = vrot.slane %v3022_v48, %v3610_v37  ;;  %v1620_v51 = vrot.slane %v1613_v42, %v3610_v37  ;;  %v1628_v52 = vrot.slane %v3023_v38, %v3610_v37  ;;  %v3288_v22 = vpop.eup %3287 }
 0x43a   : > { %v1959_v55 = vpop.xlane.xlu0 %1958  ;;  %v3290_v59 = vpop.eup %3289  ;;  %v1971_v2 = vmul.f32 %v3288_v22, %v3789_v29 }
 0x43b   : > { %v1629_v16 = vcombine.low %v1604_v26, %v1612_v43  ;;  %v1645_v57 = vcombine.low %v1620_v51, %v1628_v52  ;;  %v1630_v58 = vcombine.high %v1604_v26, %v1612_v43  ;;  %3291 = vrcp.f32 %v1959_v55 }
 0x43c   : > { %v1646_v33 = vcombine.high %v1620_v51, %v1628_v52  ;;  %3293 = vrcp.f32 %v1956_v39  ;;  %v1970_v13 = vmul.f32 %v3290_v59, %v3785_v9 }
 0x43d   : > { %v1637_v23 = vrot.slane %v1629_v16, %v3631_v53  ;;  %v1653_v28 = vrot.slane %v1645_v57, %v3631_v53  ;;  %v1644_v20 = vrot.slane %v1630_v58, %v3631_v53  ;;  %3295 = vrcp.f32 %v3828_v30 }
 0x43e   : > { %v1660_v61 = vrot.slane %v1646_v33, %v3631_v53  ;;  %v1977_v27 = vpack.c.bf16 %v1971_v2, %v1970_v13 }
 0x43f   : > { %v1661_v62 = vcombine.low %v1637_v23, %v1653_v28  ;;  %v1662_v25 = vcombine.high %v1637_v23, %v1653_v28 }
 0x440   : > { %v1663_v7 = vcombine.low %v1644_v20, %v1660_v61  ;;  %v1664_v8 = vcombine.high %v1644_v20, %v1660_v61 }
 0x441   : > { %v1980_v4 = vpack.c.bf16 %v1661_v62, %v1593_v21  ;;  %v1981_v5 = vpack.c.bf16 %v1662_v25, %v1594_v63 }
 0x442   : > { %v1982_v6 = vpack.c.bf16 %v1663_v7, %v1595_v14  ;;  %v1983_v29 = vpack.c.bf16 %v1664_v8, %v1596_v17 }
 0x443   : > { %3138 = vmatpush3.bf16.msra.mxu1 %v1980_v4  ;;  %3144 = vmatpush3.bf16.msra.mxu0 %v1981_v5 }
 0x444   : > { %3149 = vmatprep.subr.bf16.mxu1 %v3347_v3  ;;  %3155 = vmatprep.subr.bf16.mxu0 %v3347_v3 }
 0x445   : > { %v3292_v32 = vpop.eup %3291 }
 0x446   : > { %3140 = vmatmul.mubr.msk.bf16.vlgmr.msra.gmra.mrb[8].mxu1 %vm1887_vm6, %v1976_v18  ;;  %3146 = vmatmul.mubr.msk.bf16.vlgmr.msra.gmra.mrb[12].mxu0 %vm1887_vm6, %v1977_v27  ;;  %v3294_v1 = vpop.eup %3293  ;;  %v1975_v9 = vmul.f32 %v3292_v32, %v3801_v19 }
 0x447   : > { %3150 = vmatpush3.bf16.msra.mxu1 %v1982_v6  ;;  %3156 = vmatpush3.bf16.msra.mxu0 %v1983_v29  ;;  %v1974_v35 = vmul.f32 %v3294_v1, %v3797_v31  ;;  %v3296_v40 = vpop.eup %3295 }
 0x448   : > { %3157 = vmatprep.mubr.msk.bf16.mxu0 %vm3348_vm1, %v3347_v3  ;;  %3151 = vmatprep.mubr.msk.bf16.mxu1 %vm3348_vm1, %v3347_v3  ;;  %v1972_v46 = vmul.f32 %v3296_v40, %v3793_v15 }
 0x449   : > { %3161 = vmatprep.subr.bf16.mxu1 %v3347_v3  ;;  %3169 = vmatprep.subr.bf16.mxu0 %v3347_v3  ;;  %v1979_v36 = vpack.c.bf16 %v1975_v9, %v1974_v35 }
 0x44e   : > { %3158 = vmatmul.mubr.msk.bf16.vlgmr.msra.gmra.mrb[16].mxu0 %vm1887_vm6, %v1979_v36 }
 0x44f   : > { %3173 = vmatprep.mubr.msk.bf16.mxu0 %vm3348_vm1, %v3347_v3 }
 0x45f   : > { %v1953_v19 = vpop.xlane.xlu1 %1952 }
 0x460   : > { %3297 = vrcp.f32 %v1953_v19 }
 0x46a   : > { %v3298_v41 = vpop.eup %3297 }
 0x46b   : > { %v1973_v47 = vmul.f32 %v3298_v41, %v3808_v34 }
 0x46d   : > { %v1978_v48 = vpack.c.bf16 %v1973_v47, %v1972_v46 }
 0x46f   : > { %3152 = vmatmul.mubr.msk.bf16.vlgmr.msra.gmra.mrb[12].mxu1 %vm1887_vm6, %v1978_v48 }
 0x470   : > { %3165 = vmatprep.mubr.msk.bf16.mxu1 %vm3348_vm1, %v3347_v3 }
 0x519   : > { %v2021_v31 = vpop.f32.mrb[8].mxu1  ;;  %v2065_v42 = vpop.f32.mrb[12].mxu0 }
 0x51a   : > { %v3141_v38 = vpop.f32.mrb[9].mxu1  ;;  %v3147_v39 = vpop.f32.mrb[13].mxu0 }
 0x51b   : > { %v2024_v26 = vpop.f32.mrb[10].mxu1  ;;  %v2068_v30 = vpop.f32.mrb[14].mxu0 }
 0x51c   : > { %v3142_v43 = vpop.f32.mrb[11].mxu1  ;;  %v3148_v51 = vpop.f32.mrb[15].mxu0 }
 0x521   : > { %v2153_v52 = vpop.f32.mrb[16].mxu0 }
 0x522   : > { %v2176_v44 = vcombine.low %v2065_v42, %v2153_v52  ;;  %v2177_v45 = vcombine.high %v2065_v42, %v2153_v52  ;;  %v3159_v15 = vpop.f32.mrb[17].mxu0  ;;  %v3259_v42 = vld [vmem:[%s3492_s22] sm:$0xff]  }
 0x523   : > { %v2156_v49 = vpop.f32.mrb[18].mxu0  ;;  %3162 = vmatpush3.bf16.msra.mxu1 %v3259_v42 }
 0x524   : > { %v2244_v34 = vcombine.low %v2068_v30, %v2156_v49  ;;  %v2245_v50 = vcombine.high %v2068_v30, %v2156_v49  ;;  %v3160_v54 = vpop.f32.mrb[19].mxu0  ;;  %v2184_v58 = vrot.slane %v2176_v44, %v3610_v37  ;;  %v2191_v22 = vrot.slane %v2177_v45, %v3610_v37  ;;  %3163 = vmatprep.subr.bf16.mxu1 %v3347_v3 }
 0x526   : > { %v2252_v63 = vrot.slane %v2244_v34, %v3610_v37  ;;  %v2259_v25 = vrot.slane %v2245_v50, %v3610_v37 }
 0x542   : > { %v2109_v55 = vpop.f32.mrb[12].mxu1 }
 0x543   : > { %v2160_v56 = vcombine.low %v2021_v31, %v2109_v55  ;;  %v2161_v16 = vcombine.high %v2021_v31, %v2109_v55  ;;  %v3153_v57 = vpop.f32.mrb[13].mxu1 }
 0x544   : > { %v2112_v33 = vpop.f32.mrb[14].mxu1 }
 0x545   : > { %v2168_v23 = vrot.slane %v2160_v56, %v3610_v37  ;;  %v2175_v28 = vrot.slane %v2161_v16, %v3610_v37  ;;  %v2228_v20 = vcombine.low %v2024_v26, %v2112_v33  ;;  %v2229_v59 = vcombine.high %v2024_v26, %v2112_v33  ;;  %v3154_v60 = vpop.f32.mrb[15].mxu1  ;;  %v3260_v16 = vld [vmem:[%s3492_s22 + $0x8] sm:$0xff]   ;;  %s3357_s22 = smov 16  }
 0x546   : > { %3164 = vmatpush3.bf16.msra.mxu1 %v3260_v16 }
 0x547   : > { %v2192_v24 = vcombine.low %v2168_v23, %v2184_v58  ;;  %v2193_v61 = vcombine.high %v2168_v23, %v2184_v58  ;;  %v2208_v21 = vcombine.low %v2175_v28, %v2191_v22  ;;  %v2209_v62 = vcombine.high %v2175_v28, %v2191_v22  ;;  %3177 = vmatprep.subr.bf16.mxu1 %v3347_v3 }
 0x548   : > { %v2236_v0 = vrot.slane %v2228_v20, %v3610_v37  ;;  %v2243_v2 = vrot.slane %v2229_v59, %v3610_v37 }
 0x549   : > { %v2200_v4 = vrot.slane %v2192_v24, %v3631_v53  ;;  %v2207_v5 = vrot.slane %v2193_v61, %v3631_v53  ;;  %v2216_v7 = vrot.slane %v2208_v21, %v3631_v53  ;;  %v2223_v8 = vrot.slane %v2209_v62, %v3631_v53 }
 0x54a   : > { %v2260_v10 = vcombine.low %v2236_v0, %v2252_v63  ;;  %v2261_v13 = vcombine.high %v2236_v0, %v2252_v63  ;;  %v2276_v14 = vcombine.low %v2243_v2, %v2259_v25  ;;  %v2277_v17 = vcombine.high %v2243_v2, %v2259_v25 }
 0x54b   : > { %v2296_v18 = vcombine.low %v2200_v4, %v2207_v5  ;;  %v3032_v27 = vcombine.high %v2200_v4, %v2207_v5  ;;  %v2312_v6 = vcombine.low %v2216_v7, %v2223_v8  ;;  %v3033_v29 = vcombine.high %v2216_v7, %v2223_v8 }
 0x54c   : > { %v2268_v32 = vrot.slane %v2260_v10, %v3631_v53  ;;  %v2275_v1 = vrot.slane %v2261_v13, %v3631_v53  ;;  %v2284_v9 = vrot.slane %v2276_v14, %v3631_v53  ;;  %v2291_v35 = vrot.slane %v2277_v17, %v3631_v53 }
 0x54d   : > { %v2303_v36 = vrot.slane %v2296_v18, %v3610_v37  ;;  %v2311_v19 = vrot.slane %v3032_v27, %v3610_v37  ;;  %v2319_v40 = vrot.slane %v2312_v6, %v3610_v37  ;;  %v2327_v41 = vrot.slane %v3033_v29, %v3610_v37 }
 0x54e   : > { %v2364_v46 = vcombine.low %v2268_v32, %v2275_v1  ;;  %v3034_v47 = vcombine.high %v2268_v32, %v2275_v1  ;;  %v2380_v48 = vcombine.low %v2284_v9, %v2291_v35  ;;  %v3035_v31 = vcombine.high %v2284_v9, %v2291_v35  ;;  %v3036_v32 = vld [vmem:[%s4032_s8] ss:$0 sm:$0xff] }
 0x54f   : > { %v2329_v38 = vcombine.high %v2303_v36, %v2311_v19  ;;  %v2345_v39 = vcombine.high %v2319_v40, %v2327_v41  ;;  %v2328_v26 = vcombine.low %v2303_v36, %v2311_v19  ;;  %v2344_v30 = vcombine.low %v2319_v40, %v2327_v41 }
 0x550   : > { %v2371_v43 = vrot.slane %v2364_v46, %v3610_v37  ;;  %v2379_v51 = vrot.slane %v3034_v47, %v3610_v37  ;;  %v2387_v52 = vrot.slane %v2380_v48, %v3610_v37  ;;  %v2395_v44 = vrot.slane %v3035_v31, %v3610_v37 }
 0x551   : > { %v2343_v45 = vrot.slane %v2329_v38, %v3631_v53  ;;  %v2359_v15 = vrot.slane %v2345_v39, %v3631_v53  ;;  %v2336_v49 = vrot.slane %v2328_v26, %v3631_v53  ;;  %v2352_v34 = vrot.slane %v2344_v30, %v3631_v53 }
 0x552   : > { %v2397_v50 = vcombine.high %v2371_v43, %v2379_v51  ;;  %v2413_v54 = vcombine.high %v2387_v52, %v2395_v44  ;;  %v2396_v55 = vcombine.low %v2371_v43, %v2379_v51  ;;  %v2412_v56 = vcombine.low %v2387_v52, %v2395_v44  ;;  %v3261_v52 = vld [vmem:[%s3501_s1] sm:$0xff]   ;;  %v3262_v44 = vld [vmem:[%s3501_s1 + $0x8] sm:$0xff]  }
 0x553   : > { %v2362_v57 = vcombine.low %v2343_v45, %v2359_v15  ;;  %v2360_v58 = vcombine.low %v2336_v49, %v2352_v34  ;;  %v2361_v22 = vcombine.high %v2336_v49, %v2352_v34  ;;  %v2363_v37 = vcombine.high %v2343_v45, %v2359_v15  ;;  %3170 = vmatpush3.bf16.msra.mxu0 %v3261_v52  ;;  %v3263_v45 = vld [vmem:[%s3511_s14] sm:$0xff]   ;;  %v3264_v15 = vld [vmem:[%s3511_s14 + $0x8] sm:$0xff]  }
 0x554   : > { %v2411_v33 = vrot.slane %v2397_v50, %v3631_v53  ;;  %v2427_v23 = vrot.slane %v2413_v54, %v3631_v53  ;;  %v2404_v28 = vrot.slane %v2396_v55, %v3631_v53  ;;  %v2420_v20 = vrot.slane %v2412_v56, %v3631_v53  ;;  %3171 = vmatprep.subr.bf16.mxu0 %v3347_v3  ;;  %v3053_v52 = vld [vmem:[%s686_s15] ss:$0 sm:$0xff] }
 0x556   : > { %v2430_v59 = vcombine.low %v2411_v33, %v2427_v23  ;;  %v2429_v60 = vcombine.high %v2404_v28, %v2420_v20  ;;  %v2428_v24 = vcombine.low %v2404_v28, %v2420_v20  ;;  %v2431_v61 = vcombine.high %v2411_v33, %v2427_v23  ;;  %v3041_v23 = vld [vmem:[%s680_s6] ss:$0 sm:$0xff] }
 0x557   : > { %3172 = vmatpush3.bf16.msra.mxu0 %v3262_v44 }
 0x558   : > { %v3247_v21 = vpack.i.bf16 %v2430_v59, %v2362_v57  ;;  %v3242_v62 = vpack.i.bf16 %v2429_v60, %v2361_v22  ;;  %v3252_v63 = vpack.i.bf16 %v2431_v61, %v2363_v37  ;;  %v3040_v57 = vld [vmem:[%s677_s27] ss:$0 sm:$0xff]  ;;  %v3266_v61 = vld [vmem:[%s3511_s14 + $0x18] sm:$0xff]  }
 0x55a   : > { %3248 = vrot.lane.b32.xlu0 %v3247_v21, %s3357_s22  ;;  %3243 = vrot.lane.b32.xlu1 %v3242_v62, %s3358_s2  ;;  %v3042_v21 = vld [vmem:[%s4034_s23] ss:$0 sm:$0xff] }
 0x55e   : > { %3253 = vrot.lane.b32.xlu1 %v3252_v63, %s3359_s30 }
 0x5cc   : > { %v3249_v25 = vpop.permute.xlu0 %3248  ;;  %v3244_v0 = vpop.permute.xlu1 %3243 }
 0x5cd   : > { %v3246_v2 = vunpack.i.h.bf16 %v3244_v0  ;;  %v3245_v53 = vunpack.i.l.bf16 %v3244_v0  ;;  %v3251_v4 = vunpack.i.h.bf16 %v3249_v25  ;;  %v3250_v5 = vunpack.i.l.bf16 %v3249_v25 }
 0x5cf   : > { %v2456_v7 = vsel %vm1673_vm3, %v2360_v58, %v3245_v53  ;;  %v2457_v8 = vsel %vm1673_vm3, %v2428_v24, %v3246_v2  ;;  %v3265_v24 = vld [vmem:[%s3511_s14 + $0x10] sm:$0xff]   ;;  %s4035_s14 = scalar_lea.vmem %s3996_s9, %s3469_s20 }
 0x5d0   : > { %v3254_v10 = vpop.permute.xlu1 %3253  ;;  %v2458_v17 = vsel %vm1887_vm6, %v2456_v7, %v3250_v5  ;;  %v2459_v18 = vsel %vm1887_vm6, %v2457_v8, %v3251_v4 }
 0x5d1   : > { %v3256_v13 = vunpack.i.h.bf16 %v3254_v10  ;;  %v3255_v14 = vunpack.i.l.bf16 %v3254_v10 }
 0x5d3   : > { %v2461_v27 = vsel %vm2460_vm7, %v2458_v17, %v3255_v14  ;;  %v2462_v6 = vsel %vm2460_vm7, %v2459_v18, %v3256_v13 }
 0x5d4   : > { %v2463_v29 = vpack.c.bf16 %v2462_v6, %v2461_v27 }
 0x5d6   : > { %3166 = vmatmul.mubr.msk.bf16.vlgmr.msra.gmra.mrb[16].mxu1 %vm736_vm2, %v2463_v29 }
 0x5d7   : > { %3185 = vmatprep.mubr.msk.bf16.mxu1 %vm3348_vm1, %v3347_v3  ;;  %3178 = vmatpush3.bf16.msra.mxu1 %v3263_v45 }
 0x5d8   : > { %3179 = vmatprep.subr.bf16.mxu1 %v3347_v3 }
 0x5db   : > { %3180 = vmatpush3.bf16.msra.mxu1 %v3264_v15 }
 0x5dc   : > { %3181 = vmatprep.subr.bf16.mxu1 %v3347_v3 }
 0x5df   : > { %3182 = vmatpush3.bf16.msra.mxu1 %v3265_v24 }
 0x5e0   : > { %3183 = vmatprep.subr.bf16.mxu1 %v3347_v3  ;;  %v3046_v3 = vld [vmem:[%s4035_s14] ss:$0 sm:$0xff] }
 0x5e3   : > { %3184 = vmatpush3.bf16.msra.mxu1 %v3266_v61 }
 0x6a9   : > { %v2524_v1 = vpop.f32.mrb[16].mxu1 }
 0x6aa   : > { %v2525_v9 = vadd.f32 %v3036_v32, %v2524_v1  ;;  %v3167_v35 = vpop.f32.mrb[17].mxu1 }
 0x6ab   : > { %v2527_v36 = vpop.f32.mrb[18].mxu1 }
 0x6ac   : > { %v2528_v19 = vadd.f32 %v3036_v32, %v2527_v36  ;;  %v3168_v40 = vpop.f32.mrb[19].mxu1  ;;  %v2531_v41 = vadd.f32 %v2525_v9, %v3555_v11 }
 0x6ae   : > { %v2535_v46 = vsel %vm736_vm2, %v2531_v41, 0.0  ;;  %v2532_v47 = vadd.f32 %v2528_v19, %v3557_v12 }
 0x6af   : > { %2536 = vadd.xlane.f32.xlu1 %v2535_v46 }
 0x6b0   : > { %v2538_v48 = vsel %vm736_vm2, %v2532_v47, 0.0 }
 0x6b1   : > { %2539 = vadd.xlane.f32.xlu0 %v2538_v48 }
 0x73c   : > { %v2537_v31 = vpop.xlane.xlu1 %2536 }
 0x73d   : > { %v2542_v42 = vmul.f32 0.03125, %v2537_v31 }
 0x73e   : > { %v2540_v38 = vpop.xlane.xlu0 %2539 }
 0x73f   : > { %v2544_v39 = vsub.f32 %v2531_v41, %v2542_v42  ;;  %v2543_v26 = vmul.f32 0.03125, %v2540_v38 }
 0x741   : > { %v2545_v30 = vsub.f32 %v2532_v47, %v2543_v26  ;;  %v2546_v43 = vmul.f32 %v2544_v39, %v2544_v39 }
 0x743   : > { %v2548_v11 = vsel %vm736_vm2, %v2546_v43, 0.0  ;;  %v2547_v51 = vmul.f32 %v2545_v30, %v2545_v30 }
 0x744   : > { %2549 = vadd.xlane.f32.xlu0 %v2548_v11  ;;  %v3052_v11 = vld [vmem:[%s683_s16] ss:$0 sm:$0xff] }
 0x745   : > { %v2551_v12 = vsel %vm736_vm2, %v2547_v51, 0.0 }
 0x746   : > { %2552 = vadd.xlane.f32.xlu1 %v2551_v12 }
 0x7d1   : > { %v2550_v49 = vpop.xlane.xlu0 %2549 }
 0x7d2   : > { %v2554_v34 = vmul.f32 0.03125, %v2550_v49 }
 0x7d3   : > { %v2553_v50 = vpop.xlane.xlu1 %2552 }
 0x7d4   : > { %v2556_v54 = vadd.f32 1e-05, %v2554_v34  ;;  %v2555_v55 = vmul.f32 0.03125, %v2553_v50 }
 0x7d6   : > { %3299 = vrsqrt.f32 %v2556_v54  ;;  %v2557_v56 = vadd.f32 1e-05, %v2555_v55 }
 0x7d8   : > { %3301 = vrsqrt.f32 %v2557_v56 }
 0x7e0   : > { %v3300_v16 = vpop.eup %3299 }
 0x7e1   : > { %v2560_v58 = vmul.f32 %v3300_v16, %v2544_v39 }
 0x7e2   : > { %v3302_v22 = vpop.eup %3301 }
 0x7e3   : > { %v2568_v37 = vmul.f32 %v3040_v57, %v2560_v58  ;;  %v2561_v33 = vmul.f32 %v3302_v22, %v2545_v30 }
 0x7e5   : > { %v2569_v28 = vmul.f32 %v3040_v57, %v2561_v33  ;;  %v2576_v20 = vadd.f32 %v3041_v23, %v2568_v37 }
 0x7e7   : > { %v2577_v59 = vadd.f32 %v3041_v23, %v2569_v28 }
 0x7e9   : > { %v2578_v60 = vpack.c.bf16 %v2577_v59, %v2576_v20 }
 0x7eb   : > { %3174 = vmatmul.mubr.msk.bf16.vlgmr.msra.gmra.mrb[20].mxu0 %vm736_vm2, %v2578_v60 }
 0x8be   : > { %v2639_v62 = vpop.f32.mrb[20].mxu0 }
 0x8bf   : > { %v2640_v63 = vadd.f32 %v3042_v21, %v2639_v62  ;;  %v3175_v25 = vpop.f32.mrb[21].mxu0 }
 0x8c0   : > { %v2642_v0 = vpop.f32.mrb[22].mxu0 }
 0x8c1   : > { %v2643_v2 = vadd.f32 %v3042_v21, %v2642_v0  ;;  %v3176_v53 = vpop.f32.mrb[23].mxu0  ;;  %v2646_v4 = vmax.f32 %v2640_v63, 0.0 }
 0x8c3   : > { %v2647_v5 = vmax.f32 %v2643_v2, 0.0 }
 0x8c5   : > { %v2648_v7 = vpack.c.bf16 %v2647_v5, %v2646_v4 }
 0x8c7   : > { %3186 = vmatmul.mubr.msk.bf16.vlgmr.msra.gmra.mrb[20].mxu1 %vm2688_vm8, %v2648_v7 }
 0x99a   : > { %v2726_v8 = vpop.f32.mrb[20].mxu1 }
 0x99b   : > { %v2727_v10 = vadd.f32 %v3046_v3, %v2726_v8  ;;  %v3187_v13 = vpop.f32.mrb[21].mxu1 }
 0x99c   : > { %v2729_v14 = vpop.f32.mrb[22].mxu1 }
 0x99d   : > { %v2730_v17 = vadd.f32 %v3046_v3, %v2729_v14  ;;  %v3188_v18 = vpop.f32.mrb[23].mxu1  ;;  %v2733_v27 = vadd.f32 %v2727_v10, %v2576_v20 }
 0x99f   : > { %v2737_v6 = vsel %vm736_vm2, %v2733_v27, 0.0  ;;  %v2734_v29 = vadd.f32 %v2730_v17, %v2577_v59 }
 0x9a0   : > { %2738 = vadd.xlane.f32.xlu0 %v2737_v6 }
 0x9a1   : > { %v2740_v32 = vsel %vm736_vm2, %v2734_v29, 0.0 }
 0x9a2   : > { %2741 = vadd.xlane.f32.xlu1 %v2740_v32 }
 0xa2d   : > { %v2739_v1 = vpop.xlane.xlu0 %2738 }
 0xa2e   : > { %v2743_v9 = vmul.f32 0.03125, %v2739_v1 }
 0xa2f   : > { %v2742_v35 = vpop.xlane.xlu1 %2741 }
 0xa30   : > { %v2745_v36 = vsub.f32 %v2733_v27, %v2743_v9  ;;  %v2744_v19 = vmul.f32 0.03125, %v2742_v35 }
 0xa32   : > { %v2746_v40 = vsub.f32 %v2734_v29, %v2744_v19  ;;  %v2747_v41 = vmul.f32 %v2745_v36, %v2745_v36 }
 0xa34   : > { %v2749_v46 = vsel %vm736_vm2, %v2747_v41, 0.0  ;;  %v2748_v47 = vmul.f32 %v2746_v40, %v2746_v40 }
 0xa35   : > { %2750 = vadd.xlane.f32.xlu0 %v2749_v46 }
 0xa36   : > { %v2752_v48 = vsel %vm736_vm2, %v2748_v47, 0.0 }
 0xa37   : > { %2753 = vadd.xlane.f32.xlu1 %v2752_v48 }
 0xac2   : > { %v2751_v31 = vpop.xlane.xlu0 %2750 }
 0xac3   : > { %v2755_v42 = vmul.f32 0.03125, %v2751_v31 }
 0xac4   : > { %v2754_v38 = vpop.xlane.xlu1 %2753 }
 0xac5   : > { %v2757_v39 = vadd.f32 1e-05, %v2755_v42  ;;  %v2756_v26 = vmul.f32 0.03125, %v2754_v38 }
 0xac7   : > { %3303 = vrsqrt.f32 %v2757_v39  ;;  %v2758_v30 = vadd.f32 1e-05, %v2756_v26 }
 0xac9   : > { %3305 = vrsqrt.f32 %v2758_v30 }
 0xad1   : > { %v3304_v43 = vpop.eup %3303 }
 0xad2   : > { %v2761_v51 = vmul.f32 %v3304_v43, %v2745_v36 }
 0xad3   : > { %v3306_v12 = vpop.eup %3305 }
 0xad4   : > { %v2769_v44 = vmul.f32 %v3052_v11, %v2761_v51  ;;  %v2762_v45 = vmul.f32 %v3306_v12, %v2746_v40 }
 0xad6   : > { %v2777_v15 = vadd.f32 %v3053_v52, %v2769_v44  ;;  %v2770_v49 = vmul.f32 %v3052_v11, %v2762_v45 }
 0xad8   : > { %v3065_v34 = vpack.c.bf16 %v2777_v15, %v2777_v15  ;;  %v2778_v50 = vadd.f32 %v3053_v52, %v2770_v49 }
 0xada   : > { %2788 = vst.msk [vmem:[%s3537_s29] sm:$0xf] %vm2787_vm9, %v3065_v34  ;;  %v3066_v54 = vpack.c.bf16 %v2778_v50, %v2778_v50 }
 0xadc   : > { %2789 = vst.msk [vmem:[%s3537_s29 + $0x4] sm:$0xf] %vm2787_vm9, %v3066_v54 }
 0xadd PF: > { %s4036_s2 = sld [smem:[#allocation5_spill]]  ;;  %s4037_s29 = sld [smem:[#allocation3_spill]] }
 0xade   : > { %s4038_s30 = sld [smem:[#allocation4_spill]]  ;;  %s4039_s15 = sld [smem:[#allocation6_spill]] }
 0xadf   : > { %s4040_s16 = sld [smem:[#allocation7_spill]] }
 0xae3   : > { %s24_s17 = sadd.s32 1, %s4036_s2  }
 0xae4   : > { %p21_p8 = scmp.ge.s32.totalorder %s24_s17, 6  }
 0xae6   :  { %23 = sbr.rel (!%p21_p8) target bundleno = 9 (0x9), region = 149 }

</bundles_post_ra>
